<compile_context>
chip_gen: v5e
topology: v5e:2x2
jax: 0.10.0
libtpu: 0.0.40
codegen_flags: <defaults>
</compile_context>

<pallas_src>
import math

import jax
import jax.numpy as jnp
from jax.experimental import pallas as pl
from jax.experimental.pallas import tpu as pltpu

# ------------------------- sizes (small, synthetic) -------------------------
CB = 8        # base feature channels
CC = 8        # content-encoder channels
CS = 8        # style-encoder channels
CD = 8        # discriminator channels
N_STYLE = 4   # style classes
N_CNT = 5     # content classes

_VMEM_LIMIT = 32 * 1024 * 1024   # safe on v5e/v6e/v7x (<= physical everywhere)


# ============ Pallas MXU matmul, lane-dense (Cout, M) orientation ===========
def _make_matmul_kernel(act):
    def kernel(wt_ref, colt_ref, bias_ref, o_ref):
        # Operands are stored bf16 (im2col HBM savings) but upcast before the
        # dot: bf16 x bf16 -> f32 dots are rejected by the CPU/interpret
        # executor, and at these shapes the matmul is launch-bound anyway.
        a = wt_ref[...].astype(jnp.float32)
        b = colt_ref[...].astype(jnp.float32)
        acc = jnp.dot(a, b, preferred_element_type=jnp.float32)
        acc = acc + bias_ref[...]                  # (N,1) broadcast over lanes
        if act == "relu":
            acc = jnp.maximum(acc, 0.0)
        elif act == "lrelu":
            acc = jnp.where(acc > 0.0, acc, 0.2 * acc)
        elif act == "sigmoid":
            acc = jax.nn.sigmoid(acc)              # exp/recip on the EUP slot
        o_ref[...] = acc.astype(o_ref.dtype)
    return kernel


def pallas_matmul_t(wt, colt, bias, act="none", out_dtype=jnp.float32):
    """(N,K) @ (K,M) -> (N,M) with the lane-dense dim (M) last.

    wt: (Cout, K), colt: (K, M) -- both bf16.  bias: (Cout, 1) f32.
    Single grid step at small M (no per-step overhead on single-TC v5e/v6e);
    a bounded 2048-wide lane tile only engages once M grows (v7x VMEM guard).
    """
    N, K = wt.shape
    K2, M = colt.shape
    assert K == K2
    if M > 2048 and M % 2048 == 0:
        tm = 2048
    else:
        tm = M
    nm = M // tm
    return pl.pallas_call(
        _make_matmul_kernel(act),
        grid=(nm,),
        in_specs=[
            pl.BlockSpec((N, K), lambda i: (0, 0)),
            pl.BlockSpec((K, tm), lambda i: (0, i)),
            pl.BlockSpec((N, 1), lambda i: (0, 0)),
        ],
        out_specs=pl.BlockSpec((N, tm), lambda i: (0, i)),
        out_shape=jax.ShapeDtypeStruct((N, M), out_dtype),
        compiler_params=pltpu.CompilerParams(
            dimension_semantics=("parallel",),
            vmem_limit_bytes=_VMEM_LIMIT),
    )(wt, colt, bias)


# ============================== convolution =================================
def _im2col_taps(x, kh, kw, stride, padding):
    B, H, W, _ = x.shape
    xp = jnp.pad(x, ((0, 0), (padding, padding), (padding, padding), (0, 0)))
    Ho = (H + 2 * padding - kh) // stride + 1
    Wo = (W + 2 * padding - kw) // stride + 1
    taps = [xp[:, i:i + stride * Ho:stride, j:j + stride * Wo:stride, :]
            for i in range(kh) for j in range(kw)]
    return taps, Ho, Wo


def conv2d_nhwc(x, w, b, stride=1, padding=1, act="none",
                out_dtype=jnp.float32):
    """NHWC 3x3 conv via host im2col + one Pallas matmul (bias + act fused)."""
    B = x.shape[0]
    kh, kw, Cin, Cout = w.shape
    # bf16 BEFORE im2col: col^T is a kh*kw-fold expansion of the activation.
    taps, Ho, Wo = _im2col_taps(x.astype(jnp.bfloat16), kh, kw, stride, padding)
    M = B * Ho * Wo
    colt = jnp.concatenate([t.reshape(M, Cin).T for t in taps], axis=0)  # (K,M)
    wt = w.reshape(kh * kw * Cin, Cout).T.astype(jnp.bfloat16)           # (N,K)
    bias = b.astype(jnp.float32).reshape(Cout, 1)
    out = pallas_matmul_t(wt, colt, bias, act=act, out_dtype=out_dtype)  # (N,M)
    return out.T.reshape(B, Ho, Wo, Cout)


# ============== fused loss-reduction kernel (ONE launch total) ==============
def _lane2d(x):
    x = x.astype(jnp.float32).reshape(-1)
    n = x.shape[0]
    if n % 128 == 0:
        return x.reshape(n // 128, 128)
    return x.reshape(1, n)


def _bchw_flat(f):
    """(B,H,W,C) -> (B, C, H*W) f32 for the in-kernel gram einsum."""
    B, H, W, C = f.shape
    return f.reshape(B, H * W, C).transpose(0, 2, 1).astype(jnp.float32)


def _make_loss_kernel(flags, diff_l1, inv1, inv2):
    use_cla, use_gan, use_perc, use_gram, use_cycle = flags

    def reduce_diff(d):
        return jnp.sum(jnp.abs(d)) if diff_l1 else jnp.sum(d * d)

    def kernel(*refs):
        o_ref = refs[-1]
        it = iter(refs[:-1])
        idx = 0
        if use_cla:
            # style-classifier head folded in (tiny (B,CD)@(CD,NS) matmul)
            pooled = next(it)[...]
            wsc = next(it)[...]
            bsc = next(it)[...]
            oh = next(it)[...]
            logits = jnp.dot(pooled, wsc,
                             preferred_element_type=jnp.float32) + bsc
            m = jnp.max(logits, axis=-1, keepdims=True)
            lse = m + jnp.log(jnp.sum(jnp.exp(logits - m), axis=-1,
                                      keepdims=True))
            tgt = jnp.sum(oh * logits, axis=-1, keepdims=True)
            o_ref[idx] = jnp.sum(lse - tgt)
            idx += 1
        if use_gan:
            # d_bc patch head folded in: (Md,Kd)@(Kd,1), LSGAN real target 1.0
            col = next(it)[...]
            wbc = next(it)[...]
            bbc = next(it)[...]
            bc = jnp.dot(col, wbc, preferred_element_type=jnp.float32) + bbc
            d = bc - 1.0
            o_ref[idx] = jnp.sum(d * d)
            idx += 1
        if use_perc:
            a = next(it)[...]
            bt = next(it)[...]
            o_ref[idx] = reduce_diff(a - bt)
            idx += 1
        if use_gram:
            f1t = next(it)[...]
            f2t = next(it)[...]
            pf1 = next(it)[...]
            pf2 = next(it)[...]

            def gram(f, inv):
                return jnp.einsum("bcn,bdn->bcd", f, f,
                                  preferred_element_type=jnp.float32) * inv

            o_ref[idx] = reduce_diff(gram(pf1, inv1) - gram(f1t, inv1))
            idx += 1
            o_ref[idx] = reduce_diff(gram(pf2, inv2) - gram(f2t, inv2))
            idx += 1
        if use_cycle:
            a = next(it)[...]
            bt = next(it)[...]
            o_ref[idx] = reduce_diff(a - bt)
            idx += 1
    return kernel


def fused_loss_sums(cla_in, gan_in, perc_in, gram_in, cycle_in, diff_l1,
                    inv1=1.0, inv2=1.0):
    """All loss reductions (CE head, GAN patch head, perceptual, 2 grams,
    cycle) of the forward pass in ONE Pallas launch.  Returns raw sums; the
    host divides by element counts and applies weights."""
    flags = (cla_in is not None, gan_in is not None, perc_in is not None,
             gram_in is not None, cycle_in is not None)
    n_terms = (int(flags[0]) + int(flags[1]) + int(flags[2])
               + 2 * int(flags[3]) + int(flags[4]))
    if n_terms == 0:
        return []
    operands, in_specs = [], []
    for grp in (cla_in, gan_in, perc_in, gram_in, cycle_in):
        if grp is None:
            continue
        for x in grp:
            x = x.astype(jnp.float32)
            operands.append(x)
            in_specs.append(
                pl.BlockSpec(x.shape, lambda i, _nd=x.ndim: (0,) * _nd))
    sums = pl.pallas_call(
        _make_loss_kernel(flags, diff_l1, inv1, inv2),
        grid=(1,),
        in_specs=in_specs,
        out_specs=pl.BlockSpec(memory_space=pltpu.MemorySpace.SMEM),
        out_shape=jax.ShapeDtypeStruct((n_terms,), jnp.float32),
    )(*operands)
    return [sums[i] for i in range(n_terms)]


# ============================== parameters ==================================
def init_params(key):
    ks = jax.random.split(key, 11)

    def conv_p(k, cin, cout, kh=3, kw=3):
        scale = 1.0 / math.sqrt(cin * kh * kw)
        return (jax.random.normal(k, (kh, kw, cin, cout), jnp.float32) * scale,
                jnp.zeros((cout,), jnp.float32))

    def lin_p(k, cin, cout):
        scale = 1.0 / math.sqrt(cin)
        return (jax.random.normal(k, (cin, cout), jnp.float32) * scale,
                jnp.zeros((cout,), jnp.float32))

    return {
        "base":  conv_p(ks[0], 3, CB),
        "cenc":  conv_p(ks[1], CB, CC),
        "senc1": conv_p(ks[2], 2 * CB, CS),
        "senc2": conv_p(ks[3], CS, CS),
        "mod":   lin_p(ks[4], CS, CC),
        "dec":   conv_p(ks[5], CC, 3),
        "d1":    conv_p(ks[6], 3, CD),
        "d2":    conv_p(ks[7], CD, CD),
        "d_bc":  conv_p(ks[8], CD, 1),
        "d_sc":  lin_p(ks[9], CD, N_STYLE),
        "d_cc":  lin_p(ks[10], CD, N_CNT),  # forward() discards cc_out; kept for parity
    }


# ============================ generator (net) ===============================
def base_net(p, x):
    w, b = p["base"]
    # base features only feed further convs -> bf16 storage is lossless
    # relative to the bf16 cast those convs do anyway.
    return conv2d_nhwc(x, w, b, act="relu", out_dtype=jnp.bfloat16)


def cenc(p, f):
    w, b = p["cenc"]
    return conv2d_nhwc(f, w, b, act="relu", out_dtype=jnp.float32)  # feeds loss


def senc_feats(p, base_cat):
    """Style-encoder feature maps f1, f2 on a 2*CB-channel input."""
    w1, b1 = p["senc1"]
    f1 = conv2d_nhwc(base_cat, w1, b1, act="relu", out_dtype=jnp.float32)
    w2, b2 = p["senc2"]
    f2 = conv2d_nhwc(f1, w2, b2, act="relu", out_dtype=jnp.float32)
    return f1, f2


def senc_feats_dup(p, base):
    """senc(cat([base, base], dim=1)) via summed weight halves.

    The two channel halves see identical data, so summing w1[...,:CB,:] and
    w1[...,CB:,:] is mathematically exact, halves K (144 -> 72) and avoids
    materializing the duplicated concat.
    """
    w1, b1 = p["senc1"]
    w1s = w1[:, :, :CB, :] + w1[:, :, CB:, :]
    f1 = conv2d_nhwc(base, w1s, b1, act="relu", out_dtype=jnp.float32)
    w2, b2 = p["senc2"]
    f2 = conv2d_nhwc(f1, w2, b2, act="relu", out_dtype=jnp.float32)
    return f1, f2


def decoder(p, content_ftr, style_code):
    wm, bm = p["mod"]
    # Tiny (B,CS)x(CS,CC) linear: a standalone pallas_call at this size is
    # pure launch overhead -> plain XLA dot.
    mod = jnp.dot(style_code, wm) + bm
    h = content_ftr * (1.0 + mod[:, None, None, :])      # AdaIN-style modulation
    wd, bd = p["dec"]
    return conv2d_nhwc(h, wd, bd, act="sigmoid", out_dtype=jnp.float32)


# ========================== discriminator (dnet) ============================
def discriminator_feats(p, img):
    """PatchDiscriminator trunk.

    Returns the im2col'd ingredients of the patch (GAN) head plus pooled
    features for the style head -- BOTH heads are folded into the fused loss
    kernel.  The content head is skipped: ae_gan.forward() discards cc_out.
    """
    w1, b1 = p["d1"]
    h = conv2d_nhwc(img, w1, b1, stride=2, padding=1, act="lrelu",
                    out_dtype=jnp.bfloat16)
    w2, b2 = p["d2"]
    h = conv2d_nhwc(h, w2, b2, stride=2, padding=1, act="lrelu",
                    out_dtype=jnp.float32)
    pooled = jnp.mean(h, axis=(1, 2))                     # (B, CD)
    wbc, bbc = p["d_bc"]
    taps, Ho, Wo = _im2col_taps(h.astype(jnp.float32), 3, 3, 1, 1)
    B = h.shape[0]
    colbc = jnp.concatenate(taps, axis=-1).reshape(B * Ho * Wo, -1)  # (Md, 9*CD)
    return colbc, wbc.reshape(-1, 1), bbc.reshape(1, 1).astype(jnp.float32), pooled


# ============================== ae_gan.forward ==============================
def ae_gan_forward(params, inputs, labels, st_inputs, st_labels, args):
    del labels  # clabel only feeds the (discarded) content head in forward()
    B = inputs.shape[0]
    x = jnp.transpose(inputs, (0, 2, 3, 1))               # NCHW -> NHWC
    sx = jnp.transpose(st_inputs, (0, 2, 3, 1))

    # ---------------- generator (mask_autoencoder.forward) -----------------
    base_both = base_net(params, jnp.concatenate([x, sx], axis=0))
    b1, b2 = base_both[:B], base_both[B:]
    ftr1 = cenc(params, b1)                                # content features

    senc_in = jnp.concatenate(
        [jnp.concatenate([b2, b2], axis=-1),               # -> grm2 targets
         jnp.concatenate([b1, b2], axis=-1)], axis=0)      # -> aux12 code
    f1, f2 = senc_feats(params, senc_in)
    aux12 = jnp.mean(f2[B:], axis=(1, 2))                  # global avg pool (B,CS)
    img12 = decoder(params, ftr1, aux12)                   # NHWC, sigmoid output

    # ---------------- discriminator on generated image ---------------------
    colbc, wbc_mat, bbc11, pooled12 = discriminator_feats(params, img12)

    # ---------------- gan_style_loss (fused into one kernel) ---------------
    diff_l1 = not args["use_mse"]
    cla_in = gan_in = perc_in = gram_in = cycle_in = None
    if args["cla_w"] > 0:
        wsc, bsc = params["d_sc"]
        onehot = jax.nn.one_hot(st_labels, N_STYLE, dtype=jnp.float32)
        cla_in = (pooled12, wsc, bsc.reshape(1, -1), onehot)
    if args["gan_w"] > 0:
        gan_in = (colbc, wbc_mat, bbc11)                   # add_gan_real (target 1)

    need_perc = (args["per_w"] > 0 or args["gram_w"] > 0 or args["cycle_w"] > 0)
    inv1 = inv2 = 1.0
    if need_perc:
        # TODO(synk): blur_flag (gaussian blur before perceptual features) not implemented.
        base12 = base_net(params, img12)
        ftr12 = cenc(params, base12)
        pf1, pf2 = senc_feats_dup(params, base12)          # == senc(cat[base12,base12])
        perc_in = (_lane2d(ftr12), _lane2d(jax.lax.stop_gradient(ftr1)))
        inv1 = 1.0 / float(pf1.shape[1] * pf1.shape[2] * pf1.shape[3])
        inv2 = 1.0 / float(pf2.shape[1] * pf2.shape[2] * pf2.shape[3])
        gram_in = (jax.lax.stop_gradient(_bchw_flat(f1[:B])),
                   jax.lax.stop_gradient(_bchw_flat(f2[:B])),
                   _bchw_flat(pf1), _bchw_flat(pf2))
        if args["cycle_w"] > 0:
            # senc(cat(base12.detach(), base12.detach())) has the identical
            # forward value to the senc call above -> reuse its pooled code.
            cycle12 = jax.lax.stop_gradient(jnp.mean(pf2, axis=(1, 2)))
            cycle_in = (aux12, cycle12)

    sums = fused_loss_sums(cla_in, gan_in, perc_in, gram_in, cycle_in,
                           diff_l1, inv1, inv2)

    ls = []
    si = 0
    if args["cla_w"] > 0:
        ls.append(args["cla_w"] * sums[si] / B)
        si += 1
    if args["gan_w"] > 0:
        ls.append(args["gan_w"] * sums[si] / colbc.shape[0])
        si += 1
    if need_perc:
        ls.append(args["per_w"] * sums[si] / ftr12.size)
        si += 1
        g1_size = B * pf1.shape[3] * pf1.shape[3]
        g2_size = B * pf2.shape[3] * pf2.shape[3]
        ls.append(args["gram_w"] * sums[si] / g1_size)
        si += 1
        ls.append(args["gram_w"] * sums[si] / g2_size)
        si += 1
        if args["cycle_w"] > 0:
            ls.append(args["cycle_w"] * sums[si] / aux12.size)
            si += 1

    return ls, jnp.transpose(img12, (0, 3, 1, 2))          # NHWC -> NCHW


# ==================================== main ==================================
if __name__ == "__main__":
    key = jax.random.PRNGKey(0)
    k_in, k_st, k_lab, k_slab, k_par = jax.random.split(key, 5)
    B, H, W = 2, 16, 16
    inputs = jax.random.uniform(k_in, (B, 3, H, W), dtype=jnp.float32)
    st_inputs = jax.random.uniform(k_st, (B, 3, H, W), dtype=jnp.float32)
    labels = jax.random.randint(k_lab, (B,), 0, N_CNT)
    st_labels = jax.random.randint(k_slab, (B,), 0, N_STYLE)
    params = init_params(k_par)

    args = dict(cla_w=1.0, gan_w=1.0, per_w=1.0, gram_w=1.0, cycle_w=1.0,
                use_mse=False)

    fwd = jax.jit(lambda p, a, lab, b, slab:
                  ae_gan_forward(p, a, lab, b, slab, args))
    losses, img12 = fwd(params, inputs, labels, st_inputs, st_labels)

    for l in losses:
        jax.block_until_ready(l)
    jax.block_until_ready(img12)
    assert img12.shape == (B, 3, H, W)
    assert all(bool(jnp.isfinite(l)) for l in losses)
    print("KERNEL_OK")
</pallas_src>

<mosaic_0001>
module attributes {stable_mosaic.version = 11 : i64} {
  func.func @kernel(%arg0: i32, %arg1: memref<8x27xbf16, #tpu.memory_space<vmem>>, %arg2: memref<27x1024xbf16, #tpu.memory_space<vmem>>, %arg3: memref<8x1xf32, #tpu.memory_space<vmem>>, %arg4: memref<8x1024xbf16, #tpu.memory_space<vmem>>) attributes {dimension_semantics = [#tpu.dimension_semantics<parallel>], iteration_bounds = array<i64: 1>, scalar_prefetch = 0 : i64, scratch_operands = 0 : i64, tpu.core_type = #tpu.core_type<tc>, window_params = [{pipeline_mode = #tpu.pipeline_mode<synchronous>, transform_indices = @transform_0, window_bounds = array<i64: 8, 27>}, {transform_indices = @transform_1, window_bounds = array<i64: 27, 1024>}, {pipeline_mode = #tpu.pipeline_mode<synchronous>, transform_indices = @transform_2, window_bounds = array<i64: 8, 1>}, {transform_indices = @transform_3, window_bounds = array<i64: 8, 1024>}]} {
    %c0 = arith.constant 0 : index
    %c0_0 = arith.constant 0 : index
    %0 = vector.load %arg1[%c0, %c0_0] : memref<8x27xbf16, #tpu.memory_space<vmem>>, vector<8x27xbf16>
    %1 = arith.extf %0 : vector<8x27xbf16> to vector<8x27xf32>
    %c0_1 = arith.constant 0 : index
    %c0_2 = arith.constant 0 : index
    %2 = vector.load %arg2[%c0_1, %c0_2] : memref<27x1024xbf16, #tpu.memory_space<vmem>>, vector<27x1024xbf16>
    %3 = arith.extf %2 : vector<27x1024xbf16> to vector<27x1024xf32>
    %cst = arith.constant dense<0.000000e+00> : vector<8x1024xf32>
    %4 = tpu.matmul %1, %3, %cst {dimension_numbers = #tpu.dot_dimension_numbers<[1], [0], [0], [1], [0, 0, 1, 1], [], []>} : vector<8x27xf32>, vector<27x1024xf32>, vector<8x1024xf32> -> vector<8x1024xf32>
    %c0_3 = arith.constant 0 : index
    %c0_4 = arith.constant 0 : index
    %5 = vector.load %arg3[%c0_3, %c0_4] : memref<8x1xf32, #tpu.memory_space<vmem>>, vector<8x1xf32>
    %6 = vector.broadcast %5 : vector<8x1xf32> to vector<8x1024xf32>
    %7 = arith.addf %4, %6 : vector<8x1024xf32>
    %cst_5 = arith.constant 0.000000e+00 : f32
    %8 = vector.broadcast %cst_5 : f32 to vector<8x1024xf32>
    %9 = arith.maximumf %7, %8 : vector<8x1024xf32>
    %10 = arith.truncf %9 : vector<8x1024xf32> to vector<8x1024xbf16>
    %c0_6 = arith.constant 0 : index
    %c0_7 = arith.constant 0 : index
    %11 = vector.load %arg4[%c0_6, %c0_7] : memref<8x1024xbf16, #tpu.memory_space<vmem>>, vector<8x1024xbf16>
    tpu.vector_store %arg4[%c0_6, %c0_7], %10 {strides = array<i32>} : memref<8x1024xbf16, #tpu.memory_space<vmem>>, vector<8x1024xbf16>,
    return
  }
  func.func @transform_0(%arg0: i32) -> (i32, i32) {
    %c0_i32 = arith.constant 0 : i32
    %c0_i32_0 = arith.constant 0 : i32
    %c0_i32_1 = arith.constant 0 : i32
    return %c0_i32, %c0_i32_0 : i32, i32
  }
  func.func @transform_1(%arg0: i32) -> (i32, i32) {
    %c0_i32 = arith.constant 0 : i32
    %c0_i32_0 = arith.constant 0 : i32
    return %c0_i32, %arg0 : i32, i32
  }
  func.func @transform_2(%arg0: i32) -> (i32, i32) {
    %c0_i32 = arith.constant 0 : i32
    %c0_i32_0 = arith.constant 0 : i32
    %c0_i32_1 = arith.constant 0 : i32
    return %c0_i32, %c0_i32_0 : i32, i32
  }
  func.func @transform_3(%arg0: i32) -> (i32, i32) {
    %c0_i32 = arith.constant 0 : i32
    %c0_i32_0 = arith.constant 0 : i32
    return %c0_i32, %arg0 : i32, i32
  }
}

module attributes {stable_mosaic.version = 11 : i64} {
  func.func @kernel(%arg0: i32, %arg1: memref<8x144xbf16, #tpu.memory_space<vmem>>, %arg2: memref<144x1024xbf16, #tpu.memory_space<vmem>>, %arg3: memref<8x1xf32, #tpu.memory_space<vmem>>, %arg4: memref<8x1024xf32, #tpu.memory_space<vmem>>) attributes {dimension_semantics = [#tpu.dimension_semantics<parallel>], iteration_bounds = array<i64: 1>, scalar_prefetch = 0 : i64, scratch_operands = 0 : i64, tpu.core_type = #tpu.core_type<tc>, window_params = [{pipeline_mode = #tpu.pipeline_mode<synchronous>, transform_indices = @transform_0, window_bounds = array<i64: 8, 144>}, {transform_indices = @transform_1, window_bounds = array<i64: 144, 1024>}, {pipeline_mode = #tpu.pipeline_mode<synchronous>, transform_indices = @transform_2, window_bounds = array<i64: 8, 1>}, {transform_indices = @transform_3, window_bounds = array<i64: 8, 1024>}]} {
    %c0 = arith.constant 0 : index
    %c0_0 = arith.constant 0 : index
    %0 = vector.load %arg1[%c0, %c0_0] : memref<8x144xbf16, #tpu.memory_space<vmem>>, vector<8x144xbf16>
    %1 = arith.extf %0 : vector<8x144xbf16> to vector<8x144xf32>
    %c0_1 = arith.constant 0 : index
    %c0_2 = arith.constant 0 : index
    %2 = vector.load %arg2[%c0_1, %c0_2] : memref<144x1024xbf16, #tpu.memory_space<vmem>>, vector<144x1024xbf16>
    %3 = arith.extf %2 : vector<144x1024xbf16> to vector<144x1024xf32>
    %cst = arith.constant dense<0.000000e+00> : vector<8x1024xf32>
    %4 = tpu.matmul %1, %3, %cst {dimension_numbers = #tpu.dot_dimension_numbers<[1], [0], [0], [1], [0, 0, 1, 1], [], []>} : vector<8x144xf32>, vector<144x1024xf32>, vector<8x1024xf32> -> vector<8x1024xf32>
    %c0_3 = arith.constant 0 : index
    %c0_4 = arith.constant 0 : index
    %5 = vector.load %arg3[%c0_3, %c0_4] : memref<8x1xf32, #tpu.memory_space<vmem>>, vector<8x1xf32>
    %6 = vector.broadcast %5 : vector<8x1xf32> to vector<8x1024xf32>
    %7 = arith.addf %4, %6 : vector<8x1024xf32>
    %cst_5 = arith.constant 0.000000e+00 : f32
    %8 = vector.broadcast %cst_5 : f32 to vector<8x1024xf32>
    %9 = arith.maximumf %7, %8 : vector<8x1024xf32>
    %c0_6 = arith.constant 0 : index
    %c0_7 = arith.constant 0 : index
    %10 = vector.load %arg4[%c0_6, %c0_7] : memref<8x1024xf32, #tpu.memory_space<vmem>>, vector<8x1024xf32>
    tpu.vector_store %arg4[%c0_6, %c0_7], %9 {strides = array<i32>} : memref<8x1024xf32, #tpu.memory_space<vmem>>, vector<8x1024xf32>,
    return
  }
  func.func @transform_0(%arg0: i32) -> (i32, i32) {
    %c0_i32 = arith.constant 0 : i32
    %c0_i32_0 = arith.constant 0 : i32
    %c0_i32_1 = arith.constant 0 : i32
    return %c0_i32, %c0_i32_0 : i32, i32
  }
  func.func @transform_1(%arg0: i32) -> (i32, i32) {
    %c0_i32 = arith.constant 0 : i32
    %c0_i32_0 = arith.constant 0 : i32
    return %c0_i32, %arg0 : i32, i32
  }
  func.func @transform_2(%arg0: i32) -> (i32, i32) {
    %c0_i32 = arith.constant 0 : i32
    %c0_i32_0 = arith.constant 0 : i32
    %c0_i32_1 = arith.constant 0 : i32
    return %c0_i32, %c0_i32_0 : i32, i32
  }
  func.func @transform_3(%arg0: i32) -> (i32, i32) {
    %c0_i32 = arith.constant 0 : i32
    %c0_i32_0 = arith.constant 0 : i32
    return %c0_i32, %arg0 : i32, i32
  }
}

module attributes {stable_mosaic.version = 11 : i64} {
  func.func @kernel(%arg0: i32, %arg1: memref<8x72xbf16, #tpu.memory_space<vmem>>, %arg2: memref<72x1024xbf16, #tpu.memory_space<vmem>>, %arg3: memref<8x1xf32, #tpu.memory_space<vmem>>, %arg4: memref<8x1024xf32, #tpu.memory_space<vmem>>) attributes {dimension_semantics = [#tpu.dimension_semantics<parallel>], iteration_bounds = array<i64: 1>, scalar_prefetch = 0 : i64, scratch_operands = 0 : i64, tpu.core_type = #tpu.core_type<tc>, window_params = [{pipeline_mode = #tpu.pipeline_mode<synchronous>, transform_indices = @transform_0, window_bounds = array<i64: 8, 72>}, {transform_indices = @transform_1, window_bounds = array<i64: 72, 1024>}, {pipeline_mode = #tpu.pipeline_mode<synchronous>, transform_indices = @transform_2, window_bounds = array<i64: 8, 1>}, {transform_indices = @transform_3, window_bounds = array<i64: 8, 1024>}]} {
    %c0 = arith.constant 0 : index
    %c0_0 = arith.constant 0 : index
    %0 = vector.load %arg1[%c0, %c0_0] : memref<8x72xbf16, #tpu.memory_space<vmem>>, vector<8x72xbf16>
    %1 = arith.extf %0 : vector<8x72xbf16> to vector<8x72xf32>
    %c0_1 = arith.constant 0 : index
    %c0_2 = arith.constant 0 : index
    %2 = vector.load %arg2[%c0_1, %c0_2] : memref<72x1024xbf16, #tpu.memory_space<vmem>>, vector<72x1024xbf16>
    %3 = arith.extf %2 : vector<72x1024xbf16> to vector<72x1024xf32>
    %cst = arith.constant dense<0.000000e+00> : vector<8x1024xf32>
    %4 = tpu.matmul %1, %3, %cst {dimension_numbers = #tpu.dot_dimension_numbers<[1], [0], [0], [1], [0, 0, 1, 1], [], []>} : vector<8x72xf32>, vector<72x1024xf32>, vector<8x1024xf32> -> vector<8x1024xf32>
    %c0_3 = arith.constant 0 : index
    %c0_4 = arith.constant 0 : index
    %5 = vector.load %arg3[%c0_3, %c0_4] : memref<8x1xf32, #tpu.memory_space<vmem>>, vector<8x1xf32>
    %6 = vector.broadcast %5 : vector<8x1xf32> to vector<8x1024xf32>
    %7 = arith.addf %4, %6 : vector<8x1024xf32>
    %cst_5 = arith.constant 0.000000e+00 : f32
    %8 = vector.broadcast %cst_5 : f32 to vector<8x1024xf32>
    %9 = arith.maximumf %7, %8 : vector<8x1024xf32>
    %c0_6 = arith.constant 0 : index
    %c0_7 = arith.constant 0 : index
    %10 = vector.load %arg4[%c0_6, %c0_7] : memref<8x1024xf32, #tpu.memory_space<vmem>>, vector<8x1024xf32>
    tpu.vector_store %arg4[%c0_6, %c0_7], %9 {strides = array<i32>} : memref<8x1024xf32, #tpu.memory_space<vmem>>, vector<8x1024xf32>,
    return
  }
  func.func @transform_0(%arg0: i32) -> (i32, i32) {
    %c0_i32 = arith.constant 0 : i32
    %c0_i32_0 = arith.constant 0 : i32
    %c0_i32_1 = arith.constant 0 : i32
    return %c0_i32, %c0_i32_0 : i32, i32
  }
  func.func @transform_1(%arg0: i32) -> (i32, i32) {
    %c0_i32 = arith.constant 0 : i32
    %c0_i32_0 = arith.constant 0 : i32
    return %c0_i32, %arg0 : i32, i32
  }
  func.func @transform_2(%arg0: i32) -> (i32, i32) {
    %c0_i32 = arith.constant 0 : i32
    %c0_i32_0 = arith.constant 0 : i32
    %c0_i32_1 = arith.constant 0 : i32
    return %c0_i32, %c0_i32_0 : i32, i32
  }
  func.func @transform_3(%arg0: i32) -> (i32, i32) {
    %c0_i32 = arith.constant 0 : i32
    %c0_i32_0 = arith.constant 0 : i32
    return %c0_i32, %arg0 : i32, i32
  }
}

module attributes {stable_mosaic.version = 11 : i64} {
  func.func @kernel(%arg0: i32, %arg1: memref<8x72xbf16, #tpu.memory_space<vmem>>, %arg2: memref<72x512xbf16, #tpu.memory_space<vmem>>, %arg3: memref<8x1xf32, #tpu.memory_space<vmem>>, %arg4: memref<8x512xf32, #tpu.memory_space<vmem>>) attributes {dimension_semantics = [#tpu.dimension_semantics<parallel>], iteration_bounds = array<i64: 1>, scalar_prefetch = 0 : i64, scratch_operands = 0 : i64, tpu.core_type = #tpu.core_type<tc>, window_params = [{pipeline_mode = #tpu.pipeline_mode<synchronous>, transform_indices = @transform_0, window_bounds = array<i64: 8, 72>}, {transform_indices = @transform_1, window_bounds = array<i64: 72, 512>}, {pipeline_mode = #tpu.pipeline_mode<synchronous>, transform_indices = @transform_2, window_bounds = array<i64: 8, 1>}, {transform_indices = @transform_3, window_bounds = array<i64: 8, 512>}]} {
    %c0 = arith.constant 0 : index
    %c0_0 = arith.constant 0 : index
    %0 = vector.load %arg1[%c0, %c0_0] : memref<8x72xbf16, #tpu.memory_space<vmem>>, vector<8x72xbf16>
    %1 = arith.extf %0 : vector<8x72xbf16> to vector<8x72xf32>
    %c0_1 = arith.constant 0 : index
    %c0_2 = arith.constant 0 : index
    %2 = vector.load %arg2[%c0_1, %c0_2] : memref<72x512xbf16, #tpu.memory_space<vmem>>, vector<72x512xbf16>
    %3 = arith.extf %2 : vector<72x512xbf16> to vector<72x512xf32>
    %cst = arith.constant dense<0.000000e+00> : vector<8x512xf32>
    %4 = tpu.matmul %1, %3, %cst {dimension_numbers = #tpu.dot_dimension_numbers<[1], [0], [0], [1], [0, 0, 1, 1], [], []>} : vector<8x72xf32>, vector<72x512xf32>, vector<8x512xf32> -> vector<8x512xf32>
    %c0_3 = arith.constant 0 : index
    %c0_4 = arith.constant 0 : index
    %5 = vector.load %arg3[%c0_3, %c0_4] : memref<8x1xf32, #tpu.memory_space<vmem>>, vector<8x1xf32>
    %6 = vector.broadcast %5 : vector<8x1xf32> to vector<8x512xf32>
    %7 = arith.addf %4, %6 : vector<8x512xf32>
    %cst_5 = arith.constant 0.000000e+00 : f32
    %8 = vector.broadcast %cst_5 : f32 to vector<8x512xf32>
    %9 = arith.maximumf %7, %8 : vector<8x512xf32>
    %c0_6 = arith.constant 0 : index
    %c0_7 = arith.constant 0 : index
    %10 = vector.load %arg4[%c0_6, %c0_7] : memref<8x512xf32, #tpu.memory_space<vmem>>, vector<8x512xf32>
    tpu.vector_store %arg4[%c0_6, %c0_7], %9 {strides = array<i32>} : memref<8x512xf32, #tpu.memory_space<vmem>>, vector<8x512xf32>,
    return
  }
  func.func @transform_0(%arg0: i32) -> (i32, i32) {
    %c0_i32 = arith.constant 0 : i32
    %c0_i32_0 = arith.constant 0 : i32
    %c0_i32_1 = arith.constant 0 : i32
    return %c0_i32, %c0_i32_0 : i32, i32
  }
  func.func @transform_1(%arg0: i32) -> (i32, i32) {
    %c0_i32 = arith.constant 0 : i32
    %c0_i32_0 = arith.constant 0 : i32
    return %c0_i32, %arg0 : i32, i32
  }
  func.func @transform_2(%arg0: i32) -> (i32, i32) {
    %c0_i32 = arith.constant 0 : i32
    %c0_i32_0 = arith.constant 0 : i32
    %c0_i32_1 = arith.constant 0 : i32
    return %c0_i32, %c0_i32_0 : i32, i32
  }
  func.func @transform_3(%arg0: i32) -> (i32, i32) {
    %c0_i32 = arith.constant 0 : i32
    %c0_i32_0 = arith.constant 0 : i32
    return %c0_i32, %arg0 : i32, i32
  }
}

module attributes {stable_mosaic.version = 11 : i64} {
  func.func @kernel(%arg0: i32, %arg1: memref<3x72xbf16, #tpu.memory_space<vmem>>, %arg2: memref<72x512xbf16, #tpu.memory_space<vmem>>, %arg3: memref<3x1xf32, #tpu.memory_space<vmem>>, %arg4: memref<3x512xf32, #tpu.memory_space<vmem>>) attributes {dimension_semantics = [#tpu.dimension_semantics<parallel>], iteration_bounds = array<i64: 1>, scalar_prefetch = 0 : i64, scratch_operands = 0 : i64, tpu.core_type = #tpu.core_type<tc>, window_params = [{pipeline_mode = #tpu.pipeline_mode<synchronous>, transform_indices = @transform_0, window_bounds = array<i64: 3, 72>}, {transform_indices = @transform_1, window_bounds = array<i64: 72, 512>}, {pipeline_mode = #tpu.pipeline_mode<synchronous>, transform_indices = @transform_2, window_bounds = array<i64: 3, 1>}, {transform_indices = @transform_3, window_bounds = array<i64: 3, 512>}]} {
    %c0 = arith.constant 0 : index
    %c0_0 = arith.constant 0 : index
    %0 = vector.load %arg1[%c0, %c0_0] : memref<3x72xbf16, #tpu.memory_space<vmem>>, vector<3x72xbf16>
    %1 = arith.extf %0 : vector<3x72xbf16> to vector<3x72xf32>
    %c0_1 = arith.constant 0 : index
    %c0_2 = arith.constant 0 : index
    %2 = vector.load %arg2[%c0_1, %c0_2] : memref<72x512xbf16, #tpu.memory_space<vmem>>, vector<72x512xbf16>
    %3 = arith.extf %2 : vector<72x512xbf16> to vector<72x512xf32>
    %cst = arith.constant dense<0.000000e+00> : vector<3x512xf32>
    %4 = tpu.matmul %1, %3, %cst {dimension_numbers = #tpu.dot_dimension_numbers<[1], [0], [0], [1], [0, 0, 1, 1], [], []>} : vector<3x72xf32>, vector<72x512xf32>, vector<3x512xf32> -> vector<3x512xf32>
    %c0_3 = arith.constant 0 : index
    %c0_4 = arith.constant 0 : index
    %5 = vector.load %arg3[%c0_3, %c0_4] : memref<3x1xf32, #tpu.memory_space<vmem>>, vector<3x1xf32>
    %6 = vector.broadcast %5 : vector<3x1xf32> to vector<3x512xf32>
    %7 = arith.addf %4, %6 : vector<3x512xf32>
    %8 = arith.negf %7 : vector<3x512xf32>
    %9 = math.exp %8 : vector<3x512xf32>
    %cst_5 = arith.constant 1.000000e+00 : f32
    %10 = vector.broadcast %cst_5 : f32 to vector<3x512xf32>
    %11 = arith.addf %10, %9 : vector<3x512xf32>
    %12 = arith.divf %10, %11 : vector<3x512xf32>
    %c0_6 = arith.constant 0 : index
    %c0_7 = arith.constant 0 : index
    %13 = vector.load %arg4[%c0_6, %c0_7] : memref<3x512xf32, #tpu.memory_space<vmem>>, vector<3x512xf32>
    tpu.vector_store %arg4[%c0_6, %c0_7], %12 {strides = array<i32>} : memref<3x512xf32, #tpu.memory_space<vmem>>, vector<3x512xf32>,
    return
  }
  func.func @transform_0(%arg0: i32) -> (i32, i32) {
    %c0_i32 = arith.constant 0 : i32
    %c0_i32_0 = arith.constant 0 : i32
    %c0_i32_1 = arith.constant 0 : i32
    return %c0_i32, %c0_i32_0 : i32, i32
  }
  func.func @transform_1(%arg0: i32) -> (i32, i32) {
    %c0_i32 = arith.constant 0 : i32
    %c0_i32_0 = arith.constant 0 : i32
    return %c0_i32, %arg0 : i32, i32
  }
  func.func @transform_2(%arg0: i32) -> (i32, i32) {
    %c0_i32 = arith.constant 0 : i32
    %c0_i32_0 = arith.constant 0 : i32
    %c0_i32_1 = arith.constant 0 : i32
    return %c0_i32, %c0_i32_0 : i32, i32
  }
  func.func @transform_3(%arg0: i32) -> (i32, i32) {
    %c0_i32 = arith.constant 0 : i32
    %c0_i32_0 = arith.constant 0 : i32
    return %c0_i32, %arg0 : i32, i32
  }
}

module attributes {stable_mosaic.version = 11 : i64} {
  func.func @kernel(%arg0: i32, %arg1: memref<8x27xbf16, #tpu.memory_space<vmem>>, %arg2: memref<27x512xbf16, #tpu.memory_space<vmem>>, %arg3: memref<8x1xf32, #tpu.memory_space<vmem>>, %arg4: memref<8x512xbf16, #tpu.memory_space<vmem>>) attributes {dimension_semantics = [#tpu.dimension_semantics<parallel>], iteration_bounds = array<i64: 1>, scalar_prefetch = 0 : i64, scratch_operands = 0 : i64, tpu.core_type = #tpu.core_type<tc>, window_params = [{pipeline_mode = #tpu.pipeline_mode<synchronous>, transform_indices = @transform_0, window_bounds = array<i64: 8, 27>}, {transform_indices = @transform_1, window_bounds = array<i64: 27, 512>}, {pipeline_mode = #tpu.pipeline_mode<synchronous>, transform_indices = @transform_2, window_bounds = array<i64: 8, 1>}, {transform_indices = @transform_3, window_bounds = array<i64: 8, 512>}]} {
    %c0 = arith.constant 0 : index
    %c0_0 = arith.constant 0 : index
    %0 = vector.load %arg1[%c0, %c0_0] : memref<8x27xbf16, #tpu.memory_space<vmem>>, vector<8x27xbf16>
    %1 = arith.extf %0 : vector<8x27xbf16> to vector<8x27xf32>
    %c0_1 = arith.constant 0 : index
    %c0_2 = arith.constant 0 : index
    %2 = vector.load %arg2[%c0_1, %c0_2] : memref<27x512xbf16, #tpu.memory_space<vmem>>, vector<27x512xbf16>
    %3 = arith.extf %2 : vector<27x512xbf16> to vector<27x512xf32>
    %cst = arith.constant dense<0.000000e+00> : vector<8x512xf32>
    %4 = tpu.matmul %1, %3, %cst {dimension_numbers = #tpu.dot_dimension_numbers<[1], [0], [0], [1], [0, 0, 1, 1], [], []>} : vector<8x27xf32>, vector<27x512xf32>, vector<8x512xf32> -> vector<8x512xf32>
    %c0_3 = arith.constant 0 : index
    %c0_4 = arith.constant 0 : index
    %5 = vector.load %arg3[%c0_3, %c0_4] : memref<8x1xf32, #tpu.memory_space<vmem>>, vector<8x1xf32>
    %6 = vector.broadcast %5 : vector<8x1xf32> to vector<8x512xf32>
    %7 = arith.addf %4, %6 : vector<8x512xf32>
    %cst_5 = arith.constant 0.000000e+00 : f32
    %8 = vector.broadcast %cst_5 : f32 to vector<8x512xf32>
    %9 = arith.maximumf %7, %8 : vector<8x512xf32>
    %10 = arith.truncf %9 : vector<8x512xf32> to vector<8x512xbf16>
    %c0_6 = arith.constant 0 : index
    %c0_7 = arith.constant 0 : index
    %11 = vector.load %arg4[%c0_6, %c0_7] : memref<8x512xbf16, #tpu.memory_space<vmem>>, vector<8x512xbf16>
    tpu.vector_store %arg4[%c0_6, %c0_7], %10 {strides = array<i32>} : memref<8x512xbf16, #tpu.memory_space<vmem>>, vector<8x512xbf16>,
    return
  }
  func.func @transform_0(%arg0: i32) -> (i32, i32) {
    %c0_i32 = arith.constant 0 : i32
    %c0_i32_0 = arith.constant 0 : i32
    %c0_i32_1 = arith.constant 0 : i32
    return %c0_i32, %c0_i32_0 : i32, i32
  }
  func.func @transform_1(%arg0: i32) -> (i32, i32) {
    %c0_i32 = arith.constant 0 : i32
    %c0_i32_0 = arith.constant 0 : i32
    return %c0_i32, %arg0 : i32, i32
  }
  func.func @transform_2(%arg0: i32) -> (i32, i32) {
    %c0_i32 = arith.constant 0 : i32
    %c0_i32_0 = arith.constant 0 : i32
    %c0_i32_1 = arith.constant 0 : i32
    return %c0_i32, %c0_i32_0 : i32, i32
  }
  func.func @transform_3(%arg0: i32) -> (i32, i32) {
    %c0_i32 = arith.constant 0 : i32
    %c0_i32_0 = arith.constant 0 : i32
    return %c0_i32, %arg0 : i32, i32
  }
}

module attributes {stable_mosaic.version = 11 : i64} {
  func.func @kernel(%arg0: i32, %arg1: memref<8x27xbf16, #tpu.memory_space<vmem>>, %arg2: memref<27x128xbf16, #tpu.memory_space<vmem>>, %arg3: memref<8x1xf32, #tpu.memory_space<vmem>>, %arg4: memref<8x128xbf16, #tpu.memory_space<vmem>>) attributes {dimension_semantics = [#tpu.dimension_semantics<parallel>], iteration_bounds = array<i64: 1>, scalar_prefetch = 0 : i64, scratch_operands = 0 : i64, tpu.core_type = #tpu.core_type<tc>, window_params = [{pipeline_mode = #tpu.pipeline_mode<synchronous>, transform_indices = @transform_0, window_bounds = array<i64: 8, 27>}, {transform_indices = @transform_1, window_bounds = array<i64: 27, 128>}, {pipeline_mode = #tpu.pipeline_mode<synchronous>, transform_indices = @transform_2, window_bounds = array<i64: 8, 1>}, {transform_indices = @transform_3, window_bounds = array<i64: 8, 128>}]} {
    %c0 = arith.constant 0 : index
    %c0_0 = arith.constant 0 : index
    %0 = vector.load %arg1[%c0, %c0_0] : memref<8x27xbf16, #tpu.memory_space<vmem>>, vector<8x27xbf16>
    %1 = arith.extf %0 : vector<8x27xbf16> to vector<8x27xf32>
    %c0_1 = arith.constant 0 : index
    %c0_2 = arith.constant 0 : index
    %2 = vector.load %arg2[%c0_1, %c0_2] : memref<27x128xbf16, #tpu.memory_space<vmem>>, vector<27x128xbf16>
    %3 = arith.extf %2 : vector<27x128xbf16> to vector<27x128xf32>
    %cst = arith.constant dense<0.000000e+00> : vector<8x128xf32>
    %4 = tpu.matmul %1, %3, %cst {dimension_numbers = #tpu.dot_dimension_numbers<[1], [0], [0], [1], [0, 0, 1, 1], [], []>} : vector<8x27xf32>, vector<27x128xf32>, vector<8x128xf32> -> vector<8x128xf32>
    %c0_3 = arith.constant 0 : index
    %c0_4 = arith.constant 0 : index
    %5 = vector.load %arg3[%c0_3, %c0_4] : memref<8x1xf32, #tpu.memory_space<vmem>>, vector<8x1xf32>
    %6 = vector.broadcast %5 : vector<8x1xf32> to vector<8x128xf32>
    %7 = arith.addf %4, %6 : vector<8x128xf32>
    %cst_5 = arith.constant 0.000000e+00 : f32
    %8 = vector.broadcast %cst_5 : f32 to vector<8x128xf32>
    %9 = arith.cmpf ogt, %7, %8 : vector<8x128xf32>
    %cst_6 = arith.constant 2.000000e-01 : f32
    %10 = vector.broadcast %cst_6 : f32 to vector<8x128xf32>
    %11 = arith.mulf %10, %7 : vector<8x128xf32>
    %12 = arith.select %9, %7, %11 : vector<8x128xi1>, vector<8x128xf32>
    %13 = arith.truncf %12 : vector<8x128xf32> to vector<8x128xbf16>
    %c0_7 = arith.constant 0 : index
    %c0_8 = arith.constant 0 : index
    %14 = vector.load %arg4[%c0_7, %c0_8] : memref<8x128xbf16, #tpu.memory_space<vmem>>, vector<8x128xbf16>
    tpu.vector_store %arg4[%c0_7, %c0_8], %13 {strides = array<i32>} : memref<8x128xbf16, #tpu.memory_space<vmem>>, vector<8x128xbf16>,
    return
  }
  func.func @transform_0(%arg0: i32) -> (i32, i32) {
    %c0_i32 = arith.constant 0 : i32
    %c0_i32_0 = arith.constant 0 : i32
    %c0_i32_1 = arith.constant 0 : i32
    return %c0_i32, %c0_i32_0 : i32, i32
  }
  func.func @transform_1(%arg0: i32) -> (i32, i32) {
    %c0_i32 = arith.constant 0 : i32
    %c0_i32_0 = arith.constant 0 : i32
    return %c0_i32, %arg0 : i32, i32
  }
  func.func @transform_2(%arg0: i32) -> (i32, i32) {
    %c0_i32 = arith.constant 0 : i32
    %c0_i32_0 = arith.constant 0 : i32
    %c0_i32_1 = arith.constant 0 : i32
    return %c0_i32, %c0_i32_0 : i32, i32
  }
  func.func @transform_3(%arg0: i32) -> (i32, i32) {
    %c0_i32 = arith.constant 0 : i32
    %c0_i32_0 = arith.constant 0 : i32
    return %c0_i32, %arg0 : i32, i32
  }
}

module attributes {stable_mosaic.version = 11 : i64} {
  func.func @kernel(%arg0: i32, %arg1: memref<8x72xbf16, #tpu.memory_space<vmem>>, %arg2: memref<72x32xbf16, #tpu.memory_space<vmem>>, %arg3: memref<8x1xf32, #tpu.memory_space<vmem>>, %arg4: memref<8x32xf32, #tpu.memory_space<vmem>>) attributes {dimension_semantics = [#tpu.dimension_semantics<parallel>], iteration_bounds = array<i64: 1>, scalar_prefetch = 0 : i64, scratch_operands = 0 : i64, tpu.core_type = #tpu.core_type<tc>, window_params = [{pipeline_mode = #tpu.pipeline_mode<synchronous>, transform_indices = @transform_0, window_bounds = array<i64: 8, 72>}, {transform_indices = @transform_1, window_bounds = array<i64: 72, 32>}, {pipeline_mode = #tpu.pipeline_mode<synchronous>, transform_indices = @transform_2, window_bounds = array<i64: 8, 1>}, {transform_indices = @transform_3, window_bounds = array<i64: 8, 32>}]} {
    %c0 = arith.constant 0 : index
    %c0_0 = arith.constant 0 : index
    %0 = vector.load %arg1[%c0, %c0_0] : memref<8x72xbf16, #tpu.memory_space<vmem>>, vector<8x72xbf16>
    %1 = arith.extf %0 : vector<8x72xbf16> to vector<8x72xf32>
    %c0_1 = arith.constant 0 : index
    %c0_2 = arith.constant 0 : index
    %2 = vector.load %arg2[%c0_1, %c0_2] : memref<72x32xbf16, #tpu.memory_space<vmem>>, vector<72x32xbf16>
    %3 = arith.extf %2 : vector<72x32xbf16> to vector<72x32xf32>
    %cst = arith.constant dense<0.000000e+00> : vector<8x32xf32>
    %4 = tpu.matmul %1, %3, %cst {dimension_numbers = #tpu.dot_dimension_numbers<[1], [0], [0], [1], [0, 0, 1, 1], [], []>} : vector<8x72xf32>, vector<72x32xf32>, vector<8x32xf32> -> vector<8x32xf32>
    %c0_3 = arith.constant 0 : index
    %c0_4 = arith.constant 0 : index
    %5 = vector.load %arg3[%c0_3, %c0_4] : memref<8x1xf32, #tpu.memory_space<vmem>>, vector<8x1xf32>
    %6 = vector.broadcast %5 : vector<8x1xf32> to vector<8x32xf32>
    %7 = arith.addf %4, %6 : vector<8x32xf32>
    %cst_5 = arith.constant 0.000000e+00 : f32
    %8 = vector.broadcast %cst_5 : f32 to vector<8x32xf32>
    %9 = arith.cmpf ogt, %7, %8 : vector<8x32xf32>
    %cst_6 = arith.constant 2.000000e-01 : f32
    %10 = vector.broadcast %cst_6 : f32 to vector<8x32xf32>
    %11 = arith.mulf %10, %7 : vector<8x32xf32>
    %12 = arith.select %9, %7, %11 : vector<8x32xi1>, vector<8x32xf32>
    %c0_7 = arith.constant 0 : index
    %c0_8 = arith.constant 0 : index
    %13 = vector.load %arg4[%c0_7, %c0_8] : memref<8x32xf32, #tpu.memory_space<vmem>>, vector<8x32xf32>
    tpu.vector_store %arg4[%c0_7, %c0_8], %12 {strides = array<i32>} : memref<8x32xf32, #tpu.memory_space<vmem>>, vector<8x32xf32>,
    return
  }
  func.func @transform_0(%arg0: i32) -> (i32, i32) {
    %c0_i32 = arith.constant 0 : i32
    %c0_i32_0 = arith.constant 0 : i32
    %c0_i32_1 = arith.constant 0 : i32
    return %c0_i32, %c0_i32_0 : i32, i32
  }
  func.func @transform_1(%arg0: i32) -> (i32, i32) {
    %c0_i32 = arith.constant 0 : i32
    %c0_i32_0 = arith.constant 0 : i32
    return %c0_i32, %arg0 : i32, i32
  }
  func.func @transform_2(%arg0: i32) -> (i32, i32) {
    %c0_i32 = arith.constant 0 : i32
    %c0_i32_0 = arith.constant 0 : i32
    %c0_i32_1 = arith.constant 0 : i32
    return %c0_i32, %c0_i32_0 : i32, i32
  }
  func.func @transform_3(%arg0: i32) -> (i32, i32) {
    %c0_i32 = arith.constant 0 : i32
    %c0_i32_0 = arith.constant 0 : i32
    return %c0_i32, %arg0 : i32, i32
  }
}

module attributes {stable_mosaic.version = 11 : i64} {
  func.func @kernel(%arg0: i32, %arg1: memref<2x8xf32, #tpu.memory_space<vmem>>, %arg2: memref<8x4xf32, #tpu.memory_space<vmem>>, %arg3: memref<1x4xf32, #tpu.memory_space<vmem>>, %arg4: memref<2x4xf32, #tpu.memory_space<vmem>>, %arg5: memref<32x72xf32, #tpu.memory_space<vmem>>, %arg6: memref<72x1xf32, #tpu.memory_space<vmem>>, %arg7: memref<1x1xf32, #tpu.memory_space<vmem>>, %arg8: memref<32x128xf32, #tpu.memory_space<vmem>>, %arg9: memref<32x128xf32, #tpu.memory_space<vmem>>, %arg10: memref<2x8x256xf32, #tpu.memory_space<vmem>>, %arg11: memref<2x8x256xf32, #tpu.memory_space<vmem>>, %arg12: memref<2x8x256xf32, #tpu.memory_space<vmem>>, %arg13: memref<2x8x256xf32, #tpu.memory_space<vmem>>, %arg14: memref<2x8xf32, #tpu.memory_space<vmem>>, %arg15: memref<2x8xf32, #tpu.memory_space<vmem>>, %arg16: memref<6xf32, #tpu.memory_space<smem>>) attributes {dimension_semantics = [#tpu.dimension_semantics<arbitrary>], iteration_bounds = array<i64: 1>, scalar_prefetch = 0 : i64, scratch_operands = 0 : i64, tpu.core_type = #tpu.core_type<tc>, window_params = [{pipeline_mode = #tpu.pipeline_mode<synchronous>, transform_indices = @transform_0, window_bounds = array<i64: 2, 8>}, {pipeline_mode = #tpu.pipeline_mode<synchronous>, transform_indices = @transform_1, window_bounds = array<i64: 8, 4>}, {pipeline_mode = #tpu.pipeline_mode<synchronous>, transform_indices = @transform_2, window_bounds = array<i64: 1, 4>}, {pipeline_mode = #tpu.pipeline_mode<synchronous>, transform_indices = @transform_3, window_bounds = array<i64: 2, 4>}, {pipeline_mode = #tpu.pipeline_mode<synchronous>, transform_indices = @transform_4, window_bounds = array<i64: 32, 72>}, {pipeline_mode = #tpu.pipeline_mode<synchronous>, transform_indices = @transform_5, window_bounds = array<i64: 72, 1>}, {pipeline_mode = #tpu.pipeline_mode<synchronous>, transform_indices = @transform_6, window_bounds = array<i64: 1, 1>}, {pipeline_mode = #tpu.pipeline_mode<synchronous>, transform_indices = @transform_7, window_bounds = array<i64: 32, 128>}, {pipeline_mode = #tpu.pipeline_mode<synchronous>, transform_indices = @transform_8, window_bounds = array<i64: 32, 128>}, {pipeline_mode = #tpu.pipeline_mode<synchronous>, transform_indices = @transform_9, window_bounds = array<i64: 2, 8, 256>}, {pipeline_mode = #tpu.pipeline_mode<synchronous>, transform_indices = @transform_10, window_bounds = array<i64: 2, 8, 256>}, {pipeline_mode = #tpu.pipeline_mode<synchronous>, transform_indices = @transform_11, window_bounds = array<i64: 2, 8, 256>}, {pipeline_mode = #tpu.pipeline_mode<synchronous>, transform_indices = @transform_12, window_bounds = array<i64: 2, 8, 256>}, {pipeline_mode = #tpu.pipeline_mode<synchronous>, transform_indices = @transform_13, window_bounds = array<i64: 2, 8>}, {pipeline_mode = #tpu.pipeline_mode<synchronous>, transform_indices = @transform_14, window_bounds = array<i64: 2, 8>}, {transform_indices = @transform_15, window_bounds = array<i64: 6>}]} {
    %c0 = arith.constant 0 : index
    %c0_0 = arith.constant 0 : index
    %0 = vector.load %arg1[%c0, %c0_0] : memref<2x8xf32, #tpu.memory_space<vmem>>, vector<2x8xf32>
    %c0_1 = arith.constant 0 : index
    %c0_2 = arith.constant 0 : index
    %1 = vector.load %arg2[%c0_1, %c0_2] : memref<8x4xf32, #tpu.memory_space<vmem>>, vector<8x4xf32>
    %c0_3 = arith.constant 0 : index
    %c0_4 = arith.constant 0 : index
    %2 = vector.load %arg3[%c0_3, %c0_4] : memref<1x4xf32, #tpu.memory_space<vmem>>, vector<1x4xf32>
    %c0_5 = arith.constant 0 : index
    %c0_6 = arith.constant 0 : index
    %3 = vector.load %arg4[%c0_5, %c0_6] : memref<2x4xf32, #tpu.memory_space<vmem>>, vector<2x4xf32>
    %cst = arith.constant dense<0.000000e+00> : vector<2x4xf32>
    %4 = tpu.matmul %0, %1, %cst {dimension_numbers = #tpu.dot_dimension_numbers<[1], [0], [0], [1], [0, 0, 1, 1], [], []>} : vector<2x8xf32>, vector<8x4xf32>, vector<2x4xf32> -> vector<2x4xf32>
    %5 = vector.broadcast %2 : vector<1x4xf32> to vector<2x4xf32>
    %6 = arith.addf %4, %5 : vector<2x4xf32>
    %cst_7 = arith.constant dense<0xFF800000> : vector<2xf32>
    %7 = vector.multi_reduction <maximumf>, %6, %cst_7 [1] : vector<2x4xf32> to vector<2xf32>
    %8 = vector.shape_cast %7 : vector<2xf32> to vector<2x1xf32>
    %9 = vector.broadcast %8 : vector<2x1xf32> to vector<2x4xf32>
    %10 = arith.subf %6, %9 : vector<2x4xf32>
    %11 = math.exp %10 : vector<2x4xf32>
    %cst_8 = arith.constant dense<0.000000e+00> : vector<2xf32>
    %12 = vector.multi_reduction <add>, %11, %cst_8 [1] : vector<2x4xf32> to vector<2xf32>
    %13 = vector.shape_cast %12 : vector<2xf32> to vector<2x1xf32>
    %14 = math.log %13 : vector<2x1xf32>
    %15 = arith.addf %8, %14 : vector<2x1xf32>
    %16 = arith.mulf %3, %6 : vector<2x4xf32>
    %cst_9 = arith.constant dense<0.000000e+00> : vector<2xf32>
    %17 = vector.multi_reduction <add>, %16, %cst_9 [1] : vector<2x4xf32> to vector<2xf32>
    %18 = vector.shape_cast %17 : vector<2xf32> to vector<2x1xf32>
    %19 = arith.subf %15, %18 : vector<2x1xf32>
    %20 = vector.shape_cast %19 : vector<2x1xf32> to vector<1x2x1xf32>
    %cst_10 = arith.constant dense<0.000000e+00> : vector<1xf32>
    %21 = vector.multi_reduction <add>, %20, %cst_10 [1, 2] : vector<1x2x1xf32> to vector<1xf32>
    %22 = vector.shape_cast %21 : vector<1xf32> to vector<1x1x1xf32>
    %23 = vector.extract %22[0, 0, 0] : f32 from vector<1x1x1xf32>
    %c0_11 = arith.constant 0 : index
    %24 = memref.load %arg16[%c0_11] : memref<6xf32, #tpu.memory_space<smem>>
    memref.store %23, %arg16[%c0_11] : memref<6xf32, #tpu.memory_space<smem>>
    %c0_12 = arith.constant 0 : index
    %c0_13 = arith.constant 0 : index
    %25 = vector.load %arg5[%c0_12, %c0_13] : memref<32x72xf32, #tpu.memory_space<vmem>>, vector<32x72xf32>
    %c0_14 = arith.constant 0 : index
    %c0_15 = arith.constant 0 : index
    %26 = vector.load %arg6[%c0_14, %c0_15] : memref<72x1xf32, #tpu.memory_space<vmem>>, vector<72x1xf32>
    %c0_16 = arith.constant 0 : index
    %c0_17 = arith.constant 0 : index
    %27 = vector.load %arg7[%c0_16, %c0_17] : memref<1x1xf32, #tpu.memory_space<vmem>>, vector<1x1xf32>
    %cst_18 = arith.constant dense<0.000000e+00> : vector<32x1xf32>
    %28 = tpu.matmul %25, %26, %cst_18 {dimension_numbers = #tpu.dot_dimension_numbers<[1], [0], [0], [1], [0, 0, 1, 1], [], []>} : vector<32x72xf32>, vector<72x1xf32>, vector<32x1xf32> -> vector<32x1xf32>
    %29 = vector.broadcast %27 : vector<1x1xf32> to vector<32x1xf32>
    %30 = arith.addf %28, %29 : vector<32x1xf32>
    %cst_19 = arith.constant 1.000000e+00 : f32
    %31 = vector.broadcast %cst_19 : f32 to vector<32x1xf32>
    %32 = arith.subf %30, %31 : vector<32x1xf32>
    %33 = arith.mulf %32, %32 : vector<32x1xf32>
    %34 = vector.shape_cast %33 : vector<32x1xf32> to vector<1x32x1xf32>
    %cst_20 = arith.constant dense<0.000000e+00> : vector<1xf32>
    %35 = vector.multi_reduction <add>, %34, %cst_20 [1, 2] : vector<1x32x1xf32> to vector<1xf32>
    %36 = vector.shape_cast %35 : vector<1xf32> to vector<1x1x1xf32>
    %37 = vector.extract %36[0, 0, 0] : f32 from vector<1x1x1xf32>
    %c1 = arith.constant 1 : index
    %38 = memref.load %arg16[%c1] : memref<6xf32, #tpu.memory_space<smem>>
    memref.store %37, %arg16[%c1] : memref<6xf32, #tpu.memory_space<smem>>
    %c0_21 = arith.constant 0 : index
    %c0_22 = arith.constant 0 : index
    %39 = vector.load %arg8[%c0_21, %c0_22] : memref<32x128xf32, #tpu.memory_space<vmem>>, vector<32x128xf32>
    %c0_23 = arith.constant 0 : index
    %c0_24 = arith.constant 0 : index
    %40 = vector.load %arg9[%c0_23, %c0_24] : memref<32x128xf32, #tpu.memory_space<vmem>>, vector<32x128xf32>
    %41 = arith.subf %39, %40 : vector<32x128xf32>
    %42 = math.absf %41 : vector<32x128xf32>
    %43 = vector.shape_cast %42 : vector<32x128xf32> to vector<1x32x128xf32>
    %cst_25 = arith.constant dense<0.000000e+00> : vector<1xf32>
    %44 = vector.multi_reduction <add>, %43, %cst_25 [1, 2] : vector<1x32x128xf32> to vector<1xf32>
    %45 = vector.shape_cast %44 : vector<1xf32> to vector<1x1x1xf32>
    %46 = vector.extract %45[0, 0, 0] : f32 from vector<1x1x1xf32>
    %c2 = arith.constant 2 : index
    %47 = memref.load %arg16[%c2] : memref<6xf32, #tpu.memory_space<smem>>
    memref.store %46, %arg16[%c2] : memref<6xf32, #tpu.memory_space<smem>>
    %c0_26 = arith.constant 0 : index
    %c0_27 = arith.constant 0 : index
    %c0_28 = arith.constant 0 : index
    %48 = vector.load %arg10[%c0_26, %c0_27, %c0_28] : memref<2x8x256xf32, #tpu.memory_space<vmem>>, vector<2x8x256xf32>
    %c0_29 = arith.constant 0 : index
    %c0_30 = arith.constant 0 : index
    %c0_31 = arith.constant 0 : index
    %49 = vector.load %arg11[%c0_29, %c0_30, %c0_31] : memref<2x8x256xf32, #tpu.memory_space<vmem>>, vector<2x8x256xf32>
    %c0_32 = arith.constant 0 : index
    %c0_33 = arith.constant 0 : index
    %c0_34 = arith.constant 0 : index
    %50 = vector.load %arg12[%c0_32, %c0_33, %c0_34] : memref<2x8x256xf32, #tpu.memory_space<vmem>>, vector<2x8x256xf32>
    %c0_35 = arith.constant 0 : index
    %c0_36 = arith.constant 0 : index
    %c0_37 = arith.constant 0 : index
    %51 = vector.load %arg13[%c0_35, %c0_36, %c0_37] : memref<2x8x256xf32, #tpu.memory_space<vmem>>, vector<2x8x256xf32>
    "tpu.trace_start"() <{level = 10 : i32, message = "bcn,bdn->bcd"}> : () -> ()
    %cst_38 = arith.constant dense<0.000000e+00> : vector<2x8x8xf32>
    %52 = tpu.matmul %50, %50, %cst_38 {dimension_numbers = #tpu.dot_dimension_numbers<[2], [2], [1], [1], [0, 0, 0, 1, 1, 1], [0], [0]>} : vector<2x8x256xf32>, vector<2x8x256xf32>, vector<2x8x8xf32> -> vector<2x8x8xf32>
    "tpu.trace_stop"() : () -> ()
    %cst_39 = arith.constant 4.8828125E-4 : f32
    %53 = vector.broadcast %cst_39 : f32 to vector<2x8x8xf32>
    %54 = arith.mulf %52, %53 : vector<2x8x8xf32>
    "tpu.trace_start"() <{level = 10 : i32, message = "bcn,bdn->bcd"}> : () -> ()
    %cst_40 = arith.constant dense<0.000000e+00> : vector<2x8x8xf32>
    %55 = tpu.matmul %48, %48, %cst_40 {dimension_numbers = #tpu.dot_dimension_numbers<[2], [2], [1], [1], [0, 0, 0, 1, 1, 1], [0], [0]>} : vector<2x8x256xf32>, vector<2x8x256xf32>, vector<2x8x8xf32> -> vector<2x8x8xf32>
    "tpu.trace_stop"() : () -> ()
    %cst_41 = arith.constant 4.8828125E-4 : f32
    %56 = vector.broadcast %cst_41 : f32 to vector<2x8x8xf32>
    %57 = arith.mulf %55, %56 : vector<2x8x8xf32>
    %58 = arith.subf %54, %57 : vector<2x8x8xf32>
    %59 = math.absf %58 : vector<2x8x8xf32>
    %60 = vector.shape_cast %59 : vector<2x8x8xf32> to vector<1x2x8x8xf32>
    %cst_42 = arith.constant dense<0.000000e+00> : vector<1xf32>
    %61 = vector.multi_reduction <add>, %60, %cst_42 [1, 2, 3] : vector<1x2x8x8xf32> to vector<1xf32>
    %62 = vector.shape_cast %61 : vector<1xf32> to vector<1x1x1x1xf32>
    %63 = vector.extract %62[0, 0, 0, 0] : f32 from vector<1x1x1x1xf32>
    %c3 = arith.constant 3 : index
    %64 = memref.load %arg16[%c3] : memref<6xf32, #tpu.memory_space<smem>>
    memref.store %63, %arg16[%c3] : memref<6xf32, #tpu.memory_space<smem>>
    "tpu.trace_start"() <{level = 10 : i32, message = "bcn,bdn->bcd"}> : () -> ()
    %cst_43 = arith.constant dense<0.000000e+00> : vector<2x8x8xf32>
    %65 = tpu.matmul %51, %51, %cst_43 {dimension_numbers = #tpu.dot_dimension_numbers<[2], [2], [1], [1], [0, 0, 0, 1, 1, 1], [0], [0]>} : vector<2x8x256xf32>, vector<2x8x256xf32>, vector<2x8x8xf32> -> vector<2x8x8xf32>
    "tpu.trace_stop"() : () -> ()
    %cst_44 = arith.constant 4.8828125E-4 : f32
    %66 = vector.broadcast %cst_44 : f32 to vector<2x8x8xf32>
    %67 = arith.mulf %65, %66 : vector<2x8x8xf32>
    "tpu.trace_start"() <{level = 10 : i32, message = "bcn,bdn->bcd"}> : () -> ()
    %cst_45 = arith.constant dense<0.000000e+00> : vector<2x8x8xf32>
    %68 = tpu.matmul %49, %49, %cst_45 {dimension_numbers = #tpu.dot_dimension_numbers<[2], [2], [1], [1], [0, 0, 0, 1, 1, 1], [0], [0]>} : vector<2x8x256xf32>, vector<2x8x256xf32>, vector<2x8x8xf32> -> vector<2x8x8xf32>
    "tpu.trace_stop"() : () -> ()
    %cst_46 = arith.constant 4.8828125E-4 : f32
    %69 = vector.broadcast %cst_46 : f32 to vector<2x8x8xf32>
    %70 = arith.mulf %68, %69 : vector<2x8x8xf32>
    %71 = arith.subf %67, %70 : vector<2x8x8xf32>
    %72 = math.absf %71 : vector<2x8x8xf32>
    %73 = vector.shape_cast %72 : vector<2x8x8xf32> to vector<1x2x8x8xf32>
    %cst_47 = arith.constant dense<0.000000e+00> : vector<1xf32>
    %74 = vector.multi_reduction <add>, %73, %cst_47 [1, 2, 3] : vector<1x2x8x8xf32> to vector<1xf32>
    %75 = vector.shape_cast %74 : vector<1xf32> to vector<1x1x1x1xf32>
    %76 = vector.extract %75[0, 0, 0, 0] : f32 from vector<1x1x1x1xf32>
    %c4 = arith.constant 4 : index
    %77 = memref.load %arg16[%c4] : memref<6xf32, #tpu.memory_space<smem>>
    memref.store %76, %arg16[%c4] : memref<6xf32, #tpu.memory_space<smem>>
    %c0_48 = arith.constant 0 : index
    %c0_49 = arith.constant 0 : index
    %78 = vector.load %arg14[%c0_48, %c0_49] : memref<2x8xf32, #tpu.memory_space<vmem>>, vector<2x8xf32>
    %c0_50 = arith.constant 0 : index
    %c0_51 = arith.constant 0 : index
    %79 = vector.load %arg15[%c0_50, %c0_51] : memref<2x8xf32, #tpu.memory_space<vmem>>, vector<2x8xf32>
    %80 = arith.subf %78, %79 : vector<2x8xf32>
    %81 = math.absf %80 : vector<2x8xf32>
    %82 = vector.shape_cast %81 : vector<2x8xf32> to vector<1x2x8xf32>
    %cst_52 = arith.constant dense<0.000000e+00> : vector<1xf32>
    %83 = vector.multi_reduction <add>, %82, %cst_52 [1, 2] : vector<1x2x8xf32> to vector<1xf32>
    %84 = vector.shape_cast %83 : vector<1xf32> to vector<1x1x1xf32>
    %85 = vector.extract %84[0, 0, 0] : f32 from vector<1x1x1xf32>
    %c5 = arith.constant 5 : index
    %86 = memref.load %arg16[%c5] : memref<6xf32, #tpu.memory_space<smem>>
    memref.store %85, %arg16[%c5] : memref<6xf32, #tpu.memory_space<smem>>
    return
  }
  func.func @transform_0(%arg0: i32) -> (i32, i32) {
    %c0_i32 = arith.constant 0 : i32
    %c0_i32_0 = arith.constant 0 : i32
    %c0_i32_1 = arith.constant 0 : i32
    return %c0_i32, %c0_i32_0 : i32, i32
  }
  func.func @transform_1(%arg0: i32) -> (i32, i32) {
    %c0_i32 = arith.constant 0 : i32
    %c0_i32_0 = arith.constant 0 : i32
    %c0_i32_1 = arith.constant 0 : i32
    return %c0_i32, %c0_i32_0 : i32, i32
  }
  func.func @transform_2(%arg0: i32) -> (i32, i32) {
    %c0_i32 = arith.constant 0 : i32
    %c0_i32_0 = arith.constant 0 : i32
    %c0_i32_1 = arith.constant 0 : i32
    return %c0_i32, %c0_i32_0 : i32, i32
  }
  func.func @transform_3(%arg0: i32) -> (i32, i32) {
    %c0_i32 = arith.constant 0 : i32
    %c0_i32_0 = arith.constant 0 : i32
    %c0_i32_1 = arith.constant 0 : i32
    return %c0_i32, %c0_i32_0 : i32, i32
  }
  func.func @transform_4(%arg0: i32) -> (i32, i32) {
    %c0_i32 = arith.constant 0 : i32
    %c0_i32_0 = arith.constant 0 : i32
    %c0_i32_1 = arith.constant 0 : i32
    return %c0_i32, %c0_i32_0 : i32, i32
  }
  func.func @transform_5(%arg0: i32) -> (i32, i32) {
    %c0_i32 = arith.constant 0 : i32
    %c0_i32_0 = arith.constant 0 : i32
    %c0_i32_1 = arith.constant 0 : i32
    return %c0_i32, %c0_i32_0 : i32, i32
  }
  func.func @transform_6(%arg0: i32) -> (i32, i32) {
    %c0_i32 = arith.constant 0 : i32
    %c0_i32_0 = arith.constant 0 : i32
    %c0_i32_1 = arith.constant 0 : i32
    return %c0_i32, %c0_i32_0 : i32, i32
  }
  func.func @transform_7(%arg0: i32) -> (i32, i32) {
    %c0_i32 = arith.constant 0 : i32
    %c0_i32_0 = arith.constant 0 : i32
    %c0_i32_1 = arith.constant 0 : i32
    return %c0_i32, %c0_i32_0 : i32, i32
  }
  func.func @transform_8(%arg0: i32) -> (i32, i32) {
    %c0_i32 = arith.constant 0 : i32
    %c0_i32_0 = arith.constant 0 : i32
    %c0_i32_1 = arith.constant 0 : i32
    return %c0_i32, %c0_i32_0 : i32, i32
  }
  func.func @transform_9(%arg0: i32) -> (i32, i32, i32) {
    %c0_i32 = arith.constant 0 : i32
    %c0_i32_0 = arith.constant 0 : i32
    %c0_i32_1 = arith.constant 0 : i32
    %c0_i32_2 = arith.constant 0 : i32
    return %c0_i32, %c0_i32_0, %c0_i32_1 : i32, i32, i32
  }
  func.func @transform_10(%arg0: i32) -> (i32, i32, i32) {
    %c0_i32 = arith.constant 0 : i32
    %c0_i32_0 = arith.constant 0 : i32
    %c0_i32_1 = arith.constant 0 : i32
    %c0_i32_2 = arith.constant 0 : i32
    return %c0_i32, %c0_i32_0, %c0_i32_1 : i32, i32, i32
  }
  func.func @transform_11(%arg0: i32) -> (i32, i32, i32) {
    %c0_i32 = arith.constant 0 : i32
    %c0_i32_0 = arith.constant 0 : i32
    %c0_i32_1 = arith.constant 0 : i32
    %c0_i32_2 = arith.constant 0 : i32
    return %c0_i32, %c0_i32_0, %c0_i32_1 : i32, i32, i32
  }
  func.func @transform_12(%arg0: i32) -> (i32, i32, i32) {
    %c0_i32 = arith.constant 0 : i32
    %c0_i32_0 = arith.constant 0 : i32
    %c0_i32_1 = arith.constant 0 : i32
    %c0_i32_2 = arith.constant 0 : i32
    return %c0_i32, %c0_i32_0, %c0_i32_1 : i32, i32, i32
  }
  func.func @transform_13(%arg0: i32) -> (i32, i32) {
    %c0_i32 = arith.constant 0 : i32
    %c0_i32_0 = arith.constant 0 : i32
    %c0_i32_1 = arith.constant 0 : i32
    return %c0_i32, %c0_i32_0 : i32, i32
  }
  func.func @transform_14(%arg0: i32) -> (i32, i32) {
    %c0_i32 = arith.constant 0 : i32
    %c0_i32_0 = arith.constant 0 : i32
    %c0_i32_1 = arith.constant 0 : i32
    return %c0_i32, %c0_i32_0 : i32, i32
  }
  func.func @transform_15(%arg0: i32) -> i32 {
    %c0_i32 = arith.constant 0 : i32
    %c0_i32_0 = arith.constant 0 : i32
    return %c0_i32 : i32
  }
}

</mosaic_0001>

<bundles_post_ra>
// kernel: _lambda_.12
= control target key start
LH: loop header
LB: loop body
LE: loop exit
PB: predicated region body
PF: predicated region fallthrough
CT: control target
= control target key end

     0   :  { %vm74_vm0 = vcmask 1042432   ;;  %v297_v3 = vmov 0   ;;  %vm70_vm1 = vcmask 220160   ;;  %s410_s1 = inlined_call_operand.vmem [shape: bf16[27,1024], index: 1, kind: input, shape index: {}]   ;;  %s411_s0 = inlined_call_operand.vmem [shape: bf16[8,27], index: 0, kind: input, shape index: {}]   ;;  %s412_s2 = inlined_call_operand.vmem [shape: f32[8,1], index: 2, kind: input, shape index: {}]   ;;  %s413_s3 = inlined_call_operand.vmem [shape: bf16[8,1024], index: 3, kind: output, shape index: {}]  }
   0x1   :  { %v29_v0 = vld [vmem:[%s410_s1 + $0x68] sm:$0x33]  ;;  %296 = vset.pattern.permute.xlu0 %v297_v3  ;;  %v28_v8 = vld [vmem:[%s410_s1 + $0x60] sm:$0x33]  ;;  %v31_v17 = vld [vmem:[%s410_s1 + $0x78] sm:$0x33] }
   0x2   :  { %v25_v1 = vld [vmem:[%s410_s1 + $0x48] sm:$0xff]  ;;  %v58_v4 = vunpack.c.l.bf16 %v29_v0  ;;  %v59_v5 = vunpack.c.h.bf16 %v29_v0  ;;  %v56_v9 = vunpack.c.l.bf16 %v28_v8  ;;  %v57_v10 = vunpack.c.h.bf16 %v28_v8  ;;  %v24_v12 = vld [vmem:[%s410_s1 + $0x40] sm:$0xff]  ;;  %v27_v26 = vld [vmem:[%s410_s1 + $0x58] sm:$0xff] }
   0x3   :  { %v21_v2 = vld [vmem:[%s410_s1 + $0x28] sm:$0xff]  ;;  %v50_v6 = vunpack.c.l.bf16 %v25_v1  ;;  %v51_v7 = vunpack.c.h.bf16 %v25_v1  ;;  %v14_v15 = vld [vmem:[%s411_s0] sm:$0xf]  ;;  %v48_v18 = vunpack.c.l.bf16 %v24_v12  ;;  %v49_v19 = vunpack.c.h.bf16 %v24_v12  ;;  %v23_v29 = vld [vmem:[%s410_s1 + $0x38] sm:$0xff] }
   0x4   :  { %v17_v11 = vld [vmem:[%s410_s1 + $0x8] sm:$0xff]  ;;  %283 = vmatpush.msk.msra.mxu2 %vm74_vm0, %v58_v4  ;;  %285 = vmatpush.msk.msra.mxu3 %vm74_vm0, %v59_v5  ;;  %v42_v13 = vunpack.c.l.bf16 %v21_v2  ;;  %v43_v14 = vunpack.c.h.bf16 %v21_v2  ;;  %v20_v16 = vld [vmem:[%s410_s1 + $0x20] sm:$0xff]  ;;  %v352_v25 = vunpack.c.l.bf16 %v14_v15  ;;  %v62_v27 = vunpack.c.l.bf16 %v31_v17  ;;  %v30_v34 = vld [vmem:[%s410_s1 + $0x70] sm:$0x33] }
   0x5   :  { %279 = vmatpush.msk.msra.mxu0 %vm74_vm0, %v56_v9  ;;  %281 = vmatpush.msk.msra.mxu1 %vm74_vm0, %v57_v10  ;;  %v34_v20 = vunpack.c.l.bf16 %v17_v11  ;;  %v35_v21 = vunpack.c.h.bf16 %v17_v11  ;;  %v40_v22 = vunpack.c.l.bf16 %v20_v16  ;;  %v41_v23 = vunpack.c.h.bf16 %v20_v16  ;;  %v16_v24 = vld [vmem:[%s410_s1] sm:$0xff]  ;;  %v19_v35 = vld [vmem:[%s410_s1 + $0x18] sm:$0xff]  ;;  %v26_v38 = vld [vmem:[%s410_s1 + $0x50] sm:$0xff] }
   0x6   :  { %152 = vmatpush.msra.mxu2 %v50_v6  ;;  %172 = vmatpush.msra.mxu3 %v51_v7  ;;  %v63_v28 = vunpack.c.h.bf16 %v31_v17  ;;  %v32_v30 = vunpack.c.l.bf16 %v16_v24  ;;  %v33_v31 = vunpack.c.h.bf16 %v16_v24  ;;  %v54_v32 = vunpack.c.l.bf16 %v27_v26  ;;  %v22_v43 = vld [vmem:[%s410_s1 + $0x30] sm:$0xff]  ;;  %v64_v51 = vld [vmem:[%s412_s2] sm:$0xff] }
   0x7   :  { %112 = vmatpush.msra.mxu0 %v48_v18  ;;  %132 = vmatpush.msra.mxu1 %v49_v19  ;;  %v55_v33 = vunpack.c.h.bf16 %v27_v26  ;;  %v46_v36 = vunpack.c.l.bf16 %v23_v29  ;;  %v47_v37 = vunpack.c.h.bf16 %v23_v29  ;;  %v60_v39 = vunpack.c.l.bf16 %v30_v34  ;;  %v18_v46 = vld [vmem:[%s410_s1 + $0x10] sm:$0xff] }
   0x8   :  { %153 = vmatpush.msra.mxu2 %v42_v13  ;;  %173 = vmatpush.msra.mxu3 %v43_v14  ;;  %v61_v40 = vunpack.c.h.bf16 %v30_v34  ;;  %v38_v41 = vunpack.c.l.bf16 %v19_v35  ;;  %v39_v42 = vunpack.c.h.bf16 %v19_v35  ;;  %v52_v44 = vunpack.c.l.bf16 %v26_v38 }
   0x9   :  { %113 = vmatpush.msra.mxu0 %v40_v22  ;;  %133 = vmatpush.msra.mxu1 %v41_v23  ;;  %v53_v45 = vunpack.c.h.bf16 %v26_v38  ;;  %v44_v47 = vunpack.c.l.bf16 %v22_v43  ;;  %v45_v48 = vunpack.c.h.bf16 %v22_v43  ;;  %v36_v49 = vunpack.c.l.bf16 %v18_v46 }
   0xa   :  { %154 = vmatpush.msra.mxu2 %v34_v20  ;;  %174 = vmatpush.msra.mxu3 %v35_v21  ;;  %v37_v50 = vunpack.c.h.bf16 %v18_v46 }
   0xb   :  { %284 = vmatmul.msk.f32.vlgmr.msra.gmra.mxu2 %vm70_vm1, %v352_v25  ;;  %286 = vmatmul.msk.f32.vlgmr.msra.gmra.mxu3 %vm70_vm1, %v352_v25 }
   0xc   :  { %291 = vmatpush.msk.msrb.mxu2 %vm74_vm0, %v62_v27  ;;  %293 = vmatpush.msk.msrb.mxu3 %vm74_vm0, %v63_v28 }
   0xd   :  { %114 = vmatpush.msra.mxu0 %v32_v30  ;;  %134 = vmatpush.msra.mxu1 %v33_v31 }
   0xe   :  { %232 = vmatpush.msrb.mxu2 %v54_v32  ;;  %252 = vmatpush.msrb.mxu3 %v55_v33 }
   0xf   :  { %280 = vmatmul.msk.f32.vlgmr.msra.gmra.mxu0 %vm70_vm1, %v352_v25  ;;  %282 = vmatmul.msk.f32.vlgmr.msra.gmra.mxu1 %vm70_vm1, %v352_v25 }
  0x10   :  { %233 = vmatpush.msrb.mxu2 %v46_v36  ;;  %253 = vmatpush.msrb.mxu3 %v47_v37 }
  0x11   :  { %287 = vmatpush.msk.msrb.mxu0 %vm74_vm0, %v60_v39  ;;  %289 = vmatpush.msk.msrb.mxu1 %vm74_vm0, %v61_v40 }
  0x12   :  { %234 = vmatpush.msrb.mxu2 %v38_v41  ;;  %254 = vmatpush.msrb.mxu3 %v39_v42 }
  0x13   :  { %192 = vmatpush.msrb.mxu0 %v52_v44  ;;  %212 = vmatpush.msrb.mxu1 %v53_v45 }
  0x14   :  { %292 = vmatmul.msk.f32.vlgmr.msrb.gmra.mxu2 %vm70_vm1, %v352_v25  ;;  %294 = vmatmul.msk.f32.vlgmr.msrb.gmra.mxu3 %vm70_vm1, %v352_v25 }
  0x15   :  { %193 = vmatpush.msrb.mxu0 %v44_v47  ;;  %213 = vmatpush.msrb.mxu1 %v45_v48 }
  0x16   :  { %67 = vperm.xlu0 %296, %v64_v51  }
  0x17   :  { %194 = vmatpush.msrb.mxu0 %v36_v49  ;;  %214 = vmatpush.msrb.mxu1 %v37_v50 }
  0x18   :  { %288 = vmatmul.msk.f32.vlgmr.msrb.gmra.mxu0 %vm70_vm1, %v352_v25  ;;  %290 = vmatmul.msk.f32.vlgmr.msrb.gmra.mxu1 %vm70_vm1, %v352_v25 }
  0x88   :  { %v68_v52 = vpop.permute.xlu0 %67 }
  0x8c   :  { %v116_v53 = vpop.f32.mrf.mxu0  ;;  %v136_v54 = vpop.f32.mrf.mxu1 }
  0x8d   :  { %v117_v55 = vadd.f32 %v116_v53, %v68_v52  ;;  %v137_v56 = vadd.f32 %v136_v54, %v68_v52 }
  0x8e   :  { %v156_v57 = vpop.f32.mrf.mxu2  ;;  %v176_v58 = vpop.f32.mrf.mxu3 }
  0x8f   :  { %v259_v59 = vmax.f32 %v117_v55, 0.0  ;;  %v260_v60 = vmax.f32 %v137_v56, 0.0  ;;  %v157_v61 = vadd.f32 %v156_v57, %v68_v52  ;;  %v177_v62 = vadd.f32 %v176_v58, %v68_v52 }
  0x91   :  { %v267_v63 = vpack.c.bf16 %v260_v60, %v259_v59  ;;  %v261_v0 = vmax.f32 %v157_v61, 0.0  ;;  %v262_v1 = vmax.f32 %v177_v62, 0.0 }
  0x93   :  { %271 = vst [vmem:[%s413_s3] sm:$0xff] %v267_v63  ;;  %v268_v2 = vpack.c.bf16 %v262_v1, %v261_v0 }
  0x95   :  { %272 = vst [vmem:[%s413_s3 + $0x8] sm:$0xff] %v268_v2  ;;  %v196_v3 = vpop.f32.mrf.mxu0  ;;  %v216_v4 = vpop.f32.mrf.mxu1 }
  0x96   :  { %v197_v5 = vadd.f32 %v196_v3, %v68_v52  ;;  %v217_v6 = vadd.f32 %v216_v4, %v68_v52 }
  0x97   :  { %v236_v7 = vpop.f32.mrf.mxu2  ;;  %v256_v8 = vpop.f32.mrf.mxu3 }
  0x98   :  { %v263_v9 = vmax.f32 %v197_v5, 0.0  ;;  %v264_v10 = vmax.f32 %v217_v6, 0.0  ;;  %v237_v11 = vadd.f32 %v236_v7, %v68_v52  ;;  %v257_v12 = vadd.f32 %v256_v8, %v68_v52 }
  0x9a   :  { %v269_v13 = vpack.c.bf16 %v264_v10, %v263_v9  ;;  %v265_v14 = vmax.f32 %v237_v11, 0.0  ;;  %v266_v15 = vmax.f32 %v257_v12, 0.0 }
  0x9c   :  { %273 = vst [vmem:[%s413_s3 + $0x10] sm:$0xff] %v269_v13  ;;  %v270_v16 = vpack.c.bf16 %v266_v15, %v265_v14 }
  0x9e   :  { %274 = vst [vmem:[%s413_s3 + $0x18] sm:$0xff] %v270_v16 }

// kernel: _lambda_.14
= control target key start
LH: loop header
LB: loop body
LE: loop exit
PB: predicated region body
PF: predicated region fallthrough
CT: control target
= control target key end

     0   :  { %vm239_vm0 = vcmask 130048   ;;  %s964_s1 = inlined_call_operand.vmem [shape: bf16[144,1024], index: 1, kind: input, shape index: {}]   ;;  %s965_s0 = inlined_call_operand.vmem [shape: bf16[8,144], index: 0, kind: input, shape index: {}]   ;;  %s966_s2 = inlined_call_operand.vmem [shape: f32[8,1], index: 2, kind: input, shape index: {}]   ;;  %s967_s3 = inlined_call_operand.vmem [shape: f32[8,1024], index: 3, kind: output, shape index: {}]  }
   0x1   :  { %v77_v0 = vld [vmem:[%s964_s1 + $0x1e0] sm:$0xff]  ;;  %v629_v8 = vld [vmem:[%s964_s1 + $0x228] sm:$0xff] }
   0x2   :  { %v85_v1 = vld [vmem:[%s964_s1 + $0x220] sm:$0xff]  ;;  %v209_v3 = vunpack.c.l.bf16 %v77_v0  ;;  %v210_v12 = vunpack.c.h.bf16 %v77_v0  ;;  %v637_v13 = vld [vmem:[%s964_s1 + $0x208] sm:$0xff]  ;;  %v227_v16 = vunpack.c.l.bf16 %v629_v8 }
   0x3   :  { %v73_v2 = vld [vmem:[%s964_s1 + $0x1c0] sm:$0xff]  ;;  %v225_v4 = vunpack.c.l.bf16 %v85_v1  ;;  %v226_v5 = vunpack.c.h.bf16 %v85_v1  ;;  %v78_v18 = vld [vmem:[%s964_s1 + $0x1e8] sm:$0xff]  ;;  %v219_v22 = vunpack.c.l.bf16 %v637_v13 }
   0x4   :  { %v201_v6 = vunpack.c.l.bf16 %v73_v2  ;;  %v81_v7 = vld [vmem:[%s964_s1 + $0x200] sm:$0xff]  ;;  %243 = vmatpush.msra.mxu0 %v209_v3  ;;  %v202_v19 = vunpack.c.h.bf16 %v73_v2  ;;  %v74_v24 = vld [vmem:[%s964_s1 + $0x1c8] sm:$0xff]  ;;  %v212_v25 = vunpack.c.h.bf16 %v78_v18  ;;  %v211_v28 = vunpack.c.l.bf16 %v78_v18 }
   0x5   :  { %v69_v9 = vld [vmem:[%s964_s1 + $0x1a0] sm:$0xff]  ;;  %v217_v10 = vunpack.c.l.bf16 %v81_v7  ;;  %v218_v11 = vunpack.c.h.bf16 %v81_v7  ;;  %277 = vmatpush.msra.mxu2 %v225_v4  ;;  %317 = vmatpush.msra.mxu3 %v226_v5  ;;  %v70_v30 = vld [vmem:[%s964_s1 + $0x1a8] sm:$0xff]  ;;  %v204_v31 = vunpack.c.h.bf16 %v74_v24  ;;  %v203_v34 = vunpack.c.l.bf16 %v74_v24 }
   0x6   :  { %v65_v14 = vld [vmem:[%s964_s1 + $0x180] sm:$0xff]  ;;  %v193_v17 = vunpack.c.l.bf16 %v69_v9  ;;  %244 = vmatpush.msra.mxu0 %v201_v6  ;;  %v194_v26 = vunpack.c.h.bf16 %v69_v9  ;;  %v66_v36 = vld [vmem:[%s964_s1 + $0x188] sm:$0xff]  ;;  %v196_v37 = vunpack.c.h.bf16 %v70_v30  ;;  %323 = vmatpush.msra.mxu1 %v211_v28  ;;  %v195_v40 = vunpack.c.l.bf16 %v70_v30 }
   0x7   :  { %v645_v15 = vld [vmem:[%s965_s0] sm:$0xff]  ;;  %278 = vmatpush.msra.mxu2 %v217_v10  ;;  %v185_v23 = vunpack.c.l.bf16 %v65_v14  ;;  %318 = vmatpush.msra.mxu3 %v218_v11  ;;  %v186_v32 = vunpack.c.h.bf16 %v65_v14  ;;  %v62_v42 = vld [vmem:[%s964_s1 + $0x168] sm:$0xff]  ;;  %v188_v43 = vunpack.c.h.bf16 %v66_v36  ;;  %v187_v46 = vunpack.c.l.bf16 %v66_v36 }
   0x8   :  { %v652_v20 = vunpack.c.h.bf16 %v645_v15  ;;  %v61_v21 = vld [vmem:[%s964_s1 + $0x160] sm:$0xff]  ;;  %245 = vmatpush.msra.mxu0 %v193_v17  ;;  %324 = vmatpush.msra.mxu1 %v203_v34  ;;  %v58_v48 = vld [vmem:[%s964_s1 + $0x148] sm:$0xff]  ;;  %v180_v49 = vunpack.c.h.bf16 %v62_v42  ;;  %v179_v52 = vunpack.c.l.bf16 %v62_v42  ;;  %v228_v42 = vunpack.c.h.bf16 %v629_v8  ;;  %v755_v8 = vld [vmem:[%s964_s1 + $0x1d0] sm:$0xff] }
   0x9   :  { %283 = vmatpush.msrb.mxu2 %v210_v12  ;;  %v57_v27 = vld [vmem:[%s964_s1 + $0x140] sm:$0xff]  ;;  %357 = vmatpush.msrb.mxu3 %v227_v16  ;;  %v177_v29 = vunpack.c.l.bf16 %v61_v21  ;;  %v178_v38 = vunpack.c.h.bf16 %v61_v21  ;;  %v54_v54 = vld [vmem:[%s964_s1 + $0x128] sm:$0xff]  ;;  %v172_v55 = vunpack.c.h.bf16 %v58_v48  ;;  %v171_v58 = vunpack.c.l.bf16 %v58_v48 }
   0xa   :  { %584 = vmatmul.msk.f32.vlgmr.msra.gmra.mxu3 %vm239_vm0, %v652_v20  ;;  %v53_v33 = vld [vmem:[%s964_s1 + $0x120] sm:$0xff]  ;;  %246 = vmatpush.msra.mxu0 %v185_v23  ;;  %v169_v35 = vunpack.c.l.bf16 %v57_v27  ;;  %v170_v44 = vunpack.c.h.bf16 %v57_v27  ;;  %v50_v60 = vld [vmem:[%s964_s1 + $0x108] sm:$0xff]  ;;  %v164_v61 = vunpack.c.h.bf16 %v54_v54  ;;  %v163_v0 = vunpack.c.l.bf16 %v54_v54 }
   0xb   :  { %284 = vmatpush.msrb.mxu2 %v202_v19  ;;  %358 = vmatpush.msrb.mxu3 %v219_v22  ;;  %v49_v39 = vld [vmem:[%s964_s1 + $0x100] sm:$0xff]  ;;  %v161_v41 = vunpack.c.l.bf16 %v53_v33  ;;  %v162_v50 = vunpack.c.h.bf16 %v53_v33  ;;  %v46_v2 = vld [vmem:[%s964_s1 + $0xe8] sm:$0xff]  ;;  %v156_v3 = vunpack.c.h.bf16 %v50_v60  ;;  %v155_v6 = vunpack.c.l.bf16 %v50_v60 }
   0xc   :  { %247 = vmatpush.msra.mxu0 %v177_v29  ;;  %v45_v45 = vld [vmem:[%s964_s1 + $0xe0] sm:$0xff]  ;;  %v153_v47 = vunpack.c.l.bf16 %v49_v39  ;;  %325 = vmatpush.msra.mxu1 %v195_v40  ;;  %v154_v56 = vunpack.c.h.bf16 %v49_v39  ;;  %v42_v9 = vld [vmem:[%s964_s1 + $0xc8] sm:$0xff]  ;;  %v148_v10 = vunpack.c.h.bf16 %v46_v2  ;;  %v147_v14 = vunpack.c.l.bf16 %v46_v2  ;;  %v63_v2 = vld [vmem:[%s964_s1 + $0x170] sm:$0xff] }
   0xd   :  { %363 = vmatpush.msra.mxu3 %v212_v25  ;;  %285 = vmatpush.msrb.mxu2 %v194_v26  ;;  %v41_v51 = vld [vmem:[%s964_s1 + $0xc0] sm:$0xff]  ;;  %v145_v53 = vunpack.c.l.bf16 %v45_v45  ;;  %v146_v62 = vunpack.c.h.bf16 %v45_v45  ;;  %v38_v17 = vld [vmem:[%s964_s1 + $0xa8] sm:$0xff]  ;;  %v140_v18 = vunpack.c.h.bf16 %v42_v9  ;;  %v139_v21 = vunpack.c.l.bf16 %v42_v9 }
   0xe   :  { %248 = vmatpush.msra.mxu0 %v169_v35  ;;  %v37_v57 = vld [vmem:[%s964_s1 + $0xa0] sm:$0xff]  ;;  %326 = vmatpush.msra.mxu1 %v187_v46  ;;  %v137_v59 = vunpack.c.l.bf16 %v41_v51  ;;  %v138_v4 = vunpack.c.h.bf16 %v41_v51  ;;  %v34_v24 = vld [vmem:[%s964_s1 + $0x88] sm:$0xff]  ;;  %v132_v25 = vunpack.c.h.bf16 %v38_v17  ;;  %v131_v27 = vunpack.c.l.bf16 %v38_v17 }
   0xf   :  { %364 = vmatpush.msra.mxu3 %v204_v31  ;;  %286 = vmatpush.msrb.mxu2 %v186_v32  ;;  %v33_v63 = vld [vmem:[%s964_s1 + $0x80] sm:$0xff]  ;;  %v129_v1 = vunpack.c.l.bf16 %v37_v57  ;;  %v130_v11 = vunpack.c.h.bf16 %v37_v57  ;;  %v124_v30 = vunpack.c.h.bf16 %v34_v24  ;;  %v30_v31 = vld [vmem:[%s964_s1 + $0x68] sm:$0xff]  ;;  %v123_v33 = vunpack.c.l.bf16 %v34_v24 }
  0x10   :  { %249 = vmatpush.msra.mxu0 %v161_v41  ;;  %327 = vmatpush.msra.mxu1 %v179_v52  ;;  %v29_v5 = vld [vmem:[%s964_s1 + $0x60] sm:$0xff]  ;;  %v121_v7 = vunpack.c.l.bf16 %v33_v63  ;;  %v122_v19 = vunpack.c.h.bf16 %v33_v63  ;;  %v26_v35 = vld [vmem:[%s964_s1 + $0x48] sm:$0xff]  ;;  %v116_v36 = vunpack.c.h.bf16 %v30_v31  ;;  %v115_v39 = vunpack.c.l.bf16 %v30_v31  ;;  %v787_v63 = vld [vmem:[%s964_s1 + $0x1b8] sm:$0xff] }
  0x11   :  { %365 = vmatpush.msra.mxu3 %v196_v37  ;;  %287 = vmatpush.msrb.mxu2 %v178_v38  ;;  %v25_v12 = vld [vmem:[%s964_s1 + $0x40] sm:$0xff]  ;;  %v113_v16 = vunpack.c.l.bf16 %v29_v5  ;;  %v114_v26 = vunpack.c.h.bf16 %v29_v5  ;;  %v735_v37 = vunpack.c.l.bf16 %v645_v15  ;;  %v22_v40 = vld [vmem:[%s964_s1 + $0x28] sm:$0xff]  ;;  %v108_v41 = vunpack.c.h.bf16 %v26_v35  ;;  %v843_v31 = vld [vmem:[%s964_s1 + $0x138] sm:$0xff] }
  0x12   :  { %250 = vmatpush.msra.mxu0 %v153_v47  ;;  %328 = vmatpush.msra.mxu1 %v171_v58  ;;  %v105_v22 = vunpack.c.l.bf16 %v25_v12  ;;  %v21_v23 = vld [vmem:[%s964_s1 + $0x20] sm:$0xff]  ;;  %v106_v32 = vunpack.c.h.bf16 %v25_v12  ;;  %v18_v45 = vld [vmem:[%s964_s1 + $0x8] sm:$0xff]  ;;  %v100_v46 = vunpack.c.h.bf16 %v22_v40  ;;  %v87_v47 = vld [vmem:[%s964_s1 + $0x230] sm:$0xff]  ;;  %v220_v51 = vunpack.c.h.bf16 %v637_v13 }
  0x13   :  { %366 = vmatpush.msra.mxu3 %v188_v43  ;;  %288 = vmatpush.msrb.mxu2 %v170_v44  ;;  %v17_v28 = vld [vmem:[%s964_s1] sm:$0xff]  ;;  %v97_v29 = vunpack.c.l.bf16 %v21_v23  ;;  %v98_v38 = vunpack.c.h.bf16 %v21_v23  ;;  %v744_v43 = vld [vmem:[%s964_s1 + $0x1f0] sm:$0xff]  ;;  %v107_v44 = vunpack.c.l.bf16 %v26_v35  ;;  %v92_v52 = vunpack.c.h.bf16 %v18_v45  ;;  %v779_v58 = vld [vmem:[%s964_s1 + $0x1d8] sm:$0xff] }
  0x14   :  { %251 = vmatpush.msra.mxu0 %v145_v53  ;;  %329 = vmatpush.msra.mxu1 %v163_v0  ;;  %v89_v34 = vunpack.c.l.bf16 %v17_v28  ;;  %v90_v15 = vunpack.c.h.bf16 %v17_v28  ;;  %v213_v48 = vunpack.c.l.bf16 %v744_v43  ;;  %v205_v53 = vunpack.c.l.bf16 %v755_v8 }
  0x15   :  { %367 = vmatpush.msra.mxu3 %v180_v49  ;;  %289 = vmatpush.msrb.mxu2 %v162_v50  ;;  %v99_v49 = vunpack.c.l.bf16 %v22_v40  ;;  %v764_v50 = vld [vmem:[%s964_s1 + $0x1f8] sm:$0xff]  ;;  %v229_v54 = vunpack.c.l.bf16 %v87_v47  ;;  %v91_v57 = vunpack.c.l.bf16 %v18_v45  ;;  %v214_v0 = vunpack.c.h.bf16 %v744_v43  ;;  %v39_v45 = vld [vmem:[%s964_s1 + $0xb0] sm:$0xff] }
  0x16   :  { %252 = vmatpush.msra.mxu0 %v137_v59  ;;  %330 = vmatpush.msra.mxu1 %v155_v6  ;;  %v215_v13 = vunpack.c.l.bf16 %v764_v50  ;;  %v804_v6 = vld [vmem:[%s964_s1 + $0x198] sm:$0xff]  ;;  %v199_v9 = vunpack.c.l.bf16 %v787_v63  ;;  %v181_v12 = vunpack.c.l.bf16 %v63_v2  ;;  %v216_v28 = vunpack.c.h.bf16 %v764_v50  ;;  %v35_v50 = vld [vmem:[%s964_s1 + $0x90] sm:$0xff] }
  0x17   :  { %368 = vmatpush.msra.mxu3 %v172_v55  ;;  %290 = vmatpush.msrb.mxu2 %v154_v56  ;;  %v71_v55 = vld [vmem:[%s964_s1 + $0x1b0] sm:$0xff]  ;;  %v167_v40 = vunpack.c.l.bf16 %v843_v31  ;;  %v200_v43 = vunpack.c.h.bf16 %v787_v63 }
  0x18   :  { %253 = vmatpush.msra.mxu0 %v129_v1  ;;  %331 = vmatpush.msra.mxu1 %v147_v14  ;;  %v83_v56 = vld [vmem:[%s964_s1 + $0x210] sm:$0xff]  ;;  %v197_v59 = vunpack.c.l.bf16 %v71_v55  ;;  %v207_v1 = vunpack.c.l.bf16 %v779_v58  ;;  %v198_v17 = vunpack.c.h.bf16 %v71_v55  ;;  %v887_v55 = vld [vmem:[%s964_s1 + $0xb8] sm:$0xff] }
  0x19   :  { %369 = vmatpush.msra.mxu3 %v164_v61  ;;  %291 = vmatpush.msrb.mxu2 %v146_v62  ;;  %v221_v60 = vunpack.c.l.bf16 %v83_v56  ;;  %v67_v61 = vld [vmem:[%s964_s1 + $0x190] sm:$0xff]  ;;  %v230_v62 = vunpack.c.h.bf16 %v87_v47  ;;  %v222_v5 = vunpack.c.h.bf16 %v83_v56  ;;  %v192_v47 = vunpack.c.h.bf16 %v804_v6 }
  0x1a   :  { %254 = vmatpush.msra.mxu0 %v121_v7  ;;  %332 = vmatpush.msra.mxu1 %v139_v21  ;;  %v206_v7 = vunpack.c.h.bf16 %v755_v8  ;;  %v190_v23 = vunpack.c.h.bf16 %v67_v61  ;;  %v31_v56 = vld [vmem:[%s964_s1 + $0x70] sm:$0xff] }
  0x1b   :  { %370 = vmatpush.msra.mxu3 %v156_v3  ;;  %292 = vmatpush.msrb.mxu2 %v138_v4  ;;  %v797_v3 = vld [vmem:[%s964_s1 + $0x238] sm:$0xff]  ;;  %v189_v4 = vunpack.c.l.bf16 %v67_v61  ;;  %v27_v61 = vld [vmem:[%s964_s1 + $0x50] sm:$0xff]  ;;  %v117_v63 = vunpack.c.l.bf16 %v31_v56 }
  0x1c   :  { %255 = vmatpush.msra.mxu0 %v113_v16  ;;  %583 = vmatmul.msk.f32.vlgmr.msra.gmra.mxu2 %vm239_vm0, %v652_v20  ;;  %v231_v14 = vunpack.c.l.bf16 %v797_v3  ;;  %v822_v16 = vld [vmem:[%s964_s1 + $0x178] sm:$0xff] }
  0x1d   :  { %371 = vmatpush.msra.mxu3 %v148_v10  ;;  %293 = vmatpush.msrb.mxu2 %v130_v11  ;;  %v59_v10 = vld [vmem:[%s964_s1 + $0x150] sm:$0xff]  ;;  %v814_v11 = vld [vmem:[%s964_s1 + $0x218] sm:$0xff]  ;;  %v183_v24 = vunpack.c.l.bf16 %v822_v16 }
  0x1e   :  { %256 = vmatpush.msra.mxu0 %v105_v22  ;;  %333 = vmatpush.msra.mxu1 %v131_v27  ;;  %v173_v21 = vunpack.c.l.bf16 %v59_v10  ;;  %v223_v22 = vunpack.c.l.bf16 %v814_v11  ;;  %v51_v27 = vld [vmem:[%s964_s1 + $0x110] sm:$0xff]  ;;  %v174_v35 = vunpack.c.h.bf16 %v59_v10  ;;  %v28_v10 = vld [vmem:[%s964_s1 + $0x58] sm:$0xff] }
  0x1f   :  { %372 = vmatpush.msra.mxu3 %v140_v18  ;;  %294 = vmatpush.msrb.mxu2 %v122_v19  ;;  %v191_v18 = vunpack.c.l.bf16 %v804_v6  ;;  %v55_v19 = vld [vmem:[%s964_s1 + $0x130] sm:$0xff]  ;;  %v109_v6 = vunpack.c.l.bf16 %v27_v61 }
  0x20   :  { %257 = vmatpush.msra.mxu0 %v97_v29  ;;  %334 = vmatpush.msra.mxu1 %v123_v33  ;;  %v182_v29 = vunpack.c.h.bf16 %v63_v2  ;;  %v157_v33 = vunpack.c.l.bf16 %v51_v27  ;;  %v32_v2 = vld [vmem:[%s964_s1 + $0x78] sm:$0xff] }
  0x21   :  { %373 = vmatpush.msra.mxu3 %v132_v25  ;;  %295 = vmatpush.msrb.mxu2 %v114_v26  ;;  %v833_v25 = vld [vmem:[%s964_s1 + $0x158] sm:$0xff]  ;;  %v165_v26 = vunpack.c.l.bf16 %v55_v19 }
  0x22   :  { %258 = vmatpush.msra.mxu0 %v89_v34  ;;  %585 = vmatmul.msk.f32.vlgmr.msrb.gmra.mxu3 %vm239_vm0, %v652_v20  ;;  %v208_v34 = vunpack.c.h.bf16 %v779_v58  ;;  %v176_v58 = vunpack.c.h.bf16 %v833_v25 }
  0x23   :  { %374 = vmatpush.msra.mxu3 %v124_v30  ;;  %296 = vmatpush.msrb.mxu2 %v106_v32  ;;  %v175_v30 = vunpack.c.l.bf16 %v833_v25  ;;  %v47_v32 = vld [vmem:[%s964_s1 + $0xf0] sm:$0xff]  ;;  %v20_v25 = vld [vmem:[%s964_s1 + $0x18] sm:$0xff] }
  0x24   :  { %259 = vmatmul.f32.vlgmr.msra.gmra.mxu0 %v735_v37  ;;  %335 = vmatpush.msra.mxu1 %v115_v39  ;;  %v233_v39 = vld [vmem:[%s966_s2] sm:$0xff] }
  0x25   :  { %375 = vmatpush.msra.mxu3 %v116_v36  ;;  %297 = vmatpush.msrb.mxu2 %v98_v38  ;;  %v854_v36 = vld [vmem:[%s964_s1 + $0x118] sm:$0xff]  ;;  %v43_v38 = vld [vmem:[%s964_s1 + $0xd0] sm:$0xff] }
  0x26   :  { %397 = vmatpush.msrb.mxu0 %v228_v42  ;;  %336 = vmatpush.msra.mxu1 %v107_v44  ;;  %v593_v42 = vmov 0   ;;  %v867_v44 = vld [vmem:[%s964_s1 + $0xf8] sm:$0xff]  ;;  %v141_v8 = vunpack.c.l.bf16 %v43_v38 }
  0x27   :  { %376 = vmatpush.msra.mxu3 %v108_v41  ;;  %298 = vmatpush.msrb.mxu2 %v90_v15  ;;  %v149_v41 = vunpack.c.l.bf16 %v47_v32  ;;  %v166_v15 = vunpack.c.h.bf16 %v55_v19  ;;  %v111_v19 = vunpack.c.l.bf16 %v28_v10 }
  0x28   :  { %299 = vmatmul.f32.vlgmr.msrb.gmra.mxu2 %v735_v37  ;;  %337 = vmatpush.msra.mxu1 %v99_v49  ;;  %v877_v49 = vld [vmem:[%s964_s1 + $0xd8] sm:$0xff] }
  0x29   :  { %377 = vmatpush.msra.mxu3 %v100_v46  ;;  %403 = vmatpush.msra.mxu2 %v213_v48  ;;  %v159_v46 = vunpack.c.l.bf16 %v854_v36  ;;  %v158_v48 = vunpack.c.h.bf16 %v51_v27  ;;  %v232_v27 = vunpack.c.h.bf16 %v797_v3  ;;  %v120_v3 = vunpack.c.h.bf16 %v32_v2 }
  0x2a   :  { %398 = vmatpush.msrb.mxu0 %v220_v51  ;;  %338 = vmatpush.msra.mxu1 %v91_v57  ;;  %v151_v51 = vunpack.c.l.bf16 %v867_v44  ;;  %v143_v57 = vunpack.c.l.bf16 %v877_v49 }
  0x2b   :  { %378 = vmatpush.msra.mxu3 %v92_v52  ;;  %404 = vmatpush.msra.mxu2 %v205_v53  ;;  %v133_v52 = vunpack.c.l.bf16 %v39_v45  ;;  %v184_v53 = vunpack.c.h.bf16 %v822_v16  ;;  %v19_v16 = vld [vmem:[%s964_s1 + $0x10] sm:$0xff] }
  0x2c   :  { %437 = vmatpush.msra.mxu0 %v229_v54  ;;  %339 = vmatmul.f32.vlgmr.msra.gmra.mxu1 %v735_v37  ;;  %v150_v54 = vunpack.c.h.bf16 %v47_v32  ;;  %v94_v32 = vunpack.c.h.bf16 %v19_v16 }
  0x2d   :  { %483 = vmatpush.msrb.mxu3 %v215_v13  ;;  %405 = vmatpush.msra.mxu2 %v197_v59  ;;  %v125_v13 = vunpack.c.l.bf16 %v35_v50  ;;  %v142_v59 = vunpack.c.h.bf16 %v43_v38 }
  0x2e   :  { %379 = vmatmul.f32.vlgmr.msra.gmra.mxu3 %v735_v37  ;;  %438 = vmatpush.msra.mxu0 %v221_v60  ;;  %v897_v60 = vld [vmem:[%s964_s1 + $0x98] sm:$0xff] }
  0x2f   :  { %477 = vmatpush.msrb.mxu1 %v230_v62  ;;  %586 = vmatmul.msk.f32.vlgmr.msrb.gmra.mxu0 %vm239_vm0, %v652_v20  ;;  %v135_v62 = vunpack.c.l.bf16 %v887_v55 }
  0x30   :  { %443 = vmatpush.msrb.mxu0 %v214_v0  ;;  %484 = vmatpush.msrb.mxu3 %v207_v1  ;;  %v168_v0 = vunpack.c.h.bf16 %v843_v31  ;;  %v134_v1 = vunpack.c.h.bf16 %v39_v45  ;;  %v128_v31 = vunpack.c.h.bf16 %v897_v60 }
  0x31   :  { %406 = vmatpush.msra.mxu2 %v189_v4  ;;  %478 = vmatpush.msrb.mxu1 %v222_v5  ;;  %v23_v4 = vld [vmem:[%s964_s1 + $0x30] sm:$0xff]  ;;  %v127_v5 = vunpack.c.l.bf16 %v897_v60 }
  0x32   :  { %444 = vmatpush.msrb.mxu0 %v206_v7  ;;  %485 = vmatpush.msrb.mxu3 %v199_v9  ;;  %v160_v7 = vunpack.c.h.bf16 %v854_v36  ;;  %v126_v9 = vunpack.c.h.bf16 %v35_v50 }
  0x33   :  { %407 = vmatpush.msra.mxu2 %v181_v12  ;;  %517 = vmatpush.msra.mxu1 %v231_v14  ;;  %v119_v12 = vunpack.c.l.bf16 %v32_v2  ;;  %v101_v14 = vunpack.c.l.bf16 %v23_v4 }
  0x34   :  { %445 = vmatpush.msrb.mxu0 %v198_v17  ;;  %486 = vmatpush.msrb.mxu3 %v191_v18  ;;  %v152_v17 = vunpack.c.h.bf16 %v867_v44  ;;  %v118_v18 = vunpack.c.h.bf16 %v31_v56 }
  0x35   :  { %408 = vmatpush.msra.mxu2 %v173_v21  ;;  %518 = vmatpush.msra.mxu1 %v223_v22  ;;  %v24_v21 = vld [vmem:[%s964_s1 + $0x38] sm:$0xff]  ;;  %v93_v22 = vunpack.c.l.bf16 %v19_v16 }
  0x36   :  { %446 = vmatpush.msrb.mxu0 %v190_v23  ;;  %487 = vmatpush.msrb.mxu3 %v183_v24  ;;  %v144_v23 = vunpack.c.h.bf16 %v877_v49  ;;  %v110_v24 = vunpack.c.h.bf16 %v27_v61 }
  0x37   :  { %409 = vmatpush.msra.mxu2 %v165_v26  ;;  %588 = vmatmul.msk.f32.vlgmr.msrb.gmra.mxu1 %vm239_vm0, %v652_v20  ;;  %v103_v26 = vunpack.c.l.bf16 %v24_v21 }
  0x38   :  { %523 = vmatpush.msrb.mxu1 %v216_v28  ;;  %447 = vmatpush.msrb.mxu0 %v182_v29  ;;  %v136_v28 = vunpack.c.h.bf16 %v887_v55  ;;  %v102_v29 = vunpack.c.h.bf16 %v23_v4 }
  0x39   :  { %488 = vmatpush.msrb.mxu3 %v175_v30  ;;  %592 = vset.pattern.permute.xlu0 %v593_v42  ;;  %v95_v30 = vunpack.c.l.bf16 %v20_v25 }
  0x3a   :  { %410 = vmatpush.msra.mxu2 %v157_v33  ;;  %524 = vmatpush.msrb.mxu1 %v208_v34  ;;  %v224_v33 = vunpack.c.h.bf16 %v814_v11  ;;  %v112_v34 = vunpack.c.h.bf16 %v28_v10  ;;  %v96_v11 = vunpack.c.h.bf16 %v20_v25 }
  0x3b   :  { %236 = vperm.xlu0 %592, %v233_v39   ;;  %448 = vmatpush.msrb.mxu0 %v174_v35  ;;  %v104_v35 = vunpack.c.h.bf16 %v24_v21 }
  0x3c   :  { %489 = vmatpush.msrb.mxu3 %v167_v40  ;;  %411 = vmatpush.msra.mxu2 %v149_v41 }
  0x3d   :  { %525 = vmatpush.msrb.mxu1 %v200_v43  ;;  %449 = vmatpush.msrb.mxu0 %v166_v15 }
  0x3e   :  { %490 = vmatpush.msrb.mxu3 %v159_v46  ;;  %412 = vmatpush.msra.mxu2 %v141_v8 }
  0x3f   :  { %526 = vmatpush.msrb.mxu1 %v192_v47  ;;  %450 = vmatpush.msrb.mxu0 %v158_v48 }
  0x40   :  { %491 = vmatpush.msrb.mxu3 %v151_v51  ;;  %413 = vmatpush.msra.mxu2 %v133_v52 }
  0x41   :  { %527 = vmatpush.msrb.mxu1 %v184_v53  ;;  %451 = vmatpush.msrb.mxu0 %v150_v54 }
  0x42   :  { %492 = vmatpush.msrb.mxu3 %v143_v57  ;;  %414 = vmatpush.msra.mxu2 %v125_v13 }
  0x43   :  { %528 = vmatpush.msrb.mxu1 %v176_v58  ;;  %452 = vmatpush.msrb.mxu0 %v142_v59 }
  0x44   :  { %493 = vmatpush.msrb.mxu3 %v135_v62  ;;  %415 = vmatpush.msra.mxu2 %v117_v63 }
  0x45   :  { %529 = vmatpush.msrb.mxu1 %v168_v0  ;;  %453 = vmatpush.msrb.mxu0 %v134_v1 }
  0x46   :  { %494 = vmatpush.msrb.mxu3 %v127_v5  ;;  %416 = vmatpush.msra.mxu2 %v109_v6 }
  0x47   :  { %530 = vmatpush.msrb.mxu1 %v160_v7  ;;  %454 = vmatpush.msrb.mxu0 %v126_v9 }
  0x48   :  { %495 = vmatpush.msrb.mxu3 %v119_v12  ;;  %417 = vmatpush.msra.mxu2 %v101_v14 }
  0x49   :  { %587 = vmatmul.msk.f32.vlgmr.msra.gmra.mxu0 %vm239_vm0, %v652_v20  ;;  %531 = vmatpush.msrb.mxu1 %v152_v17 }
  0x4a   :  { %455 = vmatpush.msrb.mxu0 %v118_v18  ;;  %496 = vmatpush.msrb.mxu3 %v111_v19 }
  0x4b   :  { %418 = vmatpush.msra.mxu2 %v93_v22  ;;  %532 = vmatpush.msrb.mxu1 %v144_v23 }
  0x4c   :  { %419 = vmatmul.f32.vlgmr.msra.gmra.mxu2 %v735_v37  ;;  %456 = vmatpush.msrb.mxu0 %v110_v24 }
  0x4d   :  { %497 = vmatpush.msrb.mxu3 %v103_v26  ;;  %557 = vmatpush.msrb.mxu2 %v232_v27 }
  0x4e   :  { %533 = vmatpush.msrb.mxu1 %v136_v28  ;;  %457 = vmatpush.msrb.mxu0 %v102_v29 }
  0x4f   :  { %498 = vmatpush.msrb.mxu3 %v95_v30  ;;  %589 = vmatmul.msk.f32.vlgmr.msra.gmra.mxu1 %vm239_vm0, %v652_v20 }
  0x50   :  { %499 = vmatmul.f32.vlgmr.msrb.gmra.mxu3 %v735_v37  ;;  %534 = vmatpush.msrb.mxu1 %v128_v31 }
  0x51   :  { %458 = vmatpush.msrb.mxu0 %v94_v32  ;;  %558 = vmatpush.msrb.mxu2 %v224_v33 }
  0x52   :  { %459 = vmatmul.f32.vlgmr.msrb.gmra.mxu0 %v735_v37  ;;  %535 = vmatpush.msrb.mxu1 %v120_v3 }
  0x54   :  { %536 = vmatpush.msrb.mxu1 %v112_v34  ;;  %590 = vmatmul.msk.f32.vlgmr.msrb.gmra.mxu2 %vm239_vm0, %v652_v20 }
  0x56   :  { %537 = vmatpush.msrb.mxu1 %v104_v35 }
  0x58   :  { %538 = vmatpush.msrb.mxu1 %v96_v11 }
  0x59   :  { %539 = vmatmul.f32.vlgmr.msrb.gmra.mxu1 %v735_v37 }
  0x8d   :  { %v320_v36 = vpop.f32.mrf.mxu3 }
  0x9f   :  { %v280_v38 = vpop.f32.mrf.mxu2 }
  0xa1   :  { %v260_v40 = vpop.f32.mrf.mxu0 }
  0xa5   :  { %v360_v39 = vpop.f32.mrf.mxu3 }
  0xa9   :  { %v340_v41 = vpop.f32.mrf.mxu1 }
  0xab   :  { %v300_v42 = vpop.f32.mrf.mxu2 }
  0xac   :  { %v400_v20 = vpop.f32.mrf.mxu0 }
  0xad   :  { %v237_v43 = vpop.permute.xlu0 %236 }
  0xae   :  { %v261_v15 = vadd.f32 %v260_v40, %v237_v43  ;;  %v341_v44 = vadd.f32 %v340_v41, %v237_v43  ;;  %v301_v45 = vadd.f32 %v300_v42, %v237_v43 }
  0xb0   :  { %v281_v46 = vadd.f32 %v280_v38, %v261_v15  ;;  %v361_v8 = vadd.f32 %v360_v39, %v341_v44  ;;  %v321_v47 = vadd.f32 %v320_v36, %v301_v45 }
  0xb1   :  { %v380_v48 = vpop.f32.mrf.mxu3 }
  0xb2   :  { %v381_v49 = vadd.f32 %v380_v48, %v237_v43  ;;  %v563_v50 = vmax.f32 %v281_v46, 0.0  ;;  %v565_v51 = vmax.f32 %v361_v8, 0.0  ;;  %v564_v52 = vmax.f32 %v321_v47, 0.0 }
  0xb4   :  { %v401_v37 = vadd.f32 %v400_v20, %v381_v49  ;;  %571 = vst [vmem:[%s967_s3] sm:$0xff] %v563_v50  ;;  %v480_v54 = vpop.f32.mrf.mxu1 }
  0xb5   :  { %573 = vst [vmem:[%s967_s3 + $0x10] sm:$0xff] %v565_v51 }
  0xb6   :  { %v566_v53 = vmax.f32 %v401_v37, 0.0  ;;  %572 = vst [vmem:[%s967_s3 + $0x8] sm:$0xff] %v564_v52 }
  0xb8   :  { %574 = vst [vmem:[%s967_s3 + $0x18] sm:$0xff] %v566_v53 }
  0xc6   :  { %v440_v55 = vpop.f32.mrf.mxu0 }
  0xcc   :  { %v520_v56 = vpop.f32.mrf.mxu1 }
  0xcf   :  { %v460_v57 = vpop.f32.mrf.mxu0  ;;  %v420_v13 = vpop.f32.mrf.mxu2 }
  0xd0   :  { %v461_v58 = vadd.f32 %v460_v57, %v237_v43  ;;  %v421_v59 = vadd.f32 %v420_v13, %v237_v43 }
  0xd2   :  { %v481_v60 = vadd.f32 %v480_v54, %v461_v58  ;;  %v441_v61 = vadd.f32 %v440_v55, %v421_v59 }
  0xd3   :  { %v500_v62 = vpop.f32.mrf.mxu3 }
  0xd4   :  { %v568_v63 = vmax.f32 %v481_v60, 0.0  ;;  %v567_v0 = vmax.f32 %v441_v61, 0.0  ;;  %v501_v1 = vadd.f32 %v500_v62, %v237_v43 }
  0xd6   :  { %576 = vst [vmem:[%s967_s3 + $0x28] sm:$0xff] %v568_v63  ;;  %v521_v2 = vadd.f32 %v520_v56, %v501_v1  ;;  %v540_v4 = vpop.f32.mrf.mxu1 }
  0xd7   :  { %575 = vst [vmem:[%s967_s3 + $0x20] sm:$0xff] %v567_v0  ;;  %v541_v5 = vadd.f32 %v540_v4, %v237_v43  ;;  %v560_v6 = vpop.f32.mrf.mxu2 }
  0xd8   :  { %v569_v7 = vmax.f32 %v521_v2, 0.0 }
  0xd9   :  { %v561_v9 = vadd.f32 %v560_v6, %v541_v5 }
  0xda   :  { %577 = vst [vmem:[%s967_s3 + $0x30] sm:$0xff] %v569_v7 }
  0xdb   :  { %v570_v10 = vmax.f32 %v561_v9, 0.0 }
  0xdd   :  { %578 = vst [vmem:[%s967_s3 + $0x38] sm:$0xff] %v570_v10 }

// kernel: _lambda_.15
= control target key start
LH: loop header
LB: loop body
LE: loop exit
PB: predicated region body
PF: predicated region fallthrough
CT: control target
= control target key end

     0   :  { %vm130_vm0 = vcmask 588800   ;;  %s501_s1 = inlined_call_operand.vmem [shape: bf16[72,1024], index: 1, kind: input, shape index: {}]   ;;  %s502_s0 = inlined_call_operand.vmem [shape: bf16[8,72], index: 0, kind: input, shape index: {}]   ;;  %s503_s2 = inlined_call_operand.vmem [shape: f32[8,1], index: 2, kind: input, shape index: {}]   ;;  %s504_s3 = inlined_call_operand.vmem [shape: f32[8,1024], index: 3, kind: output, shape index: {}]  }
   0x1   :  { %v49_v0 = vld [vmem:[%s501_s1 + $0x108] sm:$0xff]  ;;  %v48_v7 = vld [vmem:[%s501_s1 + $0x100] sm:$0xff]  ;;  %v51_v47 = vld [vmem:[%s501_s1 + $0x118] sm:$0xff] }
   0x2   :  { %v45_v1 = vld [vmem:[%s501_s1 + $0xe8] sm:$0xff]  ;;  %v118_v3 = vunpack.c.l.bf16 %v49_v0  ;;  %v119_v4 = vunpack.c.h.bf16 %v49_v0  ;;  %v44_v8 = vld [vmem:[%s501_s1 + $0xe0] sm:$0xff]  ;;  %v116_v9 = vunpack.c.l.bf16 %v48_v7  ;;  %v117_v10 = vunpack.c.h.bf16 %v48_v7  ;;  %v47_v53 = vld [vmem:[%s501_s1 + $0xf8] sm:$0xff] }
   0x3   :  { %v41_v2 = vld [vmem:[%s501_s1 + $0xc8] sm:$0xff]  ;;  %v110_v5 = vunpack.c.l.bf16 %v45_v1  ;;  %v111_v6 = vunpack.c.h.bf16 %v45_v1  ;;  %v40_v12 = vld [vmem:[%s501_s1 + $0xc0] sm:$0xff]  ;;  %v108_v15 = vunpack.c.l.bf16 %v44_v8  ;;  %v109_v16 = vunpack.c.h.bf16 %v44_v8  ;;  %v50_v56 = vld [vmem:[%s501_s1 + $0x110] sm:$0xff] }
   0x4   :  { %v37_v11 = vld [vmem:[%s501_s1 + $0xa8] sm:$0xff]  ;;  %181 = vmatpush.msra.mxu2 %v118_v3  ;;  %201 = vmatpush.msra.mxu3 %v119_v4  ;;  %v102_v13 = vunpack.c.l.bf16 %v41_v2  ;;  %v103_v14 = vunpack.c.h.bf16 %v41_v2  ;;  %v36_v17 = vld [vmem:[%s501_s1 + $0xa0] sm:$0xff]  ;;  %v100_v19 = vunpack.c.l.bf16 %v40_v12  ;;  %v101_v20 = vunpack.c.h.bf16 %v40_v12  ;;  %v43_v57 = vld [vmem:[%s501_s1 + $0xd8] sm:$0xff] }
   0x5   :  { %141 = vmatpush.msra.mxu0 %v116_v9  ;;  %161 = vmatpush.msra.mxu1 %v117_v10  ;;  %v33_v18 = vld [vmem:[%s501_s1 + $0x88] sm:$0xff]  ;;  %v94_v21 = vunpack.c.l.bf16 %v37_v11  ;;  %v95_v22 = vunpack.c.h.bf16 %v37_v11  ;;  %v32_v23 = vld [vmem:[%s501_s1 + $0x80] sm:$0xff]  ;;  %v92_v25 = vunpack.c.l.bf16 %v36_v17  ;;  %v93_v26 = vunpack.c.h.bf16 %v36_v17  ;;  %v46_v62 = vld [vmem:[%s501_s1 + $0xf0] sm:$0xff] }
   0x6   :  { %182 = vmatpush.msra.mxu2 %v110_v5  ;;  %202 = vmatpush.msra.mxu3 %v111_v6  ;;  %v29_v24 = vld [vmem:[%s501_s1 + $0x68] sm:$0xff]  ;;  %v86_v27 = vunpack.c.l.bf16 %v33_v18  ;;  %v87_v28 = vunpack.c.h.bf16 %v33_v18  ;;  %v28_v29 = vld [vmem:[%s501_s1 + $0x60] sm:$0xff]  ;;  %v84_v31 = vunpack.c.l.bf16 %v32_v23  ;;  %v85_v32 = vunpack.c.h.bf16 %v32_v23  ;;  %v39_v1 = vld [vmem:[%s501_s1 + $0xb8] sm:$0xff] }
   0x7   :  { %142 = vmatpush.msra.mxu0 %v108_v15  ;;  %162 = vmatpush.msra.mxu1 %v109_v16  ;;  %v25_v30 = vld [vmem:[%s501_s1 + $0x48] sm:$0xff]  ;;  %v78_v33 = vunpack.c.l.bf16 %v29_v24  ;;  %v79_v34 = vunpack.c.h.bf16 %v29_v24  ;;  %v24_v35 = vld [vmem:[%s501_s1 + $0x40] sm:$0xff]  ;;  %v76_v37 = vunpack.c.l.bf16 %v28_v29  ;;  %v77_v38 = vunpack.c.h.bf16 %v28_v29  ;;  %v35_v7 = vld [vmem:[%s501_s1 + $0x98] sm:$0xff] }
   0x8   :  { %183 = vmatpush.msra.mxu2 %v102_v13  ;;  %203 = vmatpush.msra.mxu3 %v103_v14  ;;  %v21_v36 = vld [vmem:[%s501_s1 + $0x28] sm:$0xff]  ;;  %v70_v39 = vunpack.c.l.bf16 %v25_v30  ;;  %v71_v40 = vunpack.c.h.bf16 %v25_v30  ;;  %v20_v41 = vld [vmem:[%s501_s1 + $0x20] sm:$0xff]  ;;  %v68_v43 = vunpack.c.l.bf16 %v24_v35  ;;  %v69_v44 = vunpack.c.h.bf16 %v24_v35  ;;  %v42_v10 = vld [vmem:[%s501_s1 + $0xd0] sm:$0xff] }
   0x9   :  { %143 = vmatpush.msra.mxu0 %v100_v19  ;;  %163 = vmatpush.msra.mxu1 %v101_v20  ;;  %v17_v42 = vld [vmem:[%s501_s1 + $0x8] sm:$0xff]  ;;  %v62_v45 = vunpack.c.l.bf16 %v21_v36  ;;  %v63_v46 = vunpack.c.h.bf16 %v21_v36  ;;  %v60_v48 = vunpack.c.l.bf16 %v20_v41  ;;  %v61_v49 = vunpack.c.h.bf16 %v20_v41  ;;  %v16_v50 = vld [vmem:[%s501_s1] sm:$0xff]  ;;  %v31_v12 = vld [vmem:[%s501_s1 + $0x78] sm:$0xff] }
   0xa   :  { %184 = vmatpush.msra.mxu2 %v94_v21  ;;  %204 = vmatpush.msra.mxu3 %v95_v22  ;;  %v54_v51 = vunpack.c.l.bf16 %v17_v42  ;;  %v55_v52 = vunpack.c.h.bf16 %v17_v42  ;;  %v122_v54 = vunpack.c.l.bf16 %v51_v47  ;;  %v123_v55 = vunpack.c.h.bf16 %v51_v47  ;;  %v14_v4 = vld [vmem:[%s502_s0] sm:$0xf]  ;;  %v38_v15 = vld [vmem:[%s501_s1 + $0xb0] sm:$0xff]  ;;  %v27_v18 = vld [vmem:[%s501_s1 + $0x58] sm:$0xff] }
   0xb   :  { %144 = vmatpush.msra.mxu0 %v92_v25  ;;  %164 = vmatpush.msra.mxu1 %v93_v26  ;;  %v52_v58 = vunpack.c.l.bf16 %v16_v50  ;;  %v53_v59 = vunpack.c.h.bf16 %v16_v50  ;;  %v114_v60 = vunpack.c.l.bf16 %v47_v53  ;;  %v115_v61 = vunpack.c.h.bf16 %v47_v53  ;;  %v34_v21 = vld [vmem:[%s501_s1 + $0x90] sm:$0xff]  ;;  %v23_v24 = vld [vmem:[%s501_s1 + $0x38] sm:$0xff] }
   0xc   :  { %185 = vmatpush.msra.mxu2 %v86_v27  ;;  %205 = vmatpush.msra.mxu3 %v87_v28  ;;  %v120_v63 = vunpack.c.l.bf16 %v50_v56  ;;  %v121_v0 = vunpack.c.h.bf16 %v50_v56  ;;  %v106_v2 = vunpack.c.l.bf16 %v43_v57  ;;  %v107_v3 = vunpack.c.h.bf16 %v43_v57  ;;  %v30_v29 = vld [vmem:[%s501_s1 + $0x70] sm:$0xff] }
   0xd   :  { %145 = vmatpush.msra.mxu0 %v84_v31  ;;  %165 = vmatpush.msra.mxu1 %v85_v32  ;;  %v112_v5 = vunpack.c.l.bf16 %v46_v62  ;;  %v113_v6 = vunpack.c.h.bf16 %v46_v62  ;;  %v98_v8 = vunpack.c.l.bf16 %v39_v1  ;;  %v99_v9 = vunpack.c.h.bf16 %v39_v1  ;;  %v19_v32 = vld [vmem:[%s501_s1 + $0x18] sm:$0xff]  ;;  %v26_v35 = vld [vmem:[%s501_s1 + $0x50] sm:$0xff] }
   0xe   :  { %186 = vmatpush.msra.mxu2 %v78_v33  ;;  %206 = vmatpush.msra.mxu3 %v79_v34  ;;  %v426_v11 = vunpack.c.l.bf16 %v14_v4  ;;  %v90_v13 = vunpack.c.l.bf16 %v35_v7  ;;  %v91_v14 = vunpack.c.h.bf16 %v35_v7  ;;  %v104_v16 = vunpack.c.l.bf16 %v42_v10  ;;  %v18_v41 = vld [vmem:[%s501_s1 + $0x10] sm:$0xff] }
   0xf   :  { %146 = vmatpush.msra.mxu0 %v76_v37  ;;  %166 = vmatpush.msra.mxu1 %v77_v38  ;;  %v105_v17 = vunpack.c.h.bf16 %v42_v10  ;;  %v82_v19 = vunpack.c.l.bf16 %v31_v12  ;;  %v83_v20 = vunpack.c.h.bf16 %v31_v12  ;;  %v96_v22 = vunpack.c.l.bf16 %v38_v15  ;;  %v22_v38 = vld [vmem:[%s501_s1 + $0x30] sm:$0xff] }
  0x10   :  { %187 = vmatpush.msra.mxu2 %v70_v39  ;;  %207 = vmatpush.msra.mxu3 %v71_v40  ;;  %v97_v23 = vunpack.c.h.bf16 %v38_v15  ;;  %v74_v25 = vunpack.c.l.bf16 %v27_v18  ;;  %v75_v26 = vunpack.c.h.bf16 %v27_v18  ;;  %v88_v27 = vunpack.c.l.bf16 %v34_v21 }
  0x11   :  { %147 = vmatpush.msra.mxu0 %v68_v43  ;;  %167 = vmatpush.msra.mxu1 %v69_v44  ;;  %v89_v28 = vunpack.c.h.bf16 %v34_v21  ;;  %v66_v30 = vunpack.c.l.bf16 %v23_v24  ;;  %v67_v31 = vunpack.c.h.bf16 %v23_v24  ;;  %v80_v33 = vunpack.c.l.bf16 %v30_v29 }
  0x12   :  { %188 = vmatpush.msra.mxu2 %v62_v45  ;;  %208 = vmatpush.msra.mxu3 %v63_v46  ;;  %v81_v34 = vunpack.c.h.bf16 %v30_v29  ;;  %v58_v36 = vunpack.c.l.bf16 %v19_v32  ;;  %v59_v37 = vunpack.c.h.bf16 %v19_v32  ;;  %v72_v39 = vunpack.c.l.bf16 %v26_v35  ;;  %v124_v46 = vld [vmem:[%s503_s2] sm:$0xff] }
  0x13   :  { %148 = vmatpush.msra.mxu0 %v60_v48  ;;  %168 = vmatpush.msra.mxu1 %v61_v49  ;;  %v73_v40 = vunpack.c.h.bf16 %v26_v35  ;;  %v64_v42 = vunpack.c.l.bf16 %v22_v38  ;;  %v65_v43 = vunpack.c.h.bf16 %v22_v38  ;;  %v56_v44 = vunpack.c.l.bf16 %v18_v41 }
  0x14   :  { %189 = vmatpush.msra.mxu2 %v54_v51  ;;  %209 = vmatpush.msra.mxu3 %v55_v52  ;;  %v57_v45 = vunpack.c.h.bf16 %v18_v41  ;;  %v324_v47 = vmov 0  }
  0x15   :  { %149 = vmatpush.msra.mxu0 %v52_v58  ;;  %169 = vmatpush.msra.mxu1 %v53_v59 }
  0x16   :  { %261 = vmatpush.msrb.mxu2 %v122_v54  ;;  %281 = vmatpush.msrb.mxu3 %v123_v55 }
  0x17   :  { %221 = vmatpush.msrb.mxu0 %v120_v63  ;;  %241 = vmatpush.msrb.mxu1 %v121_v0 }
  0x18   :  { %262 = vmatpush.msrb.mxu2 %v114_v60  ;;  %282 = vmatpush.msrb.mxu3 %v115_v61 }
  0x19   :  { %222 = vmatpush.msrb.mxu0 %v112_v5  ;;  %242 = vmatpush.msrb.mxu1 %v113_v6 }
  0x1a   :  { %263 = vmatpush.msrb.mxu2 %v106_v2  ;;  %283 = vmatpush.msrb.mxu3 %v107_v3 }
  0x1b   :  { %316 = vmatmul.msk.f32.vlgmr.msra.gmra.mxu2 %vm130_vm0, %v426_v11  ;;  %317 = vmatmul.msk.f32.vlgmr.msra.gmra.mxu3 %vm130_vm0, %v426_v11 }
  0x1c   :  { %264 = vmatpush.msrb.mxu2 %v98_v8  ;;  %284 = vmatpush.msrb.mxu3 %v99_v9 }
  0x1d   :  { %223 = vmatpush.msrb.mxu0 %v104_v16  ;;  %243 = vmatpush.msrb.mxu1 %v105_v17 }
  0x1e   :  { %265 = vmatpush.msrb.mxu2 %v90_v13  ;;  %285 = vmatpush.msrb.mxu3 %v91_v14 }
  0x1f   :  { %224 = vmatpush.msrb.mxu0 %v96_v22  ;;  %244 = vmatpush.msrb.mxu1 %v97_v23 }
  0x20   :  { %266 = vmatpush.msrb.mxu2 %v82_v19  ;;  %286 = vmatpush.msrb.mxu3 %v83_v20 }
  0x21   :  { %225 = vmatpush.msrb.mxu0 %v88_v27  ;;  %245 = vmatpush.msrb.mxu1 %v89_v28 }
  0x22   :  { %267 = vmatpush.msrb.mxu2 %v74_v25  ;;  %287 = vmatpush.msrb.mxu3 %v75_v26 }
  0x23   :  { %314 = vmatmul.msk.f32.vlgmr.msra.gmra.mxu0 %vm130_vm0, %v426_v11  ;;  %315 = vmatmul.msk.f32.vlgmr.msra.gmra.mxu1 %vm130_vm0, %v426_v11 }
  0x24   :  { %268 = vmatpush.msrb.mxu2 %v66_v30  ;;  %288 = vmatpush.msrb.mxu3 %v67_v31 }
  0x25   :  { %226 = vmatpush.msrb.mxu0 %v80_v33  ;;  %246 = vmatpush.msrb.mxu1 %v81_v34 }
  0x26   :  { %269 = vmatpush.msrb.mxu2 %v58_v36  ;;  %289 = vmatpush.msrb.mxu3 %v59_v37 }
  0x27   :  { %320 = vmatmul.msk.f32.vlgmr.msrb.gmra.mxu2 %vm130_vm0, %v426_v11  ;;  %321 = vmatmul.msk.f32.vlgmr.msrb.gmra.mxu3 %vm130_vm0, %v426_v11 }
  0x28   :  { %227 = vmatpush.msrb.mxu0 %v72_v39  ;;  %247 = vmatpush.msrb.mxu1 %v73_v40 }
  0x29   :  { %323 = vset.pattern.permute.xlu0 %v324_v47 }
  0x2a   :  { %228 = vmatpush.msrb.mxu0 %v64_v42  ;;  %248 = vmatpush.msrb.mxu1 %v65_v43 }
  0x2b   :  { %127 = vperm.xlu0 %323, %v124_v46  }
  0x2c   :  { %229 = vmatpush.msrb.mxu0 %v56_v44  ;;  %249 = vmatpush.msrb.mxu1 %v57_v45 }
  0x2d   :  { %318 = vmatmul.msk.f32.vlgmr.msrb.gmra.mxu0 %vm130_vm0, %v426_v11  ;;  %319 = vmatmul.msk.f32.vlgmr.msrb.gmra.mxu1 %vm130_vm0, %v426_v11 }
  0x9d   :  { %v128_v48 = vpop.permute.xlu0 %127 }
  0x9e   :  { %v191_v49 = vpop.f32.mrf.mxu2  ;;  %v211_v50 = vpop.f32.mrf.mxu3 }
  0x9f   :  { %v192_v51 = vadd.f32 %v191_v49, %v128_v48  ;;  %v212_v52 = vadd.f32 %v211_v50, %v128_v48 }
  0xa0   :  { %v151_v53 = vpop.f32.mrf.mxu0  ;;  %v171_v54 = vpop.f32.mrf.mxu1 }
  0xa1   :  { %v152_v55 = vadd.f32 %v151_v53, %v128_v48  ;;  %v172_v56 = vadd.f32 %v171_v54, %v128_v48  ;;  %v296_v57 = vmax.f32 %v192_v51, 0.0  ;;  %v297_v58 = vmax.f32 %v212_v52, 0.0 }
  0xa3   :  { %v294_v59 = vmax.f32 %v152_v55, 0.0  ;;  %v295_v60 = vmax.f32 %v172_v56, 0.0  ;;  %304 = vst [vmem:[%s504_s3 + $0x10] sm:$0xff] %v296_v57 }
  0xa4   :  { %305 = vst [vmem:[%s504_s3 + $0x18] sm:$0xff] %v297_v58 }
  0xa5   :  { %302 = vst [vmem:[%s504_s3] sm:$0xff] %v294_v59 }
  0xa6   :  { %303 = vst [vmem:[%s504_s3 + $0x8] sm:$0xff] %v295_v60 }
  0xaa   :  { %v231_v61 = vpop.f32.mrf.mxu0  ;;  %v251_v62 = vpop.f32.mrf.mxu1 }
  0xab   :  { %v232_v63 = vadd.f32 %v231_v61, %v128_v48  ;;  %v252_v0 = vadd.f32 %v251_v62, %v128_v48  ;;  %v271_v1 = vpop.f32.mrf.mxu2  ;;  %v291_v2 = vpop.f32.mrf.mxu3 }
  0xac   :  { %v272_v3 = vadd.f32 %v271_v1, %v128_v48  ;;  %v292_v4 = vadd.f32 %v291_v2, %v128_v48 }
  0xad   :  { %v298_v5 = vmax.f32 %v232_v63, 0.0  ;;  %v299_v6 = vmax.f32 %v252_v0, 0.0 }
  0xae   :  { %v300_v7 = vmax.f32 %v272_v3, 0.0  ;;  %v301_v8 = vmax.f32 %v292_v4, 0.0 }
  0xaf   :  { %306 = vst [vmem:[%s504_s3 + $0x20] sm:$0xff] %v298_v5 }
  0xb0   :  { %307 = vst [vmem:[%s504_s3 + $0x28] sm:$0xff] %v299_v6 }
  0xb1   :  { %308 = vst [vmem:[%s504_s3 + $0x30] sm:$0xff] %v300_v7 }
  0xb2   :  { %309 = vst [vmem:[%s504_s3 + $0x38] sm:$0xff] %v301_v8 }

// kernel: mul.6
= control target key start
LH: loop header
LB: loop body
LE: loop exit
PB: predicated region body
PF: predicated region fallthrough
CT: control target
= control target key end

     0   :  { %s304_s0 = inlined_call_operand.vmem [shape: f32[2,8], index: 0, kind: input, shape index: {}]   ;;  %s305_s1 = inlined_call_operand.vmem [shape: f32[2,16,16,8], index: 1, kind: output, shape index: {}]  }
   0x1   :  { %v4_v0 = vld [vmem:[%s304_s0] ss:$0 sm:$0xff]  ;;  %v131_v1 = vld [vmem:[%s304_s0 + $0x2] ss:$0 sm:$0xff]  ;;  %v135_v2 = vld [vmem:[%s304_s0 + $0x4] ss:$0 sm:$0xff] }
   0x2   :  { %5 = vbcast.lane.b32.xlu0 %v4_v0, 0  ;;  %16 = vbcast.lane.b32.xlu1 %v131_v1, 0  ;;  %v129_v3 = vld [vmem:[%s304_s0 + $0x1] ss:$0 sm:$0xff]  ;;  %v133_v4 = vld [vmem:[%s304_s0 + $0x3] ss:$0 sm:$0xff]  ;;  %v137_v5 = vld [vmem:[%s304_s0 + $0x5] ss:$0 sm:$0xff] }
   0x3   :  { %28 = vbcast.lane.b32.xlu2 %v135_v2, 0  ;;  %v139_v6 = vld [vmem:[%s304_s0 + $0x6] ss:$0 sm:$0xff]  ;;  %v141_v7 = vld [vmem:[%s304_s0 + $0x7] ss:$0 sm:$0xff] }
   0xa   :  { %10 = vbcast.lane.b32.xlu0 %v129_v3, 0  ;;  %22 = vbcast.lane.b32.xlu1 %v133_v4, 0 }
   0xb   :  { %34 = vbcast.lane.b32.xlu2 %v137_v5, 0 }
  0x12   :  { %40 = vbcast.lane.b32.xlu0 %v139_v6, 0  ;;  %46 = vbcast.lane.b32.xlu1 %v141_v7, 0 }
  0x13   :  { %51 = vbcast.lane.b32.xlu2 %v4_v0, 1 }
  0x1a   :  { %57 = vbcast.lane.b32.xlu0 %v129_v3, 1  ;;  %63 = vbcast.lane.b32.xlu1 %v131_v1, 1 }
  0x1b   :  { %69 = vbcast.lane.b32.xlu2 %v133_v4, 1 }
  0x22   :  { %75 = vbcast.lane.b32.xlu0 %v135_v2, 1  ;;  %81 = vbcast.lane.b32.xlu1 %v137_v5, 1 }
  0x23   :  { %87 = vbcast.lane.b32.xlu2 %v139_v6, 1 }
  0x2a   :  { %93 = vbcast.lane.b32.xlu0 %v141_v7, 1 }
  0x5d   :  { %v29_v8 = vpop.permute.xlu2 %28 }
  0x5e   :  { %136 = vst [vmem:[%s305_s1 + $0x80] sm:$0xff] %v29_v8 }
  0x5f   :  { %162 = vst [vmem:[%s305_s1 + $0x88] sm:$0xff] %v29_v8 }
  0x65   :  { %v35_v9 = vpop.permute.xlu2 %34 }
  0x66   :  { %138 = vst [vmem:[%s305_s1 + $0xa0] sm:$0xff] %v35_v9 }
  0x67   :  { %163 = vst [vmem:[%s305_s1 + $0xa8] sm:$0xff] %v35_v9 }
  0x6d   :  { %v52_v10 = vpop.permute.xlu2 %51 }
  0x6e   :  { %143 = vst [vmem:[%s305_s1 + $0x10] sm:$0xff] %v52_v10 }
  0x6f   :  { %166 = vst [vmem:[%s305_s1 + $0x18] sm:$0xff] %v52_v10 }
  0x74   :  { %v6_v11 = vpop.permute.xlu0 %5  ;;  %v17_v12 = vpop.permute.xlu1 %16 }
  0x75   :  { %7 = vst [vmem:[%s305_s1] sm:$0xff] %v6_v11  ;;  %v70_v13 = vpop.permute.xlu2 %69 }
  0x76   :  { %158 = vst [vmem:[%s305_s1 + $0x8] sm:$0xff] %v6_v11 }
  0x77   :  { %132 = vst [vmem:[%s305_s1 + $0x40] sm:$0xff] %v17_v12 }
  0x78   :  { %160 = vst [vmem:[%s305_s1 + $0x48] sm:$0xff] %v17_v12 }
  0x79   :  { %149 = vst [vmem:[%s305_s1 + $0x70] sm:$0xff] %v70_v13 }
  0x7a   :  { %169 = vst [vmem:[%s305_s1 + $0x78] sm:$0xff] %v70_v13 }
  0x7c   :  { %v11_v14 = vpop.permute.xlu0 %10  ;;  %v23_v15 = vpop.permute.xlu1 %22 }
  0x7d   :  { %130 = vst [vmem:[%s305_s1 + $0x20] sm:$0xff] %v11_v14  ;;  %v88_v16 = vpop.permute.xlu2 %87 }
  0x7e   :  { %159 = vst [vmem:[%s305_s1 + $0x28] sm:$0xff] %v11_v14 }
  0x7f   :  { %134 = vst [vmem:[%s305_s1 + $0x60] sm:$0xff] %v23_v15 }
  0x80   :  { %161 = vst [vmem:[%s305_s1 + $0x68] sm:$0xff] %v23_v15 }
  0x81   :  { %155 = vst [vmem:[%s305_s1 + $0xd0] sm:$0xff] %v88_v16 }
  0x82   :  { %172 = vst [vmem:[%s305_s1 + $0xd8] sm:$0xff] %v88_v16 }
  0x84   :  { %v41_v17 = vpop.permute.xlu0 %40  ;;  %v47_v18 = vpop.permute.xlu1 %46 }
  0x85   :  { %140 = vst [vmem:[%s305_s1 + $0xc0] sm:$0xff] %v41_v17 }
  0x86   :  { %164 = vst [vmem:[%s305_s1 + $0xc8] sm:$0xff] %v41_v17 }
  0x87   :  { %142 = vst [vmem:[%s305_s1 + $0xe0] sm:$0xff] %v47_v18 }
  0x88   :  { %165 = vst [vmem:[%s305_s1 + $0xe8] sm:$0xff] %v47_v18 }
  0x8c   :  { %v58_v19 = vpop.permute.xlu0 %57  ;;  %v64_v20 = vpop.permute.xlu1 %63 }
  0x8d   :  { %145 = vst [vmem:[%s305_s1 + $0x30] sm:$0xff] %v58_v19 }
  0x8e   :  { %167 = vst [vmem:[%s305_s1 + $0x38] sm:$0xff] %v58_v19 }
  0x8f   :  { %147 = vst [vmem:[%s305_s1 + $0x50] sm:$0xff] %v64_v20 }
  0x90   :  { %168 = vst [vmem:[%s305_s1 + $0x58] sm:$0xff] %v64_v20 }
  0x94   :  { %v76_v21 = vpop.permute.xlu0 %75  ;;  %v82_v22 = vpop.permute.xlu1 %81 }
  0x95   :  { %151 = vst [vmem:[%s305_s1 + $0x90] sm:$0xff] %v76_v21 }
  0x96   :  { %170 = vst [vmem:[%s305_s1 + $0x98] sm:$0xff] %v76_v21 }
  0x97   :  { %153 = vst [vmem:[%s305_s1 + $0xb0] sm:$0xff] %v82_v22 }
  0x98   :  { %171 = vst [vmem:[%s305_s1 + $0xb8] sm:$0xff] %v82_v22 }
  0x9c   :  { %v94_v23 = vpop.permute.xlu0 %93 }
  0x9d   :  { %157 = vst [vmem:[%s305_s1 + $0xf0] sm:$0xff] %v94_v23 }
  0x9e   :  { %173 = vst [vmem:[%s305_s1 + $0xf8] sm:$0xff] %v94_v23 }

// kernel: _lambda_.13
= control target key start
LH: loop header
LB: loop body
LE: loop exit
PB: predicated region body
PF: predicated region fallthrough
CT: control target
= control target key end

     0   :  { %v178_v3 = vmov 0   ;;  %vm76_vm0 = vcmask 588800   ;;  %s271_s1 = inlined_call_operand.vmem [shape: bf16[72,512], index: 1, kind: input, shape index: {}]   ;;  %s272_s0 = inlined_call_operand.vmem [shape: bf16[8,72], index: 0, kind: input, shape index: {}]   ;;  %s273_s2 = inlined_call_operand.vmem [shape: f32[8,1], index: 2, kind: input, shape index: {}]   ;;  %s274_s3 = inlined_call_operand.vmem [shape: f32[8,512], index: 3, kind: output, shape index: {}]  }
   0x1   :  { %v33_v0 = vld [vmem:[%s271_s1 + $0x88] sm:$0xff]  ;;  %v31_v1 = vld [vmem:[%s271_s1 + $0x78] sm:$0xff]  ;;  %177 = vset.pattern.permute.xlu0 %v178_v3  ;;  %v32_v8 = vld [vmem:[%s271_s1 + $0x80] sm:$0xff] }
   0x2   :  { %v29_v2 = vld [vmem:[%s271_s1 + $0x68] sm:$0xff]  ;;  %v68_v4 = vunpack.c.l.bf16 %v33_v0  ;;  %v69_v5 = vunpack.c.h.bf16 %v33_v0  ;;  %v64_v6 = vunpack.c.l.bf16 %v31_v1  ;;  %v65_v7 = vunpack.c.h.bf16 %v31_v1  ;;  %v30_v9 = vld [vmem:[%s271_s1 + $0x70] sm:$0xff]  ;;  %v27_v12 = vld [vmem:[%s271_s1 + $0x58] sm:$0xff] }
   0x3   :  { %v66_v10 = vunpack.c.l.bf16 %v32_v8  ;;  %v67_v11 = vunpack.c.h.bf16 %v32_v8  ;;  %v28_v13 = vld [vmem:[%s271_s1 + $0x60] sm:$0xff]  ;;  %v60_v14 = vunpack.c.l.bf16 %v29_v2  ;;  %v61_v15 = vunpack.c.h.bf16 %v29_v2  ;;  %v26_v18 = vld [vmem:[%s271_s1 + $0x50] sm:$0xff]  ;;  %v25_v19 = vld [vmem:[%s271_s1 + $0x48] sm:$0xff] }
   0x4   :  { %127 = vmatpush.msra.mxu2 %v68_v4  ;;  %147 = vmatpush.msra.mxu3 %v69_v5  ;;  %v62_v16 = vunpack.c.l.bf16 %v30_v9  ;;  %v63_v17 = vunpack.c.h.bf16 %v30_v9  ;;  %v58_v20 = vunpack.c.l.bf16 %v28_v13  ;;  %v59_v21 = vunpack.c.h.bf16 %v28_v13  ;;  %v24_v24 = vld [vmem:[%s271_s1 + $0x40] sm:$0xff]  ;;  %v23_v25 = vld [vmem:[%s271_s1 + $0x38] sm:$0xff]  ;;  %v22_v30 = vld [vmem:[%s271_s1 + $0x30] sm:$0xff] }
   0x5   :  { %87 = vmatpush.msra.mxu0 %v66_v10  ;;  %107 = vmatpush.msra.mxu1 %v67_v11  ;;  %v56_v22 = vunpack.c.l.bf16 %v27_v12  ;;  %v57_v23 = vunpack.c.h.bf16 %v27_v12  ;;  %v54_v26 = vunpack.c.l.bf16 %v26_v18  ;;  %v55_v27 = vunpack.c.h.bf16 %v26_v18  ;;  %v21_v31 = vld [vmem:[%s271_s1 + $0x28] sm:$0xff]  ;;  %v20_v36 = vld [vmem:[%s271_s1 + $0x20] sm:$0xff]  ;;  %v19_v37 = vld [vmem:[%s271_s1 + $0x18] sm:$0xff] }
   0x6   :  { %128 = vmatpush.msra.mxu2 %v64_v6  ;;  %148 = vmatpush.msra.mxu3 %v65_v7  ;;  %v52_v28 = vunpack.c.l.bf16 %v25_v19  ;;  %v53_v29 = vunpack.c.h.bf16 %v25_v19  ;;  %v50_v32 = vunpack.c.l.bf16 %v24_v24  ;;  %v51_v33 = vunpack.c.h.bf16 %v24_v24  ;;  %v18_v42 = vld [vmem:[%s271_s1 + $0x10] sm:$0xff]  ;;  %v17_v43 = vld [vmem:[%s271_s1 + $0x8] sm:$0xff]  ;;  %v14_v48 = vld [vmem:[%s272_s0] sm:$0xf] }
   0x7   :  { %88 = vmatpush.msra.mxu0 %v62_v16  ;;  %108 = vmatpush.msra.mxu1 %v63_v17  ;;  %v48_v34 = vunpack.c.l.bf16 %v23_v25  ;;  %v49_v35 = vunpack.c.h.bf16 %v23_v25  ;;  %v46_v38 = vunpack.c.l.bf16 %v22_v30  ;;  %v47_v39 = vunpack.c.h.bf16 %v22_v30  ;;  %v16_v51 = vld [vmem:[%s271_s1] sm:$0xff] }
   0x8   :  { %129 = vmatpush.msra.mxu2 %v60_v14  ;;  %149 = vmatpush.msra.mxu3 %v61_v15  ;;  %v44_v40 = vunpack.c.l.bf16 %v21_v31  ;;  %v45_v41 = vunpack.c.h.bf16 %v21_v31  ;;  %v42_v44 = vunpack.c.l.bf16 %v20_v36  ;;  %v43_v45 = vunpack.c.h.bf16 %v20_v36  ;;  %v70_v57 = vld [vmem:[%s273_s2] sm:$0xff] }
   0x9   :  { %89 = vmatpush.msra.mxu0 %v58_v20  ;;  %109 = vmatpush.msra.mxu1 %v59_v21  ;;  %v40_v46 = vunpack.c.l.bf16 %v19_v37  ;;  %v41_v47 = vunpack.c.h.bf16 %v19_v37  ;;  %v38_v49 = vunpack.c.l.bf16 %v18_v42  ;;  %v39_v50 = vunpack.c.h.bf16 %v18_v42 }
   0xa   :  { %130 = vmatpush.msra.mxu2 %v56_v22  ;;  %150 = vmatpush.msra.mxu3 %v57_v23  ;;  %v36_v52 = vunpack.c.l.bf16 %v17_v43  ;;  %v37_v53 = vunpack.c.h.bf16 %v17_v43  ;;  %v15_v54 = vunpack.c.l.bf16 %v14_v48  ;;  %v34_v55 = vunpack.c.l.bf16 %v16_v51 }
   0xb   :  { %90 = vmatpush.msra.mxu0 %v54_v26  ;;  %110 = vmatpush.msra.mxu1 %v55_v27  ;;  %v35_v56 = vunpack.c.h.bf16 %v16_v51 }
   0xc   :  { %131 = vmatpush.msra.mxu2 %v52_v28  ;;  %151 = vmatpush.msra.mxu3 %v53_v29 }
   0xd   :  { %91 = vmatpush.msra.mxu0 %v50_v32  ;;  %111 = vmatpush.msra.mxu1 %v51_v33 }
   0xe   :  { %132 = vmatpush.msra.mxu2 %v48_v34  ;;  %152 = vmatpush.msra.mxu3 %v49_v35 }
   0xf   :  { %92 = vmatpush.msra.mxu0 %v46_v38  ;;  %112 = vmatpush.msra.mxu1 %v47_v39 }
  0x10   :  { %133 = vmatpush.msra.mxu2 %v44_v40  ;;  %153 = vmatpush.msra.mxu3 %v45_v41 }
  0x11   :  { %93 = vmatpush.msra.mxu0 %v42_v44  ;;  %113 = vmatpush.msra.mxu1 %v43_v45 }
  0x12   :  { %134 = vmatpush.msra.mxu2 %v40_v46  ;;  %154 = vmatpush.msra.mxu3 %v41_v47 }
  0x13   :  { %94 = vmatpush.msra.mxu0 %v38_v49  ;;  %114 = vmatpush.msra.mxu1 %v39_v50 }
  0x14   :  { %135 = vmatpush.msra.mxu2 %v36_v52  ;;  %155 = vmatpush.msra.mxu3 %v37_v53 }
  0x15   :  { %174 = vmatmul.msk.f32.vlgmr.msra.gmra.mxu2 %vm76_vm0, %v15_v54  ;;  %175 = vmatmul.msk.f32.vlgmr.msra.gmra.mxu3 %vm76_vm0, %v15_v54 }
  0x16   :  { %95 = vmatpush.msra.mxu0 %v34_v55  ;;  %115 = vmatpush.msra.mxu1 %v35_v56 }
  0x17   :  { %172 = vmatmul.msk.f32.vlgmr.msra.gmra.mxu0 %vm76_vm0, %v15_v54  ;;  %173 = vmatmul.msk.f32.vlgmr.msra.gmra.mxu1 %vm76_vm0, %v15_v54 }
  0x18   :  { %73 = vperm.xlu0 %177, %v70_v57  }
  0x8a   :  { %v74_v58 = vpop.permute.xlu0 %73 }
  0x94   :  { %v97_v59 = vpop.f32.mrf.mxu0  ;;  %v117_v60 = vpop.f32.mrf.mxu1 }
  0x95   :  { %v98_v61 = vadd.f32 %v97_v59, %v74_v58  ;;  %v118_v62 = vadd.f32 %v117_v60, %v74_v58 }
  0x97   :  { %v160_v63 = vmax.f32 %v98_v61, 0.0  ;;  %v161_v0 = vmax.f32 %v118_v62, 0.0 }
  0x98   :  { %v137_v1 = vpop.f32.mrf.mxu2  ;;  %v157_v2 = vpop.f32.mrf.mxu3 }
  0x99   :  { %164 = vst [vmem:[%s274_s3] sm:$0xff] %v160_v63  ;;  %v138_v3 = vadd.f32 %v137_v1, %v74_v58  ;;  %v158_v4 = vadd.f32 %v157_v2, %v74_v58 }
  0x9a   :  { %165 = vst [vmem:[%s274_s3 + $0x8] sm:$0xff] %v161_v0 }
  0x9b   :  { %v162_v5 = vmax.f32 %v138_v3, 0.0  ;;  %v163_v6 = vmax.f32 %v158_v4, 0.0 }
  0x9d   :  { %166 = vst [vmem:[%s274_s3 + $0x10] sm:$0xff] %v162_v5 }
  0x9e   :  { %167 = vst [vmem:[%s274_s3 + $0x18] sm:$0xff] %v163_v6 }

// kernel: _lambda_.16
= control target key start
LH: loop header
LB: loop body
LE: loop exit
PB: predicated region body
PF: predicated region fallthrough
CT: control target
= control target key end

     0   :  { %v279_v3 = vmov 0   ;;  %vm76_vm0 = vcmask 588800   ;;  %vm242_vm8 = vcmask 1043456   ;;  %s381_s1 = inlined_call_operand.vmem [shape: bf16[72,512], index: 1, kind: input, shape index: {}]   ;;  %s382_s0 = inlined_call_operand.vmem [shape: bf16[3,72], index: 0, kind: input, shape index: {}]   ;;  %s383_s2 = inlined_call_operand.vmem [shape: f32[3,1], index: 2, kind: input, shape index: {}]   ;;  %s384_s3 = inlined_call_operand.vmem [shape: f32[3,512], index: 3, kind: output, shape index: {}]  }
   0x1   :  { %v32_v0 = vld [vmem:[%s381_s1 + $0x80] sm:$0xff]  ;;  %v33_v1 = vld [vmem:[%s381_s1 + $0x88] sm:$0xff]  ;;  %v30_v2 = vld [vmem:[%s381_s1 + $0x70] sm:$0xff]  ;;  %262 = vset.pattern.permute.xlu0 %v279_v3 }
   0x2   :  { %v66_v4 = vunpack.c.l.bf16 %v32_v0  ;;  %v67_v5 = vunpack.c.h.bf16 %v32_v0  ;;  %v68_v6 = vunpack.c.l.bf16 %v33_v1  ;;  %v69_v7 = vunpack.c.h.bf16 %v33_v1  ;;  %v31_v8 = vld [vmem:[%s381_s1 + $0x78] sm:$0xff]  ;;  %v28_v9 = vld [vmem:[%s381_s1 + $0x60] sm:$0xff]  ;;  %v29_v10 = vld [vmem:[%s381_s1 + $0x68] sm:$0xff] }
   0x3   :  { %v62_v11 = vunpack.c.l.bf16 %v30_v2  ;;  %v63_v12 = vunpack.c.h.bf16 %v30_v2  ;;  %v64_v13 = vunpack.c.l.bf16 %v31_v8  ;;  %v65_v14 = vunpack.c.h.bf16 %v31_v8  ;;  %v26_v15 = vld [vmem:[%s381_s1 + $0x50] sm:$0xff]  ;;  %v27_v18 = vld [vmem:[%s381_s1 + $0x58] sm:$0xff]  ;;  %v24_v21 = vld [vmem:[%s381_s1 + $0x40] sm:$0xff] }
   0x4   :  { %87 = vmatpush.msra.mxu0 %v66_v4  ;;  %107 = vmatpush.msra.mxu1 %v67_v5  ;;  %v58_v16 = vunpack.c.l.bf16 %v28_v9  ;;  %v59_v17 = vunpack.c.h.bf16 %v28_v9  ;;  %v60_v19 = vunpack.c.l.bf16 %v29_v10  ;;  %v61_v20 = vunpack.c.h.bf16 %v29_v10  ;;  %v25_v24 = vld [vmem:[%s381_s1 + $0x48] sm:$0xff]  ;;  %v22_v27 = vld [vmem:[%s381_s1 + $0x30] sm:$0xff]  ;;  %v23_v30 = vld [vmem:[%s381_s1 + $0x38] sm:$0xff] }
   0x5   :  { %127 = vmatpush.msra.mxu2 %v68_v6  ;;  %147 = vmatpush.msra.mxu3 %v69_v7  ;;  %v54_v22 = vunpack.c.l.bf16 %v26_v15  ;;  %v55_v23 = vunpack.c.h.bf16 %v26_v15  ;;  %v56_v25 = vunpack.c.l.bf16 %v27_v18  ;;  %v57_v26 = vunpack.c.h.bf16 %v27_v18  ;;  %v20_v33 = vld [vmem:[%s381_s1 + $0x20] sm:$0xff]  ;;  %v21_v36 = vld [vmem:[%s381_s1 + $0x28] sm:$0xff]  ;;  %v18_v39 = vld [vmem:[%s381_s1 + $0x10] sm:$0xff] }
   0x6   :  { %88 = vmatpush.msra.mxu0 %v62_v11  ;;  %108 = vmatpush.msra.mxu1 %v63_v12  ;;  %v50_v28 = vunpack.c.l.bf16 %v24_v21  ;;  %v51_v29 = vunpack.c.h.bf16 %v24_v21  ;;  %v52_v31 = vunpack.c.l.bf16 %v25_v24  ;;  %v53_v32 = vunpack.c.h.bf16 %v25_v24  ;;  %v19_v42 = vld [vmem:[%s381_s1 + $0x18] sm:$0xff]  ;;  %v16_v45 = vld [vmem:[%s381_s1] sm:$0xff]  ;;  %v17_v48 = vld [vmem:[%s381_s1 + $0x8] sm:$0xff] }
   0x7   :  { %128 = vmatpush.msra.mxu2 %v64_v13  ;;  %148 = vmatpush.msra.mxu3 %v65_v14  ;;  %v46_v34 = vunpack.c.l.bf16 %v22_v27  ;;  %v47_v35 = vunpack.c.h.bf16 %v22_v27  ;;  %v48_v37 = vunpack.c.l.bf16 %v23_v30  ;;  %v49_v38 = vunpack.c.h.bf16 %v23_v30  ;;  %v14_v51 = vld [vmem:[%s382_s0] sm:$0x3] }
   0x8   :  { %89 = vmatpush.msra.mxu0 %v58_v16  ;;  %109 = vmatpush.msra.mxu1 %v59_v17  ;;  %v42_v40 = vunpack.c.l.bf16 %v20_v33  ;;  %v43_v41 = vunpack.c.h.bf16 %v20_v33  ;;  %v44_v43 = vunpack.c.l.bf16 %v21_v36  ;;  %v45_v44 = vunpack.c.h.bf16 %v21_v36  ;;  %v70_v57 = vld [vmem:[%s383_s2] sm:$0x7] }
   0x9   :  { %129 = vmatpush.msra.mxu2 %v60_v19  ;;  %149 = vmatpush.msra.mxu3 %v61_v20  ;;  %v38_v46 = vunpack.c.l.bf16 %v18_v39  ;;  %v39_v47 = vunpack.c.h.bf16 %v18_v39  ;;  %v40_v49 = vunpack.c.l.bf16 %v19_v42  ;;  %v41_v50 = vunpack.c.h.bf16 %v19_v42 }
   0xa   :  { %90 = vmatpush.msra.mxu0 %v54_v22  ;;  %110 = vmatpush.msra.mxu1 %v55_v23  ;;  %v34_v52 = vunpack.c.l.bf16 %v16_v45  ;;  %v35_v53 = vunpack.c.h.bf16 %v16_v45  ;;  %v36_v54 = vunpack.c.l.bf16 %v17_v48  ;;  %v37_v55 = vunpack.c.h.bf16 %v17_v48 }
   0xb   :  { %130 = vmatpush.msra.mxu2 %v56_v25  ;;  %150 = vmatpush.msra.mxu3 %v57_v26  ;;  %v15_v56 = vunpack.c.l.bf16 %v14_v51 }
   0xc   :  { %91 = vmatpush.msra.mxu0 %v50_v28  ;;  %111 = vmatpush.msra.mxu1 %v51_v29 }
   0xd   :  { %131 = vmatpush.msra.mxu2 %v52_v31  ;;  %151 = vmatpush.msra.mxu3 %v53_v32 }
   0xe   :  { %92 = vmatpush.msra.mxu0 %v46_v34  ;;  %112 = vmatpush.msra.mxu1 %v47_v35 }
   0xf   :  { %132 = vmatpush.msra.mxu2 %v48_v37  ;;  %152 = vmatpush.msra.mxu3 %v49_v38 }
  0x10   :  { %93 = vmatpush.msra.mxu0 %v42_v40  ;;  %113 = vmatpush.msra.mxu1 %v43_v41 }
  0x11   :  { %133 = vmatpush.msra.mxu2 %v44_v43  ;;  %153 = vmatpush.msra.mxu3 %v45_v44 }
  0x12   :  { %94 = vmatpush.msra.mxu0 %v38_v46  ;;  %114 = vmatpush.msra.mxu1 %v39_v47 }
  0x13   :  { %134 = vmatpush.msra.mxu2 %v40_v49  ;;  %154 = vmatpush.msra.mxu3 %v41_v50 }
  0x14   :  { %95 = vmatpush.msra.mxu0 %v34_v52  ;;  %115 = vmatpush.msra.mxu1 %v35_v53 }
  0x15   :  { %135 = vmatpush.msra.mxu2 %v36_v54  ;;  %155 = vmatpush.msra.mxu3 %v37_v55 }
  0x16   :  { %253 = vmatmul.msk.f32.vlgmr.msra.gmra.mxu0 %vm76_vm0, %v15_v56  ;;  %254 = vmatmul.msk.f32.vlgmr.msra.gmra.mxu1 %vm76_vm0, %v15_v56 }
  0x17   :  { %255 = vmatmul.msk.f32.vlgmr.msra.gmra.mxu2 %vm76_vm0, %v15_v56  ;;  %256 = vmatmul.msk.f32.vlgmr.msra.gmra.mxu3 %vm76_vm0, %v15_v56 }
  0x18   :  { %73 = vperm.xlu0 %262, %v70_v57  }
  0x8a   :  { %v74_v58 = vpop.permute.xlu0 %73 }
  0x93   :  { %v97_v59 = vpop.f32.mrf.mxu0  ;;  %v117_v60 = vpop.f32.mrf.mxu1 }
  0x94   :  { %v98_v61 = vadd.f32 %v97_v59, %v74_v58  ;;  %v118_v62 = vadd.f32 %v117_v60, %v74_v58 }
  0x96   :  { %v257_v63 = vmul.f32 -1.442695, %v98_v61  ;;  %v258_v0 = vmul.f32 -1.442695, %v118_v62 }
  0x98   :  { %263 = vpow2.f32 %v257_v63 }
  0x99   :  { %265 = vpow2.f32 %v258_v0 }
  0x9a   :  { %v137_v1 = vpop.f32.mrf.mxu2  ;;  %v157_v2 = vpop.f32.mrf.mxu3 }
  0x9b   :  { %v138_v3 = vadd.f32 %v137_v1, %v74_v58  ;;  %v158_v4 = vadd.f32 %v157_v2, %v74_v58 }
  0x9d   :  { %v259_v5 = vmul.f32 -1.442695, %v138_v3  ;;  %v260_v6 = vmul.f32 -1.442695, %v158_v4 }
  0x9e   :  { %v264_v7 = vpop.eup %263 }
  0x9f   :  { %v266_v8 = vpop.eup %265  ;;  %v172_v9 = vadd.f32 1.0, %v264_v7  ;;  %267 = vpow2.f32 %v259_v5 }
  0xa0   :  { %v173_v10 = vadd.f32 1.0, %v266_v8  ;;  %269 = vpow2.f32 %v260_v6 }
  0xa1   :  { %271 = vrcp.f32 %v172_v9  ;;  %vm181_vm1 = vweird.f32 %v172_v9  ;;  %v187_v27 = vand.u32 2147483648, %v172_v9  ;;  %v185_v29 = vand.u32 2147483647, %v172_v9 }
  0xa2   :  { %273 = vrcp.f32 %v173_v10  ;;  %v200_v22 = vand.u32 2147483647, %v173_v10  ;;  %v202_v23 = vand.u32 2147483648, %v173_v10  ;;  %vm196_vm3 = vweird.f32 %v173_v10 }
  0xa3   :  { %v188_v38 = vor.u32 1.1754944e-38, %v187_v27  ;;  %vm186_vm9 = vcmp.eq.f32.partialorder %v185_v29, 8.507059e+37 }
  0xa4   :  { %vm201_vm7 = vcmp.eq.f32.partialorder %v200_v22, 8.507059e+37  ;;  %v203_v33 = vor.u32 1.1754944e-38, %v202_v23 }
  0xa5   :  { %v268_v11 = vpop.eup %267 }
  0xa6   :  { %v270_v12 = vpop.eup %269  ;;  %v360_v13 = vadd.f32 1.0, %v268_v11 }
  0xa7   :  { %v272_v14 = vpop.eup %271  ;;  %v175_v15 = vadd.f32 1.0, %v270_v12 }
  0xa8   :  { %v274_v16 = vpop.eup %273  ;;  %v177_v17 = vmul.f32 %v272_v14, %v172_v9  ;;  %275 = vrcp.f32 %v360_v13  ;;  %vm182_vm2 = vweird.f32 %v272_v14  ;;  %vm211_vm12 = vweird.f32 %v360_v13 }
  0xa9   :  { %v192_v18 = vmul.f32 %v274_v16, %v173_v10  ;;  %277 = vrcp.f32 %v175_v15  ;;  %vm197_vm4 = vweird.f32 %v274_v16  ;;  %vm363_vm5 = vmor %vm181_vm1, %vm182_vm2  ;;  %v230_v44 = vand.u32 2147483647, %v175_v15 }
  0xaa   :  { %v178_v19 = vsub.f32 1.0, %v177_v17  ;;  %vm198_vm6 = vmor %vm196_vm3, %vm197_vm4  ;;  %v232_v45 = vand.u32 2147483648, %v175_v15  ;;  %v217_v49 = vand.u32 2147483648, %v360_v13  ;;  %v215_v50 = vand.u32 2147483647, %v360_v13 }
  0xab   :  { %v193_v20 = vsub.f32 1.0, %v192_v18  ;;  %vm226_vm14 = vweird.f32 %v175_v15  ;;  %vm231_vm0 = vcmp.eq.f32.partialorder %v230_v44, 8.507059e+37 }
  0xac   :  { %v179_v21 = vmul.f32 %v272_v14, %v178_v19  ;;  %v233_v52 = vor.u32 1.1754944e-38, %v232_v45  ;;  %v218_v55 = vor.u32 1.1754944e-38, %v217_v49  ;;  %vm216_vm1 = vcmp.eq.f32.partialorder %v215_v50, 8.507059e+37 }
  0xad   :  { %v194_v24 = vmul.f32 %v274_v16, %v193_v20 }
  0xae   :  { %v276_v25 = vpop.eup %275  ;;  %v180_v26 = vadd.f32 %v272_v14, %v179_v21 }
  0xaf   :  { %v195_v30 = vadd.f32 %v274_v16, %v194_v24  ;;  %v207_v31 = vmul.f32 %v276_v25, %v360_v13  ;;  %v278_v32 = vpop.eup %277  ;;  %vm212_vm10 = vweird.f32 %v276_v25 }
  0xb0   :  { %v184_v34 = vsel %vm363_vm5, %v272_v14, %v180_v26  ;;  %v222_v37 = vmul.f32 %v278_v32, %v175_v15  ;;  %vm227_vm11 = vweird.f32 %v278_v32  ;;  %vm213_vm13 = vmor %vm211_vm12, %vm212_vm10 }
  0xb1   :  { %v199_v35 = vsel %vm198_vm6, %v274_v16, %v195_v30  ;;  %v208_v36 = vsub.f32 1.0, %v207_v31  ;;  %v189_v43 = vsel %vm186_vm9, %v188_v38, %v184_v34  ;;  %vm228_vm15 = vmor %vm226_vm14, %vm227_vm11 }
  0xb2   :  { %v204_v39 = vsel %vm201_vm7, %v203_v33, %v199_v35  ;;  %v223_v42 = vsub.f32 1.0, %v222_v37 }
  0xb3   :  { %v240_v40 = vrot.slane %v204_v39, 4  ;;  %v209_v41 = vmul.f32 %v276_v25, %v208_v36 }
  0xb4   :  { %v224_v48 = vmul.f32 %v278_v32, %v223_v42 }
  0xb5   :  { %v243_v46 = vsel %vm242_vm8, %v189_v43, %v240_v40  ;;  %v210_v47 = vadd.f32 %v276_v25, %v209_v41 }
  0xb6   :  { %247 = vst [vmem:[%s384_s3] sm:$0x77] %v243_v46  ;;  %v225_v51 = vadd.f32 %v278_v32, %v224_v48 }
  0xb7   :  { %v214_v53 = vsel %vm213_vm13, %v276_v25, %v210_v47 }
  0xb8   :  { %v229_v54 = vsel %vm228_vm15, %v278_v32, %v225_v51  ;;  %v219_v58 = vsel %vm216_vm1, %v218_v55, %v214_v53 }
  0xb9   :  { %v234_v56 = vsel %vm231_vm0, %v233_v52, %v229_v54 }
  0xba   :  { %v241_v57 = vrot.slane %v234_v56, 4 }
  0xbc   :  { %v244_v59 = vsel %vm242_vm8, %v219_v58, %v241_v57 }
  0xbd   :  { %248 = vst [vmem:[%s384_s3 + $0x8] sm:$0x77] %v244_v59 }

// kernel: _lambda_.19
= control target key start
LH: loop header
LB: loop body
LE: loop exit
PB: predicated region body
PF: predicated region fallthrough
CT: control target
= control target key end

     0   :  { %vm50_vm0 = vcmask 1042432   ;;  %v165_v3 = vmov 0   ;;  %vm46_vm1 = vcmask 220160   ;;  %s226_s1 = inlined_call_operand.vmem [shape: bf16[27,512], index: 1, kind: input, shape index: {}]   ;;  %s227_s0 = inlined_call_operand.vmem [shape: bf16[8,27], index: 0, kind: input, shape index: {}]   ;;  %s228_s2 = inlined_call_operand.vmem [shape: f32[8,1], index: 2, kind: input, shape index: {}]   ;;  %s229_s3 = inlined_call_operand.vmem [shape: bf16[8,512], index: 3, kind: output, shape index: {}]  }
   0x1   :  { %v23_v0 = vld [vmem:[%s226_s1 + $0x38] sm:$0x33]  ;;  %v21_v1 = vld [vmem:[%s226_s1 + $0x28] sm:$0xff]  ;;  %164 = vset.pattern.permute.xlu0 %v165_v3  ;;  %v22_v8 = vld [vmem:[%s226_s1 + $0x30] sm:$0x33] }
   0x2   :  { %v19_v2 = vld [vmem:[%s226_s1 + $0x18] sm:$0xff]  ;;  %v38_v4 = vunpack.c.l.bf16 %v23_v0  ;;  %v39_v5 = vunpack.c.h.bf16 %v23_v0  ;;  %v34_v6 = vunpack.c.l.bf16 %v21_v1  ;;  %v35_v7 = vunpack.c.h.bf16 %v21_v1  ;;  %v17_v11 = vld [vmem:[%s226_s1 + $0x8] sm:$0xff]  ;;  %v20_v12 = vld [vmem:[%s226_s1 + $0x20] sm:$0xff] }
   0x3   :  { %v36_v9 = vunpack.c.l.bf16 %v22_v8  ;;  %v37_v10 = vunpack.c.h.bf16 %v22_v8  ;;  %v18_v13 = vld [vmem:[%s226_s1 + $0x10] sm:$0xff]  ;;  %v30_v14 = vunpack.c.l.bf16 %v19_v2  ;;  %v31_v15 = vunpack.c.h.bf16 %v19_v2  ;;  %v14_v16 = vld [vmem:[%s227_s0] sm:$0xf] }
   0x4   :  { %159 = vmatpush.msk.msra.mxu2 %vm50_vm0, %v38_v4  ;;  %161 = vmatpush.msk.msra.mxu3 %vm50_vm0, %v39_v5  ;;  %v32_v17 = vunpack.c.l.bf16 %v20_v12  ;;  %v33_v18 = vunpack.c.h.bf16 %v20_v12  ;;  %v28_v19 = vunpack.c.l.bf16 %v18_v13  ;;  %v29_v20 = vunpack.c.h.bf16 %v18_v13  ;;  %v16_v21 = vld [vmem:[%s226_s1] sm:$0xff] }
   0x5   :  { %155 = vmatpush.msk.msra.mxu0 %vm50_vm0, %v36_v9  ;;  %157 = vmatpush.msk.msra.mxu1 %vm50_vm0, %v37_v10  ;;  %v26_v22 = vunpack.c.l.bf16 %v17_v11  ;;  %v27_v23 = vunpack.c.h.bf16 %v17_v11  ;;  %v15_v24 = vunpack.c.l.bf16 %v14_v16  ;;  %v24_v25 = vunpack.c.l.bf16 %v16_v21  ;;  %v40_v27 = vld [vmem:[%s228_s2] sm:$0xff] }
   0x6   :  { %116 = vmatpush.msra.mxu2 %v34_v6  ;;  %136 = vmatpush.msra.mxu3 %v35_v7  ;;  %v25_v26 = vunpack.c.h.bf16 %v16_v21 }
   0x7   :  { %76 = vmatpush.msra.mxu0 %v32_v17  ;;  %96 = vmatpush.msra.mxu1 %v33_v18 }
   0x8   :  { %117 = vmatpush.msra.mxu2 %v30_v14  ;;  %137 = vmatpush.msra.mxu3 %v31_v15 }
   0x9   :  { %77 = vmatpush.msra.mxu0 %v28_v19  ;;  %97 = vmatpush.msra.mxu1 %v29_v20 }
   0xa   :  { %118 = vmatpush.msra.mxu2 %v26_v22  ;;  %138 = vmatpush.msra.mxu3 %v27_v23 }
   0xb   :  { %160 = vmatmul.msk.f32.vlgmr.msra.gmra.mxu2 %vm46_vm1, %v15_v24  ;;  %162 = vmatmul.msk.f32.vlgmr.msra.gmra.mxu3 %vm46_vm1, %v15_v24 }
   0xc   :  { %78 = vmatpush.msra.mxu0 %v24_v25  ;;  %98 = vmatpush.msra.mxu1 %v25_v26 }
   0xd   :  { %156 = vmatmul.msk.f32.vlgmr.msra.gmra.mxu0 %vm46_vm1, %v15_v24  ;;  %158 = vmatmul.msk.f32.vlgmr.msra.gmra.mxu1 %vm46_vm1, %v15_v24 }
   0xe   :  { %43 = vperm.xlu0 %164, %v40_v27  }
  0x80   :  { %v44_v28 = vpop.permute.xlu0 %43 }
  0x8a   :  { %v80_v29 = vpop.f32.mrf.mxu0  ;;  %v100_v30 = vpop.f32.mrf.mxu1 }
  0x8b   :  { %v81_v31 = vadd.f32 %v80_v29, %v44_v28  ;;  %v101_v32 = vadd.f32 %v100_v30, %v44_v28 }
  0x8d   :  { %v143_v33 = vmax.f32 %v81_v31, 0.0  ;;  %v144_v34 = vmax.f32 %v101_v32, 0.0 }
  0x8e   :  { %v120_v35 = vpop.f32.mrf.mxu2  ;;  %v140_v36 = vpop.f32.mrf.mxu3 }
  0x8f   :  { %v147_v37 = vpack.c.bf16 %v144_v34, %v143_v33  ;;  %v121_v38 = vadd.f32 %v120_v35, %v44_v28  ;;  %v141_v39 = vadd.f32 %v140_v36, %v44_v28 }
  0x91   :  { %149 = vst [vmem:[%s229_s3] sm:$0xff] %v147_v37  ;;  %v145_v40 = vmax.f32 %v121_v38, 0.0  ;;  %v146_v41 = vmax.f32 %v141_v39, 0.0 }
  0x93   :  { %v148_v42 = vpack.c.bf16 %v146_v41, %v145_v40 }
  0x95   :  { %150 = vst [vmem:[%s229_s3 + $0x8] sm:$0xff] %v148_v42 }

// kernel: _lambda_.17
= control target key start
LH: loop header
LB: loop body
LE: loop exit
PB: predicated region body
PF: predicated region fallthrough
CT: control target
= control target key end

     0   :  { %vm34_vm0 = vcmask 1042432   ;;  %v75_v3 = vmov 0   ;;  %vm30_vm1 = vcmask 220160   ;;  %s114_s1 = inlined_call_operand.vmem [shape: bf16[27,128], index: 1, kind: input, shape index: {}]   ;;  %s115_s2 = inlined_call_operand.vmem [shape: f32[8,1], index: 2, kind: input, shape index: {}]   ;;  %s116_s0 = inlined_call_operand.vmem [shape: bf16[8,27], index: 0, kind: input, shape index: {}]   ;;  %s117_s3 = inlined_call_operand.vmem [shape: bf16[8,128], index: 3, kind: output, shape index: {}]  }
   0x1   :  { %v19_v0 = vld [vmem:[%s114_s1 + $0xc] sm:$0x3]  ;;  %v18_v1 = vld [vmem:[%s114_s1 + $0x8] sm:$0xf]  ;;  %v70_v2 = vld [vmem:[%s114_s1] sm:$0xff]   ;;  %74 = vset.pattern.permute.xlu0 %v75_v3 }
   0x2   :  { %v23_v4 = vunpack.c.l.bf16 %v19_v0  ;;  %v22_v5 = vunpack.c.l.bf16 %v18_v1  ;;  %v24_v6 = vld [vmem:[%s115_s2] sm:$0xff]  ;;  %v72_v7 = vunpack.c.h.bf16 %v70_v2  ;;  %v71_v9 = vunpack.c.l.bf16 %v70_v2 }
   0x3   :  { %27 = vperm.xlu0 %74, %v24_v6   ;;  %v14_v8 = vld [vmem:[%s116_s0] sm:$0xf] }
   0x4   :  { %67 = vmatpush.msk.msra.mxu0 %vm34_vm0, %v23_v4  ;;  %v15_v10 = vunpack.c.l.bf16 %v14_v8 }
   0x6   :  { %51 = vmatpush.msra.mxu0 %v22_v5 }
   0x8   :  { %52 = vmatpush.msra.mxu0 %v72_v7 }
   0xa   :  { %53 = vmatpush.msra.mxu0 %v71_v9 }
   0xb   :  { %68 = vmatmul.msk.f32.vlgmr.msra.gmra.mxu0 %vm30_vm1, %v15_v10 }
  0x75   :  { %v28_v11 = vpop.permute.xlu0 %27 }
  0x88   :  { %v55_v12 = vpop.f32.mrf.mxu0 }
  0x89   :  { %v56_v13 = vadd.f32 %v55_v12, %v28_v11 }
  0x8b   :  { %vm58_vm2 = vcmp.gt.f32.partialorder %v56_v13, 0.0  ;;  %v59_v14 = vmul.f32 0.2, %v56_v13 }
  0x8d   :  { %v60_v15 = vsel %vm58_vm2, %v56_v13, %v59_v14 }
  0x8e   :  { %v61_v16 = vpack.c.bf16 %v60_v15, %v60_v15 }
  0x90   :  { %62 = vst [vmem:[%s117_s3] sm:$0xf] %v61_v16 }

// kernel: _lambda_.18
= control target key start
LH: loop header
LB: loop body
LE: loop exit
PB: predicated region body
PF: predicated region fallthrough
CT: control target
= control target key end

     0   :  { %v95_v2 = vmov 0   ;;  %vm40_vm0 = vcmask 588800   ;;  %vm67_vm2 = vcmask 261120   ;;  %s140_s1 = inlined_call_operand.vmem [shape: bf16[72,32], index: 1, kind: input, shape index: {}]   ;;  %s141_s2 = inlined_call_operand.vmem [shape: f32[8,1], index: 2, kind: input, shape index: {}]   ;;  %s142_s0 = inlined_call_operand.vmem [shape: bf16[8,72], index: 0, kind: input, shape index: {}]   ;;  %s143_s3 = inlined_call_operand.vmem [shape: f32[8,32], index: 3, kind: output, shape index: {}]  }
   0x1   :  { %v24_v0 = vld [vmem:[%s140_s1 + $0x20] sm:$0xf]  ;;  %v92_v1 = vld [vmem:[%s140_s1 + $0x18] sm:$0xff]   ;;  %94 = vset.pattern.permute.xlu0 %v95_v2  ;;  %v91_v5 = vld [vmem:[%s140_s1 + $0x10] sm:$0xff]  }
   0x2   :  { %v33_v3 = vunpack.c.l.bf16 %v24_v0  ;;  %v89_v4 = vunpack.c.h.bf16 %v92_v1  ;;  %v34_v6 = vld [vmem:[%s141_s2] sm:$0xff]  ;;  %v88_v7 = vunpack.c.l.bf16 %v92_v1  ;;  %v85_v8 = vunpack.c.h.bf16 %v91_v5  ;;  %v90_v9 = vld [vmem:[%s140_s1 + $0x8] sm:$0xff]  }
   0x3   :  { %37 = vperm.xlu0 %94, %v34_v6   ;;  %v84_v10 = vunpack.c.l.bf16 %v91_v5  ;;  %v81_v11 = vunpack.c.h.bf16 %v90_v9  ;;  %v75_v12 = vld [vmem:[%s140_s1] sm:$0xff]   ;;  %v80_v13 = vunpack.c.l.bf16 %v90_v9 }
   0x4   :  { %51 = vmatpush.msra.mxu0 %v33_v3  ;;  %v77_v14 = vunpack.c.h.bf16 %v75_v12  ;;  %v14_v15 = vld [vmem:[%s142_s0] sm:$0xf]  ;;  %v76_v16 = vunpack.c.l.bf16 %v75_v12 }
   0x5   :  { %v15_v17 = vunpack.c.l.bf16 %v14_v15 }
   0x6   :  { %52 = vmatpush.msra.mxu0 %v89_v4 }
   0x8   :  { %53 = vmatpush.msra.mxu0 %v88_v7 }
   0xa   :  { %54 = vmatpush.msra.mxu0 %v85_v8 }
   0xc   :  { %55 = vmatpush.msra.mxu0 %v84_v10 }
   0xe   :  { %56 = vmatpush.msra.mxu0 %v81_v11 }
  0x10   :  { %57 = vmatpush.msra.mxu0 %v80_v13 }
  0x12   :  { %58 = vmatpush.msra.mxu0 %v77_v14 }
  0x14   :  { %59 = vmatpush.msra.mxu0 %v76_v16 }
  0x15   :  { %73 = vmatmul.msk.f32.vlgmr.msra.gmra.mxu0 %vm40_vm0, %v15_v17 }
  0x75   :  { %v38_v18 = vpop.permute.xlu0 %37 }
  0x92   :  { %v61_v19 = vpop.f32.mrf.mxu0 }
  0x93   :  { %v62_v20 = vadd.f32 %v61_v19, %v38_v18 }
  0x95   :  { %vm64_vm1 = vcmp.gt.f32.partialorder %v62_v20, 0.0  ;;  %v65_v21 = vmul.f32 0.2, %v62_v20 }
  0x97   :  { %v66_v22 = vsel %vm64_vm1, %v62_v20, %v65_v21 }
  0x98   :  { %68 = vst.msk [vmem:[%s143_s3] sm:$0xff] %vm67_vm2, %v66_v22 }

// kernel: _lambda_.23
= control target key start
LH: loop header
LB: loop body
LE: loop exit
PB: predicated region body
PF: predicated region fallthrough
CT: control target
= control target key end

     0   :  { %s921_s0 = inlined_call_operand.vmem [shape: f32[2,8], index: 0, kind: input, shape index: {}]   ;;  %s922_s1 = inlined_call_operand.vmem [shape: f32[8,4], index: 1, kind: input, shape index: {}]   ;;  %s923_s2 = inlined_call_operand.vmem [shape: f32[1,4], index: 2, kind: input, shape index: {}]   ;;  %s924_s3 = inlined_call_operand.vmem [shape: f32[2,4], index: 3, kind: input, shape index: {}]   ;;  %s925_s4 = inlined_call_operand.vmem [shape: f32[32,72], index: 4, kind: input, shape index: {}]   ;;  %s926_s5 = inlined_call_operand.vmem [shape: f32[72,1], index: 5, kind: input, shape index: {}]   ;;  %s927_s6 = inlined_call_operand.<no memory space> [shape: f32[1,1], index: 6, kind: input, shape index: {}]   ;;  %s928_s7 = inlined_call_operand.vmem [shape: f32[32,128], index: 7, kind: input, shape index: {}]   ;;  %s929_s8 = inlined_call_operand.vmem [shape: f32[32,128], index: 8, kind: input, shape index: {}]   ;;  %s930_s9 = inlined_call_operand.vmem [shape: f32[2,8,256], index: 9, kind: input, shape index: {}]   ;;  %s931_s10 = inlined_call_operand.vmem [shape: f32[2,8,256], index: 10, kind: input, shape index: {}]   ;;  %s932_s11 = inlined_call_operand.vmem [shape: f32[2,8,256], index: 11, kind: input, shape index: {}]   ;;  %s933_s12 = inlined_call_operand.vmem [shape: f32[2,8,256], index: 12, kind: input, shape index: {}]   ;;  %s934_s13 = inlined_call_operand.vmem [shape: f32[2,8], index: 13, kind: input, shape index: {}]   ;;  %s935_s14 = inlined_call_operand.vmem [shape: f32[2,8], index: 14, kind: input, shape index: {}]   ;;  %s936_s15 = inlined_call_operand.vmem [shape: f32[6], index: 15, kind: output, shape index: {}]  }
   0x1   :  { %v20_v0 = vstv %s927_s6 }
   0x2   :  { %21 = vst [vmem:[#allocation2] sm:$0x1] %v20_v0 }
   0x3   :  { %v54_v1 = vld [vmem:[%s922_s1] sm:$0xff]  ;;  %vm60_vm0 = vcmask 64512  }
   0x4   :  { %v53_v2 = vld [vmem:[%s921_s0] sm:$0x3]  ;;  %79 = vmatpush.msra.mxu0 %v54_v1 }
   0x5   :  { %22 = vsyncpa [#allocation4], 0  ;;  %643 = vmatmul.msk.f32.vlgmr.msra.gmra.mxu0 %vm60_vm0, %v53_v2  ;;  %v127_v3 = vld [vmem:[%s926_s5 + $0x40] sm:$0xff]  ;;  %v126_v4 = vld [vmem:[%s926_s5 + $0x38] sm:$0xff]  ;;  %vm132_vm1 = vcmask 588800   ;;  %vm84_vm2 = vcmask 25600  }
   0x6   :  { %152 = vmatpush.msra.mxu1 %v127_v3  ;;  %v125_v5 = vld [vmem:[%s926_s5 + $0x30] sm:$0xff]  ;;  %v239_v6 = vld [vmem:[%s932_s11] sm:$0xff]  ;;  %v240_v7 = vld [vmem:[%s932_s11 + $0x8] sm:$0xff]  ;;  %vm182_vm3 = vcmask 7168   ;;  %vm615_vm4 = vcmask 58368   ;;  %vm102_vm5 = vcmask 1024  }
   0x7   :  { %262 = vmatpush.xpose.msra.mxu2 %v239_v6  ;;  %v124_v8 = vld [vmem:[%s926_s5 + $0x28] sm:$0xff]  ;;  %282 = vmatpush.xpose.msra.mxu3 %v240_v7  ;;  %v242_v9 = vld [vmem:[%s932_s11 + $0x18] sm:$0xff]  ;;  %v231_v10 = vld [vmem:[%s930_s9] sm:$0xff]  ;;  %s633_s21 = sshll.u32 %s936_s15, 4  ;;  %s634_s21 = int_to_ptr.vmem [resolvable:$true] %s633_s21 }
   0x8   :  { %153 = vmatpush.msra.mxu1 %v126_v4  ;;  %v241_v11 = vld [vmem:[%s932_s11 + $0x10] sm:$0xff]  ;;  %v123_v13 = vld [vmem:[%s926_s5 + $0x20] sm:$0xff]  ;;  %v234_v14 = vld [vmem:[%s930_s9 + $0x18] sm:$0xff] }
   0x9   :  { %v233_v12 = vld [vmem:[%s930_s9 + $0x10] sm:$0xff]  ;;  %v232_v15 = vld [vmem:[%s930_s9 + $0x8] sm:$0xff]  ;;  %v122_v16 = vld [vmem:[%s926_s5 + $0x18] sm:$0xff]  ;;  %302 = vmatpush.xpose.msrb.mxu0 %v241_v11 }
   0xa   :  { %154 = vmatpush.msra.mxu1 %v125_v5  ;;  %263 = vmatmul.f32.vlgmr.msra.gmra.mxu2 %v239_v6  ;;  %v121_v17 = vld [vmem:[%s926_s5 + $0x10] sm:$0xff]  ;;  %v243_v18 = vld [vmem:[%s933_s12] sm:$0xff]  ;;  %v120_v19 = vld [vmem:[%s926_s5 + $0x8] sm:$0xff] }
   0xb   :  { %322 = vmatpush.xpose.msrb.mxu2 %v242_v9  ;;  %344 = vmatpush.xpose.msrb.mxu3 %v231_v10  ;;  %v244_v20 = vld [vmem:[%s933_s12 + $0x8] sm:$0xff]  ;;  %v245_v21 = vld [vmem:[%s933_s12 + $0x10] sm:$0xff]  ;;  %v119_v22 = vld [vmem:[%s926_s5] sm:$0xff] }
   0xc   :  { %155 = vmatpush.msra.mxu1 %v124_v8  ;;  %283 = vmatmul.f32.vlgmr.msra.gmra.mxu3 %v240_v7  ;;  %v115_v23 = vld [vmem:[%s925_s4] sm:$0xff]  ;;  %v246_v24 = vld [vmem:[%s933_s12 + $0x18] sm:$0xff]  ;;  %v236_v26 = vld [vmem:[%s931_s10 + $0x8] sm:$0xff] }
   0xd   :  { %364 = vmatpush.xpose.msra.mxu0 %v232_v15  ;;  %v235_v25 = vld [vmem:[%s931_s10] sm:$0xff]  ;;  %v116_v28 = vld [vmem:[%s925_s4 + $0x8] sm:$0xff]  ;;  %v237_v29 = vld [vmem:[%s931_s10 + $0x10] sm:$0xff] }
   0xe   :  { %156 = vmatpush.msra.mxu1 %v123_v13  ;;  %303 = vmatmul.f32.vlgmr.msrb.gmra.mxu0 %v241_v11  ;;  %v665_v27 = vld [vmem:[%s923_s2] ss:$0 sm:$0xff]  ;;  %v238_v33 = vld [vmem:[%s931_s10 + $0x18] sm:$0xff]  ;;  %v117_v37 = vld [vmem:[%s925_s4 + $0x10] sm:$0xff]  ;;  %s685_s10 = smov [#allocation3]  }
   0xf   :  { %384 = vmatpush.xpose.msra.mxu2 %v233_v12  ;;  %404 = vmatpush.xpose.msra.mxu3 %v234_v14  ;;  %v56_v31 = vld [vmem:[%s924_s3] sm:$0x3]  ;;  %v118_v38 = vld [vmem:[%s925_s4 + $0x18] sm:$0xff] }
  0x10   :  { %157 = vmatpush.msra.mxu1 %v122_v16  ;;  %v666_v51 = vld [vmem:[#allocation2] ss:$0 sm:$0xff] }
  0x11   :  { %444 = vmatpush.xpose.msrb.mxu0 %v243_v18 }
  0x12   :  { %158 = vmatpush.msra.mxu1 %v121_v17  ;;  %323 = vmatmul.f32.vlgmr.msrb.gmra.mxu2 %v242_v9 }
  0x13   :  { %464 = vmatpush.xpose.msrb.mxu2 %v244_v20 }
  0x14   :  { %159 = vmatpush.msra.mxu1 %v120_v19  ;;  %345 = vmatmul.f32.vlgmr.msrb.gmra.mxu3 %v231_v10 }
  0x15   :  { %484 = vmatpush.xpose.msrb.mxu3 %v245_v21 }
  0x16   :  { %160 = vmatpush.msra.mxu1 %v119_v22  ;;  %365 = vmatmul.f32.vlgmr.msra.gmra.mxu0 %v232_v15 }
  0x17   :  { %644 = vmatmul.msk.f32.vlgmr.msra.gmra.mxu1 %vm132_vm1, %v115_v23  ;;  %504 = vmatpush.xpose.msra.mxu0 %v246_v24 }
  0x1a   :  { %385 = vmatmul.f32.vlgmr.msra.gmra.mxu2 %v233_v12 }
  0x1b   :  { %526 = vmatpush.xpose.msra.mxu2 %v235_v25 }
  0x1c   :  { %405 = vmatmul.f32.vlgmr.msra.gmra.mxu3 %v234_v14 }
  0x1d   :  { %546 = vmatpush.xpose.msra.mxu3 %v236_v26 }
  0x1e   :  { %445 = vmatmul.f32.vlgmr.msrb.gmra.mxu0 %v243_v18 }
  0x1f   :  { %645 = vmatmul.msk.f32.gmra.mxu1 %vm132_vm1, %v116_v28  ;;  %566 = vmatpush.xpose.msrb.mxu0 %v237_v29  ;;  %v202_v28 = vld [vmem:[%s928_s7 + $0x8] sm:$0xff] }
  0x22   :  { %465 = vmatmul.f32.vlgmr.msrb.gmra.mxu2 %v244_v20 }
  0x23   :  { %586 = vmatpush.xpose.msrb.mxu2 %v238_v33 }
  0x24   :  { %485 = vmatmul.f32.vlgmr.msrb.gmra.mxu3 %v245_v21 }
  0x26   :  { %505 = vmatmul.f32.vlgmr.msra.gmra.mxu0 %v246_v24 }
  0x27   :  { %646 = vmatmul.msk.f32.gmra.mxu1 %vm132_vm1, %v117_v37  ;;  %v204_v37 = vld [vmem:[%s928_s7 + $0x18] sm:$0xff] }
  0x2a   :  { %527 = vmatmul.f32.vlgmr.msra.gmra.mxu2 %v235_v25 }
  0x2c   :  { %547 = vmatmul.f32.vlgmr.msra.gmra.mxu3 %v236_v26 }
  0x2e   :  { %567 = vmatmul.f32.vlgmr.msrb.gmra.mxu0 %v237_v29  ;;  %v205_v29 = vld [vmem:[%s929_s8] sm:$0xff] }
  0x2f   :  { %647 = vmatmul.msk.f32.gmra.mxu1 %vm132_vm1, %v118_v38  ;;  %v208_v38 = vld [vmem:[%s929_s8 + $0x18] sm:$0xff] }
  0x32   :  { %587 = vmatmul.f32.vlgmr.msrb.gmra.mxu2 %v238_v33  ;;  %v207_v33 = vld [vmem:[%s929_s8 + $0x10] sm:$0xff] }
  0x82   :  { %v81_v30 = vpop.f32.mrf.mxu0 }
  0x83   :  { %v82_v32 = vadd.f32 %v665_v27, %v81_v30  ;;  %v201_v27 = vld [vmem:[%s928_s7] sm:$0xff]  ;;  %v206_v30 = vld [vmem:[%s929_s8 + $0x8] sm:$0xff] }
  0x85   :  { %v85_v34 = vsel %vm84_vm2, %v82_v32, -inf  ;;  %v97_v35 = vmul.f32 %v82_v32, %v56_v31  ;;  %v209_v31 = vsub.f32 %v201_v27, %v205_v29 }
  0x86   :  { %86 = vmax.xlane.f32.xlu0 %v85_v34  ;;  %v210_v34 = vsub.f32 %v202_v28, %v206_v30 }
  0x87   :  { %v98_v36 = vsel %vm84_vm2, %v97_v35, 0.0 }
  0x88   :  { %99 = vadd.xlane.f32.xlu1 %v98_v36  ;;  %v213_v36 = vand.u32 2147483647, %v209_v31 }
  0x8b   :  { %v304_v39 = vpop.f32.mrf.mxu0 }
  0x8d   :  { %v264_v40 = vpop.f32.mrf.mxu2 }
  0x8f   :  { %v284_v41 = vpop.f32.mrf.mxu3 }
  0x90   :  { %v285_v45 = vadd.f32 %v284_v41, %v264_v40  ;;  %v212_v40 = vsub.f32 %v204_v37, %v208_v38 }
  0x92   :  { %v327_v52 = vmul.f32 0.00048828125, %v285_v45 }
  0x93   :  { %v366_v43 = vpop.f32.mrf.mxu0 }
  0x94   :  { %v162_v42 = vpop.f32.mrf.mxu1 }
  0x95   :  { %v324_v46 = vpop.f32.mrf.mxu2  ;;  %v163_v56 = vadd.f32 %v666_v51, %v162_v42 }
  0x96   :  { %v325_v55 = vadd.f32 %v324_v46, %v304_v39  ;;  %v214_v39 = vand.u32 2147483647, %v210_v34 }
  0x97   :  { %v346_v48 = vpop.f32.mrf.mxu3  ;;  %v648_v0 = vadd.f32 -1.0, %v163_v56 }
  0x98   :  { %v367_v49 = vadd.f32 %v366_v43, %v346_v48  ;;  %v328_v61 = vmul.f32 0.00048828125, %v325_v55  ;;  %v217_v42 = vadd.f32 %v214_v39, %v213_v36  ;;  %v216_v43 = vand.u32 2147483647, %v212_v40 }
  0x99   :  { %v178_v7 = vmul.f32 %v648_v0, %v648_v0 }
  0x9a   :  { %v409_v53 = vmul.f32 0.00048828125, %v367_v49  ;;  %v611_v49 = vld [vmem:[%s934_s13] sm:$0x3] }
  0x9b   :  { %v183_v14 = vsel %vm182_vm3, %v178_v7, 0.0 }
  0x9c   :  { %v165_v54 = vpop.f32.mrf.mxu1  ;;  %v411_v58 = vsub.f32 %v327_v52, %v409_v53 }
  0x9d   :  { %v166_v57 = vadd.f32 %v666_v51, %v165_v54  ;;  %v386_v59 = vpop.f32.mrf.mxu2 }
  0x9e   :  { %v413_v3 = vand.u32 2147483647, %v411_v58 }
  0x9f   :  { %v406_v60 = vpop.f32.mrf.mxu3  ;;  %v649_v1 = vadd.f32 -1.0, %v166_v57 }
  0xa0   :  { %v407_v62 = vadd.f32 %v406_v60, %v386_v59  ;;  %v415_v11 = vsel %vm60_vm0, %v413_v3, 0.0 }
  0xa1   :  { %v179_v8 = vmul.f32 %v649_v1, %v649_v1 }
  0xa2   :  { %v410_v4 = vmul.f32 0.00048828125, %v407_v62 }
  0xa3   :  { %v184_v15 = vsel %vm182_vm3, %v179_v8, 0.0 }
  0xa4   :  { %v168_v5 = vpop.f32.mrf.mxu1  ;;  %v412_v6 = vsub.f32 %v328_v61, %v410_v4  ;;  %v185_v19 = vadd.f32 %v184_v15, %v183_v14 }
  0xa5   :  { %v169_v9 = vadd.f32 %v666_v51, %v168_v5  ;;  %v466_v48 = vpop.f32.mrf.mxu2 }
  0xa6   :  { %v414_v10 = vand.u32 2147483647, %v412_v6 }
  0xa7   :  { %v650_v12 = vadd.f32 -1.0, %v169_v9  ;;  %v486_v55 = vpop.f32.mrf.mxu3 }
  0xa8   :  { %v416_v13 = vsel %vm60_vm0, %v414_v10, 0.0 }
  0xa9   :  { %v180_v16 = vmul.f32 %v650_v12, %v650_v12  ;;  %v417_v17 = vadd.f32 %v416_v13, %v415_v11 }
  0xab   :  { %v186_v21 = vsel %vm182_vm3, %v180_v16, 0.0 }
  0xac   :  { %v171_v18 = vpop.f32.mrf.mxu1  ;;  %v187_v23 = vadd.f32 %v186_v21, %v185_v19 }
  0xad   :  { %v172_v20 = vadd.f32 %v666_v51, %v171_v18  ;;  %v528_v56 = vpop.f32.mrf.mxu2 }
  0xaf   :  { %v651_v22 = vadd.f32 -1.0, %v172_v20  ;;  %v548_v58 = vpop.f32.mrf.mxu3 }
  0xb1   :  { %v181_v24 = vmul.f32 %v651_v22, %v651_v22 }
  0xb3   :  { %v188_v25 = vsel %vm182_vm3, %v181_v24, 0.0 }
  0xb4   :  { %v189_v26 = vadd.f32 %v188_v25, %v187_v23 }
  0xb5   :  { %v588_v59 = vpop.f32.mrf.mxu2 }
  0xb6   :  { %190 = vadd.xlane.f32.xlu2 %v189_v26 }
  0xf9   :  { %v875_v44 = vpop.xlane.xlu0 %86 }
  0xfa   :  { %v88_v47 = vsub.f32 %v82_v32, %v875_v44  ;;  %v203_v32 = vld [vmem:[%s928_s7 + $0x10] sm:$0xff] }
  0xfb   :  { %v211_v35 = vsub.f32 %v203_v32, %v207_v33  ;;  %v100_v10 = vpop.xlane.xlu1 %99 }
  0xfc   :  { %v89_v50 = vmul.f32 1.442695, %v88_v47  ;;  %v446_v47 = vpop.f32.mrf.mxu0 }
  0xfd   :  { %v215_v41 = vand.u32 2147483647, %v211_v35  ;;  %v467_v61 = vadd.f32 %v466_v48, %v446_v47 }
  0xfe   :  { %667 = vpow2.f32 %v89_v50  ;;  %v612_v50 = vld [vmem:[%s935_s14] sm:$0x3] }
  0xff   :  { %v218_v45 = vadd.f32 %v217_v42, %v215_v41  ;;  %v613_v51 = vsub.f32 %v611_v49, %v612_v50  ;;  %v509_v1 = vmul.f32 0.00048828125, %v467_v61 }
 0x101   :  { %v219_v46 = vadd.f32 %v218_v45, %v216_v43  ;;  %v614_v52 = vand.u32 2147483647, %v613_v51 }
 0x103   :  { %220 = vadd.xlane.f32.xlu2 %v219_v46  ;;  %v616_v53 = vsel %vm615_vm4, %v614_v52, 0.0 }
 0x104   :  { %v668_v63 = vpop.eup %667  ;;  %v506_v54 = vpop.f32.mrf.mxu0 }
 0x105   :  { %v91_v2 = vsel %vm84_vm2, %v668_v63, 0.0  ;;  %v507_v62 = vadd.f32 %v506_v54, %v486_v55  ;;  %v549_v63 = vadd.f32 %v548_v58, %v528_v56 }
 0x106   :  { %92 = vadd.xlane.f32.xlu0 %v91_v2 }
 0x107   :  { %v510_v2 = vmul.f32 0.00048828125, %v507_v62  ;;  %v591_v3 = vmul.f32 0.00048828125, %v549_v63 }
 0x109   :  { %v593_v7 = vsub.f32 %v509_v1, %v591_v3 }
 0x10b   :  { %617 = vadd.xlane.f32.xlu2 %v616_v53  ;;  %v595_v12 = vand.u32 2147483647, %v593_v7 }
 0x10c   :  { %v568_v57 = vpop.f32.mrf.mxu0 }
 0x10d   :  { %v589_v0 = vadd.f32 %v588_v59, %v568_v57  ;;  %v597_v15 = vsel %vm60_vm0, %v595_v12, 0.0 }
 0x10e   :  { %418 = vadd.xlane.f32.xlu0 %v417_v17 }
 0x10f   :  { %v592_v4 = vmul.f32 0.00048828125, %v589_v0 }
 0x111   :  { %v594_v8 = vsub.f32 %v510_v2, %v592_v4 }
 0x113   :  { %v596_v13 = vand.u32 2147483647, %v594_v8 }
 0x115   :  { %v598_v16 = vsel %vm60_vm0, %v596_v13, 0.0 }
 0x116   :  { %v599_v17 = vadd.f32 %v598_v16, %v597_v15 }
 0x129   :  { %v191_v18 = vpop.xlane.xlu2 %190 }
 0x12a   :  { %v192_v21 = vrot.slane %v191_v18, 4 }
 0x176   :  { %v221_v19 = vpop.xlane.xlu2 %220 }
 0x177   :  { %v222_v22 = vrot.slane %v221_v19, 4 }
 0x179   :  { %v93_v60 = vpop.xlane.xlu0 %92  ;;  %v223_v24 = vadd.f32 %v222_v22, %v221_v19 }
 0x17a   :  { %669 = vlog2.f32 %v93_v60 }
 0x17b   :  { %v224_v30 = vrot.slane %v223_v24, 2 }
 0x17d   :  { %v225_v37 = vadd.f32 %v224_v30, %v223_v24 }
 0x17e   :  { %v618_v25 = vpop.xlane.xlu2 %617 }
 0x17f   :  { %v619_v29 = vrot.slane %v618_v25, 4  ;;  %v226_v46 = vrot.slane %v225_v37, 1 }
 0x180   :  { %v670_v5 = vpop.eup %669 }
 0x181   :  { %v95_v6 = vmul.f32 0.6931472, %v670_v5  ;;  %v419_v20 = vpop.xlane.xlu0 %418  ;;  %v620_v34 = vadd.f32 %v619_v29, %v618_v25  ;;  %v227_v53 = vadd.f32 %v226_v46, %v225_v37 }
 0x182   :  { %v420_v23 = vrot.slane %v419_v20, 4 }
 0x183   :  { %v96_v9 = vadd.f32 %v95_v6, %v875_v44  ;;  %v193_v44 = vadd.f32 %v192_v21, %v191_v18  ;;  %v621_v40 = vrot.slane %v620_v34, 2 }
 0x184   :  { %v421_v26 = vadd.f32 %v420_v23, %v419_v20 }
 0x185   :  { %v101_v11 = vsub.f32 %v96_v9, %v100_v10  ;;  %v194_v27 = vrot.slane %v193_v44, 2  ;;  %v622_v50 = vadd.f32 %v621_v40, %v620_v34 }
 0x186   :  { %v422_v32 = vrot.slane %v421_v26, 2 }
 0x187   :  { %v103_v14 = vsel %vm102_vm5, %v101_v11, 0.0  ;;  %v195_v35 = vadd.f32 %v194_v27, %v193_v44  ;;  %v623_v56 = vrot.slane %v622_v50, 1 }
 0x188   :  { %104 = vadd.xlane.f32.xlu1 %v103_v14  ;;  %v423_v38 = vadd.f32 %v422_v32, %v421_v26 }
 0x189   :  { %v196_v42 = vrot.slane %v195_v35, 1  ;;  %v624_v59 = vadd.f32 %v623_v56, %v622_v50 }
 0x18a   :  { %v424_v47 = vrot.slane %v423_v38, 1 }
 0x18b   :  { %v197_v51 = vadd.f32 %v196_v42, %v195_v35 }
 0x18c   :  { %v425_v54 = vadd.f32 %v424_v47, %v423_v38 }
 0x190   :  { %600 = vadd.xlane.f32.xlu1 %v599_v17 }
 0x1fb   :  { %v105_v28 = vpop.xlane.xlu1 %104 }
 0x1fc   :  { %v106_v31 = vrot.slane %v105_v28, 4 }
 0x1fe   :  { %v107_v33 = vadd.f32 %v106_v31, %v105_v28 }
 0x200   :  { %v108_v36 = vrot.slane %v107_v33, 2 }
 0x202   :  { %v109_v39 = vadd.f32 %v108_v36, %v107_v33 }
 0x203   :  { %v601_v41 = vpop.xlane.xlu1 %600 }
 0x204   :  { %v602_v43 = vrot.slane %v601_v41, 4  ;;  %v110_v45 = vrot.slane %v109_v39, 1 }
 0x206   :  { %v603_v48 = vadd.f32 %v602_v43, %v601_v41  ;;  %v111_v49 = vadd.f32 %v110_v45, %v109_v39 }
 0x208   :  { %v604_v52 = vrot.slane %v603_v48, 2  ;;  %652 = vpush %v111_v49 }
 0x209   :  { %654 = vpush %v197_v51 }
 0x20a   :  { %v605_v55 = vadd.f32 %v604_v52, %v603_v48  ;;  %656 = vpush %v227_v53 }
 0x20b   :  { %658 = vpush %v425_v54 }
 0x20c   :  { %v606_v57 = vrot.slane %v605_v55, 1 }
 0x20e   :  { %v607_v58 = vadd.f32 %v606_v57, %v605_v55 }
 0x210   :  { %660 = vpush %v607_v58 }
 0x211   :  { %662 = vpush %v624_v59 }
 0x239   :  { %s653_s8 = spop %652 }
 0x23a   :  { %114 = sst [smem:[#allocation3]] %s653_s8  ;;  %s655_s13 = spop %654 }
 0x23b   :  { %200 = sst [smem:[#allocation3 + $0x1]] %s655_s13  ;;  %s657_s14 = spop %656 }
 0x23c   :  { %230 = sst [smem:[#allocation3 + $0x2]] %s657_s14  ;;  %s659_s19 = spop %658 }
 0x23d   :  { %428 = sst [smem:[#allocation3 + $0x3]] %s659_s19 }
 0x241   :  { %s661_s22 = spop %660 }
 0x242   :  { %610 = sst [smem:[#allocation3 + $0x4]] %s661_s22  ;;  %s663_s3 = spop %662 }
 0x243   :  { %627 = sst [smem:[#allocation3 + $0x5]] %s663_s3 }
 0x244   :  { %636 = dma.smem_to_vmem %s685_s10, 16, %s634_s21, [#allocation4]  }
 0x245   :  { %683 = dma.done.wait [#allocation4], 16  }
 0x246   :  { %684 = vsyncadd [#allocation4], 4294967280 }
 0x247   :  { %641 = sfence }
 0x248   :  { %642 = vsyncpa [#allocation4], 1 }

</bundles_post_ra>
